<compile_context>
chip_gen: v5e
topology: v5e:2x2
jax: 0.10.0
libtpu: 0.0.40
codegen_flags: <defaults>
</compile_context>

<pallas_src>
import functools

import jax
import jax.numpy as jnp
from jax.experimental import pallas as pl
from jax.experimental.pallas import tpu as pltpu


# ---------------------------------------------------------------------------
# Kernel 1: per-token projections.
#   LayerNorm -> one fused matmul against [Wh | Wqk] -> SiLU -> split into
#   v / gate / z -> gamma/beta affine -> q (scaled by 1/S), k, v, gate (bf16).
# Runs exactly once per token: no K-side recompute in the attention kernel.
# ---------------------------------------------------------------------------
def gau_proj_kernel(x_ref, ln_g_ref, ln_b_ref, w_ref, b_ref, gamma_ref,
                    beta_ref, q_ref, k_ref, v_ref, gate_ref,
                    *, hidden, inv_seq_len):
    xf = x_ref[...].astype(jnp.float32)
    mu = jnp.mean(xf, axis=-1, keepdims=True)
    var = jnp.mean((xf - mu) ** 2, axis=-1, keepdims=True)
    nx = (xf - mu) * jax.lax.rsqrt(var + 1e-5) * ln_g_ref[...] + ln_b_ref[...]

    # Single wide MXU matmul; the whole fused output goes through SiLU
    # (both nn.Sequential branches of the module end in SiLU).
    p = jnp.dot(nx.astype(jnp.bfloat16), w_ref[...],
                preferred_element_type=jnp.float32) + b_ref[...]
    p = p * jax.nn.sigmoid(p)                       # SiLU over [v | gate | z]

    # hidden / 2*hidden offsets are 128-aligned for typical in_features, so
    # these are lane-aligned slices (no VMEM re-layout).
    v_ref[...] = p[:, :hidden].astype(jnp.bfloat16)
    gate_ref[...] = p[:, hidden:2 * hidden].astype(jnp.bfloat16)
    z = p[:, 2 * hidden:]
    # Fold the 1/seq_len scale of sim into q.
    q_ref[...] = ((z * gamma_ref[0:1, :] + beta_ref[0:1, :])
                  * inv_seq_len).astype(jnp.bfloat16)
    k_ref[...] = (z * gamma_ref[1:2, :] + beta_ref[1:2, :]).astype(jnp.bfloat16)


# ---------------------------------------------------------------------------
# Kernel 2: attention + gating + output projection + residual.
#   grid = (B, S//TQ, S//TK); the only S^2-class temporary is the (TQ, TK)
#   attention tile plus a (TQ, H) f32 accumulator.  A = relu(sim)^2 has no
#   softmax normalization, so accumulating A @ v over K tiles is exact.
# ---------------------------------------------------------------------------
def gau_attn_kernel(xq_ref, q_ref, gate_ref, k_ref, v_ref, wout_ref, bout_ref,
                    o_ref, acc_ref):
    ki = pl.program_id(2)

    @pl.when(ki == 0)
    def _():
        acc_ref[...] = jnp.zeros_like(acc_ref)

    # sim = q k^T : contract the last dims (no explicit transpose of k).
    sim = jax.lax.dot_general(
        q_ref[...], k_ref[...],
        dimension_numbers=(((1,), (1,)), ((), ())),
        preferred_element_type=jnp.float32)          # (TQ, TK) f32
    a = jnp.maximum(sim, 0.0)
    A = a * a
    # Dropout(p=0.0) is identity.

    acc_ref[...] += jnp.dot(A.astype(jnp.bfloat16), v_ref[...],
                            preferred_element_type=jnp.float32)  # (TQ, H) f32

    @pl.when(ki == pl.num_programs(2) - 1)
    def _():
        V = (acc_ref[...] * gate_ref[...].astype(jnp.float32)).astype(jnp.bfloat16)
        out = jnp.dot(V, wout_ref[...],
                      preferred_element_type=jnp.float32) + bout_ref[...]
        out = out + xq_ref[...].astype(jnp.float32)   # skip_connect
        o_ref[...] = out.astype(o_ref.dtype)


def _pick_tile(requested, size, align=128):
    """Largest tile <= requested that divides `size`; prefers lane-dense
    (128-multiple) tiles, then sublane multiples (8), else the full extent."""
    t = min(requested, size)
    if t >= size:
        return size
    for a in (align, 8):
        tt = (t // a) * a
        while tt >= a:
            if size % tt == 0:
                return tt
            tt -= a
    return size


def _device_defaults():
    """(tq, tk, vmem_limit_bytes) derived from the local TPU generation."""
    vmem = None
    try:  # narrow hardware query only; never selects a different kernel config
        info = pltpu.get_tpu_info()
        vmem = int(getattr(info, "vmem_capacity_bytes", 0)) or None
    except Exception:
        vmem = None
    if vmem is None:
        vmem = 64 * 1024 * 1024            # conservative (v7x-sized) assumption
    if vmem >= 100 * 1024 * 1024:          # v5e / v6e: 128 MiB physical VMEM
        return 512, 1024, 100 * 1024 * 1024
    return 256, 512, 48 * 1024 * 1024      # v7x: 64 MiB physical VMEM


def gau_forward(x, params, *, tq=None, tk=None, vmem_limit_bytes=None):
    """GAU forward pass.  x: (B, S, D) f32."""
    B, S, D = x.shape
    (ln_g, ln_b, wh, bh, wqk, bqk, gamma, beta, wout, bout) = params
    two_h = wh.shape[1]
    hidden = two_h // 2
    dqk = wqk.shape[1]
    proj_dim = two_h + dqk

    d_tq, d_tk, d_vmem = _device_defaults()
    tq = d_tq if tq is None else tq
    tk = d_tk if tk is None else tk
    vmem_limit_bytes = d_vmem if vmem_limit_bytes is None else vmem_limit_bytes

    tq = _pick_tile(tq, S)
    tk = _pick_tile(tk, S)
    tp = tq                                 # prologue seq tile
    nq, nk, np_ = S // tq, S // tk, S // tp

    # Pre-concatenate weights so the prologue does ONE fused matmul whose
    # output splits directly into [v | gate | z].  Weights go to HBM as bf16.
    w_all = jnp.concatenate([wh, wqk], axis=1).astype(jnp.bfloat16)   # (D, 2H+dqk)
    b_all = jnp.concatenate([bh, bqk], axis=1).astype(jnp.float32)    # (1, 2H+dqk)
    wout_b = wout.astype(jnp.bfloat16)

    inv_seq_len = 1.0 / float(S)

    # ---- Prologue: q / k / v / gate, once per token. -------------------------
    proj_cost = pl.CostEstimate(
        flops=int(B * S * (2 * D * proj_dim + 8 * D + 6 * proj_dim)),
        transcendentals=int(B * S * proj_dim),
        bytes_accessed=int(4 * B * S * D + 2 * B * S * proj_dim
                           + 2 * D * proj_dim + 4 * proj_dim
                           + 8 * D + 16 * dqk),
    )
    proj = pl.pallas_call(
        functools.partial(gau_proj_kernel, hidden=hidden,
                          inv_seq_len=inv_seq_len),
        out_shape=(
            jax.ShapeDtypeStruct((B, S, dqk), jnp.bfloat16),     # q (pre-scaled)
            jax.ShapeDtypeStruct((B, S, dqk), jnp.bfloat16),     # k
            jax.ShapeDtypeStruct((B, S, hidden), jnp.bfloat16),  # v
            jax.ShapeDtypeStruct((B, S, hidden), jnp.bfloat16),  # gate
        ),
        grid_spec=pltpu.PrefetchScalarGridSpec(
            num_scalar_prefetch=0,
            grid=(B, np_),
            in_specs=[
                pl.BlockSpec((None, tp, D), lambda b, i: (b, i, 0)),   # x
                pl.BlockSpec((1, D), lambda b, i: (0, 0)),             # LN gamma
                pl.BlockSpec((1, D), lambda b, i: (0, 0)),             # LN beta
                pl.BlockSpec((D, proj_dim), lambda b, i: (0, 0)),      # [Wh|Wqk] bf16
                pl.BlockSpec((1, proj_dim), lambda b, i: (0, 0)),      # [bh|bqk]
                pl.BlockSpec((2, dqk), lambda b, i: (0, 0)),           # gamma
                pl.BlockSpec((2, dqk), lambda b, i: (0, 0)),           # beta
            ],
            out_specs=(
                pl.BlockSpec((None, tp, dqk), lambda b, i: (b, i, 0)),
                pl.BlockSpec((None, tp, dqk), lambda b, i: (b, i, 0)),
                pl.BlockSpec((None, tp, hidden), lambda b, i: (b, i, 0)),
                pl.BlockSpec((None, tp, hidden), lambda b, i: (b, i, 0)),
            )),
        compiler_params=pltpu.CompilerParams(
            dimension_semantics=("parallel", "parallel"),
            vmem_limit_bytes=vmem_limit_bytes),
        cost_estimate=proj_cost,
    )
    q, k, v, gate = proj(x, ln_g.astype(jnp.float32), ln_b.astype(jnp.float32),
                         w_all, b_all, gamma.astype(jnp.float32),
                         beta.astype(jnp.float32))

    # ---- Attention + gate + output projection + residual. --------------------
    attn_cost = pl.CostEstimate(
        flops=int(B * (2 * S * S * dqk + 2 * S * S * hidden
                       + 2 * S * hidden * D + 3 * S * S)),
        transcendentals=0,
        bytes_accessed=int(2 * B * nq * S * (dqk + hidden)   # k/v per Q tile
                           + 2 * B * S * (dqk + hidden)      # q/gate
                           + 8 * B * S * D                   # x residual + out
                           + 2 * hidden * D + 4 * D),
    )
    attn = pl.pallas_call(
        gau_attn_kernel,
        out_shape=jax.ShapeDtypeStruct((B, S, D), x.dtype),
        grid_spec=pltpu.PrefetchScalarGridSpec(
            num_scalar_prefetch=0,
            grid=(B, nq, nk),
            in_specs=[
                pl.BlockSpec((None, tq, D), lambda b, qi, ki: (b, qi, 0)),      # x
                pl.BlockSpec((None, tq, dqk), lambda b, qi, ki: (b, qi, 0)),    # q
                pl.BlockSpec((None, tq, hidden), lambda b, qi, ki: (b, qi, 0)), # gate
                pl.BlockSpec((None, tk, dqk), lambda b, qi, ki: (b, ki, 0)),    # k
                pl.BlockSpec((None, tk, hidden), lambda b, qi, ki: (b, ki, 0)), # v
                pl.BlockSpec((hidden, D), lambda b, qi, ki: (0, 0)),            # W_out bf16
                pl.BlockSpec((1, D), lambda b, qi, ki: (0, 0)),                 # b_out
            ],
            out_specs=pl.BlockSpec((None, tq, D), lambda b, qi, ki: (b, qi, 0)),
            scratch_shapes=[pltpu.VMEM((tq, hidden), jnp.float32)]),   # A @ v acc
        compiler_params=pltpu.CompilerParams(
            dimension_semantics=("parallel", "parallel", "arbitrary"),
            vmem_limit_bytes=vmem_limit_bytes),
        cost_estimate=attn_cost,
    )
    return attn(x, q, gate, k, v, wout_b, bout.astype(jnp.float32))


def gau_reference(x, params):
    """Pure-JAX f32 reference mirroring the PyTorch module semantics."""
    (ln_g, ln_b, wh, bh, wqk, bqk, gamma, beta, wout, bout) = params
    S = x.shape[-2]
    mu = jnp.mean(x, axis=-1, keepdims=True)
    var = jnp.mean((x - mu) ** 2, axis=-1, keepdims=True)
    nx = (x - mu) * jax.lax.rsqrt(var + 1e-5) * ln_g[0] + ln_b[0]
    h = nx @ wh + bh[0]
    h = h * jax.nn.sigmoid(h)
    v, gate = jnp.split(h, 2, axis=-1)
    z = nx @ wqk + bqk[0]
    z = z * jax.nn.sigmoid(z)
    qk = z[..., None, :] * gamma + beta          # (..., 2, Dqk)
    q, k = qk[..., 0, :], qk[..., 1, :]
    sim = jnp.einsum("bid,bjd->bij", q, k) / S
    A = jnp.maximum(sim, 0.0) ** 2
    V = jnp.einsum("bij,bjd->bid", A, v) * gate
    return V @ wout + bout[0] + x


def init_params(key, in_features, query_key_dim=128, expansion_factor=2.0):
    hidden = int(expansion_factor) * in_features
    ks = jax.random.split(key, 8)

    def lin(k, fan_in, shape):          # PyTorch-style Linear init
        bound = float(fan_in) ** -0.5
        return jax.random.uniform(k, shape, dtype=jnp.float32,
                                  minval=-bound, maxval=bound)

    ln_g = jnp.ones((1, in_features), jnp.float32)
    ln_b = jnp.zeros((1, in_features), jnp.float32)
    wh = lin(ks[0], in_features, (in_features, hidden * 2))
    bh = lin(ks[1], in_features, (1, hidden * 2))
    wqk = lin(ks[2], in_features, (in_features, query_key_dim))
    bqk = lin(ks[3], in_features, (1, query_key_dim))
    # Larger than the module's std=0.02 init so the attention path contributes
    # visibly to the output in the correctness check below.
    gamma = 0.5 * jax.random.normal(ks[4], (2, query_key_dim), jnp.float32)
    beta = 0.5 * jax.random.normal(ks[5], (2, query_key_dim), jnp.float32)
    wout = lin(ks[6], hidden, (hidden, in_features))
    bout = lin(ks[7], hidden, (1, in_features))
    return (ln_g, ln_b, wh, bh, wqk, bqk, gamma, beta, wout, bout)


if __name__ == "__main__":
    # 128-lane-aligned small config: B=2, seq=256, in_features=128 -> hidden=256.
    B, S, D = 2, 256, 128
    QK_DIM = 128
    key = jax.random.PRNGKey(0)
    kx, kp = jax.random.split(key)
    x = jax.random.normal(kx, (B, S, D), dtype=jnp.float32)
    params = init_params(kp, D, query_key_dim=QK_DIM, expansion_factor=2.0)

    # tq=tk=128 -> attention grid (2, 2, 2): exercises multi-tile accumulation
    # over K tiles and per-Q-tile streaming of the precomputed bf16 q/gate.
    out = gau_forward(x, params, tq=128, tk=128)
    out = jax.block_until_ready(out)

    ref = gau_reference(x, params)
    assert out.shape == (B, S, D)
    max_err = float(jnp.max(jnp.abs(out - ref)))
    # bf16 MXU operands / bf16 intermediate q,k,v,gate (f32 accumulation)
    # -> relaxed tolerance vs the f32 reference.
    assert jnp.allclose(out, ref, atol=2e-2, rtol=2e-2), (
        f"mismatch vs JAX reference (max abs err {max_err:.3e})")

    print("KERNEL_OK")
</pallas_src>

<mosaic_0001>
module attributes {stable_mosaic.version = 11 : i64} {
  func.func @gau_proj_kernel(%arg0: i32, %arg1: i32, %arg2: memref<1x128x128xf32, #tpu.memory_space<vmem>>, %arg3: memref<1x128xf32, #tpu.memory_space<vmem>>, %arg4: memref<1x128xf32, #tpu.memory_space<vmem>>, %arg5: memref<128x640xbf16, #tpu.memory_space<vmem>>, %arg6: memref<1x640xf32, #tpu.memory_space<vmem>>, %arg7: memref<2x128xf32, #tpu.memory_space<vmem>>, %arg8: memref<2x128xf32, #tpu.memory_space<vmem>>, %arg9: memref<1x128x128xbf16, #tpu.memory_space<vmem>>, %arg10: memref<1x128x128xbf16, #tpu.memory_space<vmem>>, %arg11: memref<1x128x256xbf16, #tpu.memory_space<vmem>>, %arg12: memref<1x128x256xbf16, #tpu.memory_space<vmem>>) attributes {dimension_semantics = [#tpu.dimension_semantics<parallel>, #tpu.dimension_semantics<parallel>], iteration_bounds = array<i64: 2, 2>, scalar_prefetch = 0 : i64, scratch_operands = 0 : i64, tpu.core_type = #tpu.core_type<tc>, window_params = [{transform_indices = @transform_0, window_bounds = array<i64: 1, 128, 128>}, {pipeline_mode = #tpu.pipeline_mode<synchronous>, transform_indices = @transform_1, window_bounds = array<i64: 1, 128>}, {pipeline_mode = #tpu.pipeline_mode<synchronous>, transform_indices = @transform_2, window_bounds = array<i64: 1, 128>}, {pipeline_mode = #tpu.pipeline_mode<synchronous>, transform_indices = @transform_3, window_bounds = array<i64: 128, 640>}, {pipeline_mode = #tpu.pipeline_mode<synchronous>, transform_indices = @transform_4, window_bounds = array<i64: 1, 640>}, {pipeline_mode = #tpu.pipeline_mode<synchronous>, transform_indices = @transform_5, window_bounds = array<i64: 2, 128>}, {pipeline_mode = #tpu.pipeline_mode<synchronous>, transform_indices = @transform_6, window_bounds = array<i64: 2, 128>}, {transform_indices = @transform_7, window_bounds = array<i64: 1, 128, 128>}, {transform_indices = @transform_8, window_bounds = array<i64: 1, 128, 128>}, {transform_indices = @transform_9, window_bounds = array<i64: 1, 128, 256>}, {transform_indices = @transform_10, window_bounds = array<i64: 1, 128, 256>}]} {
    %c0 = arith.constant 0 : index
    %c0_0 = arith.constant 0 : index
    %c0_1 = arith.constant 0 : index
    %0 = vector.load %arg2[%c0, %c0_0, %c0_1] : memref<1x128x128xf32, #tpu.memory_space<vmem>>, vector<1x128x128xf32>
    %1 = vector.shape_cast %0 : vector<1x128x128xf32> to vector<128x128xf32>
    %cst = arith.constant dense<0.000000e+00> : vector<128xf32>
    %2 = vector.multi_reduction <add>, %1, %cst [1] : vector<128x128xf32> to vector<128xf32>
    %3 = vector.shape_cast %2 : vector<128xf32> to vector<128x1xf32>
    %cst_2 = arith.constant 1.280000e+02 : f32
    %4 = vector.broadcast %cst_2 : f32 to vector<128x1xf32>
    %5 = arith.divf %3, %4 : vector<128x1xf32>
    %6 = vector.broadcast %5 : vector<128x1xf32> to vector<128x128xf32>
    %7 = arith.subf %1, %6 : vector<128x128xf32>
    %8 = arith.mulf %7, %7 : vector<128x128xf32>
    %cst_3 = arith.constant dense<0.000000e+00> : vector<128xf32>
    %9 = vector.multi_reduction <add>, %8, %cst_3 [1] : vector<128x128xf32> to vector<128xf32>
    %10 = vector.shape_cast %9 : vector<128xf32> to vector<128x1xf32>
    %cst_4 = arith.constant 1.280000e+02 : f32
    %11 = vector.broadcast %cst_4 : f32 to vector<128x1xf32>
    %12 = arith.divf %10, %11 : vector<128x1xf32>
    %13 = vector.broadcast %5 : vector<128x1xf32> to vector<128x128xf32>
    %14 = arith.subf %1, %13 : vector<128x128xf32>
    %cst_5 = arith.constant 9.99999974E-6 : f32
    %15 = vector.broadcast %cst_5 : f32 to vector<128x1xf32>
    %16 = arith.addf %12, %15 : vector<128x1xf32>
    %17 = math.rsqrt %16 : vector<128x1xf32>
    %18 = vector.broadcast %17 : vector<128x1xf32> to vector<128x128xf32>
    %19 = arith.mulf %14, %18 : vector<128x128xf32>
    %c0_6 = arith.constant 0 : index
    %c0_7 = arith.constant 0 : index
    %20 = vector.load %arg3[%c0_6, %c0_7] : memref<1x128xf32, #tpu.memory_space<vmem>>, vector<1x128xf32>
    %21 = vector.broadcast %20 : vector<1x128xf32> to vector<128x128xf32>
    %22 = arith.mulf %19, %21 : vector<128x128xf32>
    %c0_8 = arith.constant 0 : index
    %c0_9 = arith.constant 0 : index
    %23 = vector.load %arg4[%c0_8, %c0_9] : memref<1x128xf32, #tpu.memory_space<vmem>>, vector<1x128xf32>
    %24 = vector.broadcast %23 : vector<1x128xf32> to vector<128x128xf32>
    %25 = arith.addf %22, %24 : vector<128x128xf32>
    %26 = arith.truncf %25 : vector<128x128xf32> to vector<128x128xbf16>
    %c0_10 = arith.constant 0 : index
    %c0_11 = arith.constant 0 : index
    %27 = vector.load %arg5[%c0_10, %c0_11] : memref<128x640xbf16, #tpu.memory_space<vmem>>, vector<128x640xbf16>
    %cst_12 = arith.constant dense<0.000000e+00> : vector<128x640xf32>
    %28 = tpu.matmul %26, %27, %cst_12 {dimension_numbers = #tpu.dot_dimension_numbers<[1], [0], [0], [1], [0, 0, 1, 1], [], []>} : vector<128x128xbf16>, vector<128x640xbf16>, vector<128x640xf32> -> vector<128x640xf32>
    %c0_13 = arith.constant 0 : index
    %c0_14 = arith.constant 0 : index
    %29 = vector.load %arg6[%c0_13, %c0_14] : memref<1x640xf32, #tpu.memory_space<vmem>>, vector<1x640xf32>
    %30 = vector.broadcast %29 : vector<1x640xf32> to vector<128x640xf32>
    %31 = arith.addf %28, %30 : vector<128x640xf32>
    %32 = arith.negf %31 : vector<128x640xf32>
    %33 = math.exp %32 : vector<128x640xf32>
    %cst_15 = arith.constant 1.000000e+00 : f32
    %34 = vector.broadcast %cst_15 : f32 to vector<128x640xf32>
    %35 = arith.addf %34, %33 : vector<128x640xf32>
    %36 = arith.divf %34, %35 : vector<128x640xf32>
    %37 = arith.mulf %31, %36 : vector<128x640xf32>
    %38 = vector.extract_strided_slice %37 {offsets = [0, 0], sizes = [128, 256], strides = [1, 1]} : vector<128x640xf32> to vector<128x256xf32>
    %39 = arith.truncf %38 : vector<128x256xf32> to vector<128x256xbf16>
    %c0_16 = arith.constant 0 : index
    %c0_17 = arith.constant 0 : index
    %c0_18 = arith.constant 0 : index
    %40 = vector.load %arg11[%c0_16, %c0_17, %c0_18] : memref<1x128x256xbf16, #tpu.memory_space<vmem>>, vector<1x128x256xbf16>
    %41 = vector.shape_cast %40 : vector<1x128x256xbf16> to vector<128x256xbf16>
    %42 = vector.shape_cast %39 : vector<128x256xbf16> to vector<1x128x256xbf16>
    tpu.vector_store %arg11[%c0_16, %c0_17, %c0_18], %42 {strides = array<i32>} : memref<1x128x256xbf16, #tpu.memory_space<vmem>>, vector<1x128x256xbf16>,
    %43 = vector.extract_strided_slice %37 {offsets = [0, 256], sizes = [128, 256], strides = [1, 1]} : vector<128x640xf32> to vector<128x256xf32>
    %44 = arith.truncf %43 : vector<128x256xf32> to vector<128x256xbf16>
    %c0_19 = arith.constant 0 : index
    %c0_20 = arith.constant 0 : index
    %c0_21 = arith.constant 0 : index
    %45 = vector.load %arg12[%c0_19, %c0_20, %c0_21] : memref<1x128x256xbf16, #tpu.memory_space<vmem>>, vector<1x128x256xbf16>
    %46 = vector.shape_cast %45 : vector<1x128x256xbf16> to vector<128x256xbf16>
    %47 = vector.shape_cast %44 : vector<128x256xbf16> to vector<1x128x256xbf16>
    tpu.vector_store %arg12[%c0_19, %c0_20, %c0_21], %47 {strides = array<i32>} : memref<1x128x256xbf16, #tpu.memory_space<vmem>>, vector<1x128x256xbf16>,
    %48 = vector.extract_strided_slice %37 {offsets = [0, 512], sizes = [128, 128], strides = [1, 1]} : vector<128x640xf32> to vector<128x128xf32>
    %c0_22 = arith.constant 0 : index
    %c0_23 = arith.constant 0 : index
    %49 = vector.load %arg7[%c0_22, %c0_23] : memref<2x128xf32, #tpu.memory_space<vmem>>, vector<1x128xf32>
    %50 = vector.broadcast %49 : vector<1x128xf32> to vector<128x128xf32>
    %51 = arith.mulf %48, %50 : vector<128x128xf32>
    %c0_24 = arith.constant 0 : index
    %c0_25 = arith.constant 0 : index
    %52 = vector.load %arg8[%c0_24, %c0_25] : memref<2x128xf32, #tpu.memory_space<vmem>>, vector<1x128xf32>
    %53 = vector.broadcast %52 : vector<1x128xf32> to vector<128x128xf32>
    %54 = arith.addf %51, %53 : vector<128x128xf32>
    %cst_26 = arith.constant 3.906250e-03 : f32
    %55 = vector.broadcast %cst_26 : f32 to vector<128x128xf32>
    %56 = arith.mulf %54, %55 : vector<128x128xf32>
    %57 = arith.truncf %56 : vector<128x128xf32> to vector<128x128xbf16>
    %c0_27 = arith.constant 0 : index
    %c0_28 = arith.constant 0 : index
    %c0_29 = arith.constant 0 : index
    %58 = vector.load %arg9[%c0_27, %c0_28, %c0_29] : memref<1x128x128xbf16, #tpu.memory_space<vmem>>, vector<1x128x128xbf16>
    %59 = vector.shape_cast %58 : vector<1x128x128xbf16> to vector<128x128xbf16>
    %60 = vector.shape_cast %57 : vector<128x128xbf16> to vector<1x128x128xbf16>
    tpu.vector_store %arg9[%c0_27, %c0_28, %c0_29], %60 {strides = array<i32>} : memref<1x128x128xbf16, #tpu.memory_space<vmem>>, vector<1x128x128xbf16>,
    %c1 = arith.constant 1 : index
    %c0_30 = arith.constant 0 : index
    %61 = vector.load %arg7[%c1, %c0_30] : memref<2x128xf32, #tpu.memory_space<vmem>>, vector<1x128xf32>
    %62 = vector.broadcast %61 : vector<1x128xf32> to vector<128x128xf32>
    %63 = arith.mulf %48, %62 : vector<128x128xf32>
    %c1_31 = arith.constant 1 : index
    %c0_32 = arith.constant 0 : index
    %64 = vector.load %arg8[%c1_31, %c0_32] : memref<2x128xf32, #tpu.memory_space<vmem>>, vector<1x128xf32>
    %65 = vector.broadcast %64 : vector<1x128xf32> to vector<128x128xf32>
    %66 = arith.addf %63, %65 : vector<128x128xf32>
    %67 = arith.truncf %66 : vector<128x128xf32> to vector<128x128xbf16>
    %c0_33 = arith.constant 0 : index
    %c0_34 = arith.constant 0 : index
    %c0_35 = arith.constant 0 : index
    %68 = vector.load %arg10[%c0_33, %c0_34, %c0_35] : memref<1x128x128xbf16, #tpu.memory_space<vmem>>, vector<1x128x128xbf16>
    %69 = vector.shape_cast %68 : vector<1x128x128xbf16> to vector<128x128xbf16>
    %70 = vector.shape_cast %67 : vector<128x128xbf16> to vector<1x128x128xbf16>
    tpu.vector_store %arg10[%c0_33, %c0_34, %c0_35], %70 {strides = array<i32>} : memref<1x128x128xbf16, #tpu.memory_space<vmem>>, vector<1x128x128xbf16>,
    return
  }
  func.func @transform_0(%arg0: i32, %arg1: i32) -> (i32, i32, i32) {
    %c0_i32 = arith.constant 0 : i32
    %c0_i32_0 = arith.constant 0 : i32
    return %arg0, %arg1, %c0_i32 : i32, i32, i32
  }
  func.func @transform_1(%arg0: i32, %arg1: i32) -> (i32, i32) {
    %c0_i32 = arith.constant 0 : i32
    %c0_i32_0 = arith.constant 0 : i32
    %c0_i32_1 = arith.constant 0 : i32
    return %c0_i32, %c0_i32_0 : i32, i32
  }
  func.func @transform_2(%arg0: i32, %arg1: i32) -> (i32, i32) {
    %c0_i32 = arith.constant 0 : i32
    %c0_i32_0 = arith.constant 0 : i32
    %c0_i32_1 = arith.constant 0 : i32
    return %c0_i32, %c0_i32_0 : i32, i32
  }
  func.func @transform_3(%arg0: i32, %arg1: i32) -> (i32, i32) {
    %c0_i32 = arith.constant 0 : i32
    %c0_i32_0 = arith.constant 0 : i32
    %c0_i32_1 = arith.constant 0 : i32
    return %c0_i32, %c0_i32_0 : i32, i32
  }
  func.func @transform_4(%arg0: i32, %arg1: i32) -> (i32, i32) {
    %c0_i32 = arith.constant 0 : i32
    %c0_i32_0 = arith.constant 0 : i32
    %c0_i32_1 = arith.constant 0 : i32
    return %c0_i32, %c0_i32_0 : i32, i32
  }
  func.func @transform_5(%arg0: i32, %arg1: i32) -> (i32, i32) {
    %c0_i32 = arith.constant 0 : i32
    %c0_i32_0 = arith.constant 0 : i32
    %c0_i32_1 = arith.constant 0 : i32
    return %c0_i32, %c0_i32_0 : i32, i32
  }
  func.func @transform_6(%arg0: i32, %arg1: i32) -> (i32, i32) {
    %c0_i32 = arith.constant 0 : i32
    %c0_i32_0 = arith.constant 0 : i32
    %c0_i32_1 = arith.constant 0 : i32
    return %c0_i32, %c0_i32_0 : i32, i32
  }
  func.func @transform_7(%arg0: i32, %arg1: i32) -> (i32, i32, i32) {
    %c0_i32 = arith.constant 0 : i32
    %c0_i32_0 = arith.constant 0 : i32
    return %arg0, %arg1, %c0_i32 : i32, i32, i32
  }
  func.func @transform_8(%arg0: i32, %arg1: i32) -> (i32, i32, i32) {
    %c0_i32 = arith.constant 0 : i32
    %c0_i32_0 = arith.constant 0 : i32
    return %arg0, %arg1, %c0_i32 : i32, i32, i32
  }
  func.func @transform_9(%arg0: i32, %arg1: i32) -> (i32, i32, i32) {
    %c0_i32 = arith.constant 0 : i32
    %c0_i32_0 = arith.constant 0 : i32
    return %arg0, %arg1, %c0_i32 : i32, i32, i32
  }
  func.func @transform_10(%arg0: i32, %arg1: i32) -> (i32, i32, i32) {
    %c0_i32 = arith.constant 0 : i32
    %c0_i32_0 = arith.constant 0 : i32
    return %arg0, %arg1, %c0_i32 : i32, i32, i32
  }
}

</mosaic_0001>

<bundles_post_ra>
// kernel: tpu_custom_call.1
= control target key start
LH: loop header
LB: loop body
LE: loop exit
PB: predicated region body
PF: predicated region fallthrough
CT: control target
= control target key end

     0   :  { %s8220_s0 = inlined_call_operand.hbm [shape: f32[2,256,128], index: 0, kind: input, shape index: {}]   ;;  %s8221_s1 = inlined_call_operand.hbm [shape: f32[1,128], index: 1, kind: input, shape index: {}]   ;;  %s8222_s2 = inlined_call_operand.hbm [shape: f32[1,128], index: 2, kind: input, shape index: {}]   ;;  %s8223_s3 = inlined_call_operand.hbm [shape: bf16[128,640], index: 3, kind: input, shape index: {}]   ;;  %s8224_s4 = inlined_call_operand.hbm [shape: f32[1,640], index: 4, kind: input, shape index: {}]   ;;  %s8225_s5 = inlined_call_operand.vmem [shape: f32[2,128], index: 5, kind: input, shape index: {}]   ;;  %s8226_s6 = inlined_call_operand.vmem [shape: f32[2,128], index: 6, kind: input, shape index: {}]   ;;  %s8227_s7 = inlined_call_operand.hbm [shape: bf16[2,256,128], index: 7, kind: output, shape index: {0}]   ;;  %s8228_s8 = inlined_call_operand.hbm [shape: bf16[2,256,128], index: 8, kind: output, shape index: {1}]   ;;  %s8229_s9 = inlined_call_operand.hbm [shape: bf16[2,256,256], index: 9, kind: output, shape index: {2}]   ;;  %s8230_s10 = inlined_call_operand.hbm [shape: bf16[2,256,256], index: 10, kind: output, shape index: {3}]  }
   0x1   :  { %8249 = sst [smem:[#allocation40_spill]] %s8220_s0 }
   0x2   :  { %8250 = sst [smem:[#allocation41_spill]] %s8221_s1 }
   0x3   :  { %8251 = sst [smem:[#allocation42_spill]] %s8222_s2 }
   0x4   :  { %8252 = sst [smem:[#allocation43_spill]] %s8223_s3 }
   0x5   :  { %8253 = sst [smem:[#allocation44_spill]] %s8224_s4 }
   0x6   :  { %8254 = sst [smem:[#allocation45_spill]] %s8227_s7 }
   0x7   :  { %8255 = sst [smem:[#allocation46_spill]] %s8228_s8 }
   0x8   :  { %8256 = sst [smem:[#allocation47_spill]] %s8229_s9 }
   0x9   :  { %8257 = sst [smem:[#allocation48_spill]] %s8230_s10 }
   0xa   :  { %16 = vsyncpa [#allocation3], 0 }
   0xb   :  { %18 = vsyncpa [#allocation3 + $0x1], 0 }
   0xc   :  { %19 = vsyncpa [#allocation6], 0 }
   0xd   :  { %20 = vsyncpa [#allocation9], 0 }
   0xe   :  { %21 = vsyncpa [#allocation4], 0 }
   0xf   :  { %23 = vsyncpa [#allocation4 + $0x1], 0 }
  0x10   :  { %24 = vsyncpa [#allocation13], 0 }
  0x11   :  { %26 = vsyncpa [#allocation13 + $0x1], 0 }
  0x12   :  { %27 = vsyncpa [#allocation16], 0 }
  0x13   :  { %29 = vsyncpa [#allocation16 + $0x1], 0  ;;  %s4913_s13 = smov 0   ;;  %s4915_s14 = smov 0  }
  0x14   :  { %s4917_s15 = smov 0   ;;  %s4919_s16 = smov 0  }
  0x15   :  { %s4921_s17 = smov 0   ;;  %s4923_s18 = smov 0  }
  0x16   :  { %s4925_s19 = smov 0   ;;  %s4927_s20 = smov 0  }
  0x17 LB: > { %8258 = sst [smem:[#allocation23_spill]] %s4815_s13  ;;  %s4954_s21 = sadd.s32 4294967295, %s4843_s20   ;;  %s4843_s20 = sphi %s4927_s20, %s35_s20   ;;  %s4839_s19 = sphi %s4925_s19, %s8526_s19   ;;  %s4835_s18 = sphi %s4923_s18, %s8525_s18   ;;  %s4831_s17 = sphi %s4921_s17, %s8524_s17   ;;  %s4827_s16 = sphi %s4919_s16, %s8523_s16   ;;  %s4823_s15 = sphi %s4917_s15, %s8522_s15   ;;  %s4819_s14 = sphi %s4915_s14, %s8521_s14   ;;  %s4815_s13 = sphi %s4913_s13, %s8520_s13  }
  0x18   : > { %8259 = sst [smem:[#allocation24_spill]] %s4831_s17  ;;  %s8231_s22 = sadd.s32 4294967294, %s4843_s20  }
  0x19   : > { %p69_p0 = scmp.ne.s32.totalorder %s4819_s14, %s4815_s13  ;;  %p70_p1 = scmp.eq.s32.totalorder %s4954_s21, 0 }
  0x1a   : > { %p221_p2 = scmp.eq.s32.totalorder %s4954_s21, 3  ;;  %p227_p3 = scmp.eq.s32.totalorder %s8231_s22, 3 }
  0x1b   : > { %p4965_p4 = por %p70_p1, %p69_p0  ;;  %p3544_p5 = scmp.ge.s32.totalorder %s4843_s20, 1 }
  0x1c   : > { %p4970_p6 = por %p227_p3, %p69_p0  ;;  %p318_p7 = scmp.lt.s32.totalorder %s4843_s20, 5 }
  0x1d   : > { %s8263_s1 = sld [smem:[#allocation41_spill]]  ;;  %s4845_s29 = smov [#allocation5]  }
  0x1e   : > { %s8261_s24 = scalar_select %p4970_p6, 1, 0 }
  0x1f   : > { %p4978_p8 = pnand %p3544_p5, %p318_p7  ;;  %s332_s30 = sshll.u32 %s4845_s29, 4  ;;  %s333_s30 = int_to_ptr.vmem [resolvable:$true] %s332_s30 }
  0x20   : > { %8262 = sst [smem:[#allocation25_spill]] %s8261_s24  ;;  %s4846_s25 = smov [#allocation8]  }
  0x21   : > { %p4010_p9 = pneg %p4978_p8  ;;  %s8265_s3 = sld [smem:[#allocation43_spill]] }
  0x22   : > { %s355_s26 = sshll.u32 %s4846_s25, 4  ;;  %s4847_s29 = smov 320   ;;  %s356_s26 = int_to_ptr.vmem [resolvable:$true] %s355_s26 }
  0x23   : > { %s330_s27 = sshll.u32 %s8263_s1, 4  ;;  %p4989_p10 = pnand %p4010_p9, %p70_p1  ;;  %s331_s27 = int_to_ptr.hbm [resolvable:$true] %s330_s27 }
  0x24   : > { %s4848_s11 = smov 20   ;;  %s8267_s2 = sld [smem:[#allocation42_spill]] }
  0x25   : > { %4013 = dma.hbm_to_vmem [thread:$0]  (!%p4989_p10), %s331_s27, 16, %s333_s30, [#allocation6]  }
  0x26   : > { %s4849_s25 = smov [#allocation7]   ;;  %s8268_s4 = sld [smem:[#allocation44_spill]] }
  0x27   : > { %s353_s22 = sshll.u32 %s8265_s3, 4  ;;  %s344_s13 = sshll.u32 %s4849_s25, 4  ;;  %s354_s22 = int_to_ptr.hbm [resolvable:$true] %s353_s22  ;;  %s345_s13 = int_to_ptr.vmem [resolvable:$true] %s344_s13 }
  0x28   : > { %4019 = dma.hbm_to_vmem [thread:$0]  (!%p4989_p10), %s354_s22, 5120, %s356_s26, [#allocation9], %s4847_s29, %s4847_s29, %s4848_s11  }
  0x29   : > { %s4850_s1 = smov [#allocation10]   ;;  %s44_s26 = sadd.s32 1, %s4835_s18 }
  0x2a   : > { %s342_s3 = sshll.u32 %s8267_s2, 4  ;;  %s370_s22 = sshll.u32 %s4850_s1, 4  ;;  %s343_s3 = int_to_ptr.hbm [resolvable:$true] %s342_s3  ;;  %s371_s22 = int_to_ptr.vmem [resolvable:$true] %s370_s22 }
  0x2b   : > { %4016 = dma.hbm_to_vmem [thread:$0]  (!%p4989_p10), %s343_s3, 16, %s345_s13, [#allocation6]  }
  0x2c   : > { %s368_s10 = sshll.u32 %s8268_s4, 4  ;;  %s47_s29 = sadd.s32 1, %s4839_s19  ;;  %s369_s10 = int_to_ptr.hbm [resolvable:$true] %s368_s10 }
  0x2d   : > { %4022 = dma.hbm_to_vmem [thread:$0]  (!%p4989_p10), %s369_s10, 80, %s371_s22, [#allocation9]  }
  0x2e   : > { %p45_p11 = scmp.ge.s32.totalorder %s44_s26, 2  ;;  %s56_s11 = sadd.s32 1, %s4823_s15 }
  0x2f   : > { %p63_p12 = scmp.ne.s32.totalorder %s4823_s15, %s4819_s14  ;;  %p64_p13 = scmp.eq.s32.totalorder %s4843_s20, 0 }
  0x30   : > { %s8528_s26 = smov (%p45_p11, %s44_s26), 0  ;;  %s8530_s29 = smov (!%p45_p11, %s47_s29), %s4839_s19 }
  0x31   : > { %8269 = sst [smem:[#allocation26_spill]] %s8528_s26  ;;  %s52_s3 = ssub.s32 %s4835_s18, %s8528_s26 }
  0x32   : > { %p5018_p0 = por %p64_p13, %p63_p12  ;;  %p49_p3 = scmp.ge.s32.totalorder %s8530_s29, 2 }
  0x33   : > { %p5024_p5 = por %p221_p2, %p63_p12  ;;  %p4044_p7 = scmp.lt.s32.totalorder %s4843_s20, 4 }
  0x34   : > { %s387_s24 = sand.u32 1, %s4823_s15   ;;  %s8532_s29 = smov (%p49_p3, %s8530_s29), 0 }
  0x35   : > { %s8271_s10 = scalar_select %p5024_p5, 1, 0 }
  0x36   : > { %s3550_s12 = sshll.u32 %s387_s24, 7  ;;  %s51_s25 = ssub.s32 %s4839_s19, %s8532_s29 }
  0x37   : > { %8272 = sst [smem:[#allocation27_spill]] %s8271_s10  ;;  %s53_s27 = sor.u32 %s52_s3, %s51_s25 }
  0x38   : > { %s3551_s30 = sshll.u32 %s4835_s18, 4  ;;  %p54_p9 = scmp.eq.s32.totalorder %s53_s27, 0 }
  0x39   : > { %s3552_s1 = sshll.u32 %s4839_s19, 5  ;;  %s391_s2 = scalar_lea.vmem [#allocation2], %s3550_s12 }
  0x3a   : > { %s396_s22 = sadd.s32 %s3552_s1, %s3551_s30  ;;  %s401_s4 = sshll.u32 %s391_s2, 4  ;;  %s402_s4 = int_to_ptr.vmem [resolvable:$true] %s401_s4 }
  0x3b   : > { %s5037_s26 = scalar_select %p54_p9, %s4823_s15, %s56_s11  }
  0x3c   : > { %s3553_s9 = sshll.u32 %s396_s22, 3  ;;  %s8273_s0 = sld [smem:[#allocation40_spill]] }
  0x3d   : > { %p4024_p2 = pnand %p4044_p7, %p5018_p0  ;;  %s388_s3 = scalar_lea.sflag [#allocation3], %s387_s24 }
  0x3e   : > { %s4851_s25 = smov 128   ;;  %s4852_s27 = smov 8  }
  0x40   : > { %413 = sbr.rel (%p4978_p8) target bundleno = 937 (0x3a9), region = 48 }
  0x42   : > { %s398_s8 = scalar_lea.hbm %s8273_s0, %s3553_s9 }
  0x43   : > { %s399_s17 = sshll.u32 %s398_s8, 4  ;;  %s400_s17 = int_to_ptr.hbm [resolvable:$true] %s399_s17 }
  0x44   : > { %4026 = dma.hbm_to_vmem [thread:$0]  (!%p4024_p2), %s400_s17, 2048, %s402_s4, %s388_s3, %s4851_s25, %s4851_s25, %s4852_s27  }
  0x45   : > { %s5049_s2 = sand.u32 1, %s4819_s14  }
  0x46   : > { %s5052_s7 = sshll.u32 %s5049_s2, 7  ;;  %s416_s9 = scalar_lea.sflag [#allocation3], %s5049_s2 }
  0x47   : > { %s5056_s11 = scalar_lea.vmem [#allocation2], %s5052_s7 }
  0x48   : > { %4790 = dma.done.wait (%p4965_p4), %s416_s9, 2048  }
  0x49   : > { %4792 = vsyncadd (%p4965_p4), %s416_s9, 4294965248 }
  0x4a   : > { %4794 = dma.done.wait (%p70_p1), [#allocation6], 32  }
  0x4b   : > { %4796 = vsyncadd (%p70_p1), [#allocation6], 4294967264 }
  0x4c   : > { %4798 = dma.done.wait (%p70_p1), [#allocation9], 5200  }
  0x4d   : > { %4800 = vsyncadd (%p70_p1), [#allocation9], 4294962096  ;;  %v5071_v0 = vld [vmem:[%s5056_s11 + $0x60] sm:$0xff]  ;;  %v510_v3 = vld [vmem:[%s5056_s11 + $0x68] sm:$0xff]  ;;  %v4853_v16 = vmov 128.0   ;;  %s3560_s12 = sshll.u32 %s5049_s2, 6 }
  0x4e   : > { %v505_v1 = vld [vmem:[%s5056_s11 + $0x40] sm:$0xff]  ;;  %537 = vadd.xlane.f32.xlu2 %v5071_v0  ;;  %v506_v4 = vld [vmem:[%s5056_s11 + $0x48] sm:$0xff]  ;;  %v499_v6 = vld [vmem:[%s5056_s11 + $0x10] sm:$0xff]  ;;  %4133 = vrcp.f32 %v4853_v16  ;;  %s6289_s30 = scalar_lea.vmem [#allocation12], %s3560_s12  ;;  %s6303_s1 = scalar_lea.vmem [#allocation11], %s3560_s12 }
  0x4f   : > { %v497_v2 = vld [vmem:[%s5056_s11] sm:$0xff]  ;;  %529 = vadd.xlane.f32.xlu1 %v505_v1  ;;  %v498_v5 = vld [vmem:[%s5056_s11 + $0x8] sm:$0xff]  ;;  %v5086_v9 = vld [vmem:[%s5056_s11 + $0x58] sm:$0xff]  ;;  %s6350_s22 = scalar_lea.vmem [#allocation14], %s5052_s7  ;;  %s6421_s3 = scalar_lea.vmem [#allocation15], %s5052_s7 }
  0x50   : > { %513 = vadd.xlane.f32.xlu0 %v497_v2  ;;  %v5081_v7 = vld [vmem:[%s5056_s11 + $0x28] sm:$0xff]  ;;  %v501_v8 = vld [vmem:[%s5056_s11 + $0x20] sm:$0xff]  ;;  %v5089_v10 = vld [vmem:[%s5056_s11 + $0x50] sm:$0xff]  ;;  %s8492_s7 = sld [smem:[#allocation24_spill]]  ;;  %s3808_s9 = sshll.u32 %s4827_s16, 4 }
  0x51   : > { %v5092_v11 = vld [vmem:[%s5056_s11 + $0x18] sm:$0xff]  ;;  %v5098_v12 = vld [vmem:[%s5056_s11 + $0x30] sm:$0xff]  ;;  %s3222_s17 = sand.u32 1, %s4954_s21   ;;  %s8497_s13 = sld [smem:[#allocation46_spill]] }
  0x52   : > { %v5101_v13 = vld [vmem:[%s5056_s11 + $0x78] sm:$0xff]  ;;  %v5104_v14 = vld [vmem:[%s5056_s11 + $0x70] sm:$0xff]  ;;  %s8499_s27 = sld [smem:[#allocation45_spill]] }
  0x53   : > { %v5110_v15 = vld [vmem:[%s5056_s11 + $0x38] sm:$0xff] }
  0x54   : > { %v4134_v17 = vpop.eup %4133 }
  0x55   : > { %v546_v18 = vmul.f32 128.0, %v4134_v17  ;;  %vm550_vm0 = vweird.f32 %v4134_v17 }
  0x56   : > { %539 = vadd.xlane.f32.xlu2 %v510_v3  ;;  %s3809_s11 = sshll.u32 %s8492_s7, 5 }
  0x57   : > { %531 = vadd.xlane.f32.xlu1 %v506_v4  ;;  %v547_v19 = vsub.f32 1.0, %v546_v18  ;;  %s7943_s4 = sadd.s32 %s3809_s11, %s3808_s9  ;;  %s8498_s10 = smov %s8497_s13 }
  0x58   : > { %515 = vadd.xlane.f32.xlu0 %v498_v5  ;;  %s3810_s8 = sshll.u32 %s7943_s4, 2  ;;  %s3266_s11 = sshll.u32 %s6289_s30, 4  ;;  %s8013_s11 = int_to_ptr.vmem [resolvable:$true] %s3266_s11 }
  0x59   : > { %v548_v20 = vmul.f32 %v4134_v17, %v547_v19  ;;  %s7973_s24 = scalar_lea.hbm %s8497_s13, %s3810_s8  ;;  %s7981_s9 = scalar_lea.hbm %s8499_s27, %s3810_s8 }
  0x5a   : > { %s3268_s4 = sshll.u32 %s7973_s24, 4  ;;  %s3247_s8 = sshll.u32 %s6303_s1, 4  ;;  %s8022_s4 = int_to_ptr.hbm [resolvable:$true] %s3268_s4  ;;  %s8029_s8 = int_to_ptr.vmem [resolvable:$true] %s3247_s8 }
  0x5b   : > { %v549_v21 = vadd.f32 %v4134_v17, %v548_v20  ;;  %s3249_s23 = sshll.u32 %s7981_s9, 4  ;;  %s8049_s13 = scalar_lea.sflag [#allocation13], %s3222_s17  ;;  %s8031_s23 = int_to_ptr.hbm [resolvable:$true] %s3249_s23 }
  0x5c   : > { %s4659_s24 = sshra.s32 %s8022_s4, 4  ;;  %s4660_s24 = int_to_ptr.hbm [resolvable:$true] %s4659_s24 }
  0x5d   : > { %v5113_v22 = vsel %vm550_vm0, %v4134_v17, %v549_v21  ;;  %s4661_s12 = scalar_lea.hbm %s4660_s24, 64  ;;  %p4666_p10 = scmp.lt.s32.totalorder %s4660_s24, %s8498_s10 }
  0x5e   : > { %517 = vadd.xlane.f32.xlu2 %v499_v6  ;;  %p4662_p1 = scmp.ne.s32.totalorder %s4660_s24, %s4661_s12 }
  0x5f   : > { %523 = vadd.xlane.f32.xlu1 %v5081_v7 }
  0x60   : > { %521 = vadd.xlane.f32.xlu0 %v501_v8  ;;  %p4663_p4 = pnand %p4662_p1, %p5024_p5 }
  0x62   : > { %p4664_p8 = pneg %p4663_p4 }
  0x66   : > { %535 = vadd.xlane.f32.xlu2 %v5086_v9 }
  0x67   : > { %533 = vadd.xlane.f32.xlu1 %v5089_v10 }
  0x68   : > { %519 = vadd.xlane.f32.xlu0 %v5092_v11 }
  0x6e   : > { %525 = vadd.xlane.f32.xlu2 %v5098_v12 }
  0x6f   : > { %543 = vadd.xlane.f32.xlu1 %v5101_v13 }
  0x70   : > { %541 = vadd.xlane.f32.xlu0 %v5104_v14 }
  0x78   : > { %527 = vadd.xlane.f32.xlu0 %v5110_v15 }
  0xc1   : > { %v538_v23 = vpop.xlane.xlu2 %537 }
  0xc2   : > { %v530_v24 = vpop.xlane.xlu1 %529  ;;  %v564_v43 = vmul.f32 %v5113_v22, %v538_v23 }
  0xc3   : > { %v560_v25 = vmul.f32 %v5113_v22, %v530_v24  ;;  %v514_v26 = vpop.xlane.xlu0 %513 }
  0xc4   : > { %v552_v27 = vmul.f32 %v5113_v22, %v514_v26  ;;  %v5143_v49 = vsub.f32 %v5071_v0, %v564_v43  ;;  %v3706_v26 = vld [vmem:[#allocation8 + $0x118] sm:$0xf] }
  0xc5   : > { %v5117_v28 = vsub.f32 %v505_v1, %v560_v25 }
  0xc6   : > { %v5119_v29 = vsub.f32 %v497_v2, %v552_v27  ;;  %v596_v55 = vmul.f32 %v5143_v49, %v5143_v49  ;;  %v3861_v27 = vld [vmem:[#allocation8 + $0x128] sm:$0xf0] }
  0xc7   : > { %v592_v30 = vmul.f32 %v5117_v28, %v5117_v28 }
  0xc8   : > { %v584_v31 = vmul.f32 %v5119_v29, %v5119_v29 }
  0xc9   : > { %616 = vadd.xlane.f32.xlu0 %v592_v30  ;;  %v540_v32 = vpop.xlane.xlu2 %539  ;;  %v3707_v30 = vor.u32 %v3861_v27, %v3706_v26 }
  0xca   : > { %600 = vadd.xlane.f32.xlu1 %v584_v31  ;;  %v532_v33 = vpop.xlane.xlu1 %531  ;;  %v565_v34 = vmul.f32 %v5113_v22, %v540_v32  ;;  %v3856_v31 = vld [vmem:[#allocation8 + $0x100] sm:$0xf0] }
  0xcb   : > { %v561_v35 = vmul.f32 %v5113_v22, %v532_v33  ;;  %v516_v36 = vpop.xlane.xlu0 %515  ;;  %1156 = vmatpush.bf16.msra.mxu0 %v3707_v30  ;;  %3961 = vmatpush.bf16.msra.mxu2 %v3707_v30  ;;  %v3851_v33 = vld [vmem:[#allocation8 + $0xd8] sm:$0xf0] }
  0xcc   : > { %v553_v37 = vmul.f32 %v5113_v22, %v516_v36  ;;  %v5128_v38 = vsub.f32 %v510_v3, %v565_v34  ;;  %3962 = vmatpush.bf16.msra.mxu3 %v3707_v30  ;;  %3960 = vmatpush.bf16.msra.mxu1 %v3707_v30  ;;  %v3846_v36 = vld [vmem:[#allocation8 + $0xb0] sm:$0xf0] }
  0xcd   : > { %v5130_v39 = vsub.f32 %v506_v4, %v561_v35  ;;  %v3646_v35 = vld [vmem:[#allocation8 + $0xa0] sm:$0xf] }
  0xce   : > { %v5132_v40 = vsub.f32 %v498_v5, %v553_v37  ;;  %v597_v41 = vmul.f32 %v5128_v38, %v5128_v38  ;;  %v3647_v37 = vor.u32 %v3846_v36, %v3646_v35 }
  0xcf   : > { %v593_v42 = vmul.f32 %v5130_v39, %v5130_v39 }
  0xd0   : > { %v585_v44 = vmul.f32 %v5132_v40, %v5132_v40 }
  0xd1   : > { %626 = vadd.xlane.f32.xlu0 %v597_v41  ;;  %v518_v45 = vpop.xlane.xlu2 %517  ;;  %v3626_v41 = vld [vmem:[#allocation8 + $0x78] sm:$0xf] }
  0xd2   : > { %618 = vadd.xlane.f32.xlu1 %v593_v42  ;;  %602 = vadd.xlane.f32.xlu2 %v585_v44  ;;  %v524_v46 = vpop.xlane.xlu1 %523  ;;  %v554_v47 = vmul.f32 %v5113_v22, %v518_v45  ;;  %v3841_v42 = vld [vmem:[#allocation8 + $0x88] sm:$0xf0] }
  0xd3   : > { %v522_v48 = vpop.xlane.xlu0 %521  ;;  %v557_v53 = vmul.f32 %v5113_v22, %v524_v46  ;;  %v3627_v43 = vor.u32 %v3841_v42, %v3626_v41 }
  0xd4   : > { %v556_v50 = vmul.f32 %v5113_v22, %v522_v48  ;;  %v5146_v51 = vsub.f32 %v499_v6, %v554_v47 }
  0xd5   : > { %v5158_v57 = vsub.f32 %v5081_v7, %v557_v53  ;;  %v3836_v53 = vld [vmem:[#allocation8 + $0x60] sm:$0xf0] }
  0xd6   : > { %v5148_v52 = vsub.f32 %v501_v8, %v556_v50  ;;  %v586_v54 = vmul.f32 %v5146_v51, %v5146_v51  ;;  %v3606_v50 = vld [vmem:[#allocation8 + $0x50] sm:$0xf] }
  0xd7   : > { %v589_v1 = vmul.f32 %v5158_v57, %v5158_v57 }
  0xd8   : > { %v588_v56 = vmul.f32 %v5148_v52, %v5148_v52 }
  0xd9   : > { %604 = vadd.xlane.f32.xlu0 %v586_v54  ;;  %v536_v58 = vpop.xlane.xlu2 %535 }
  0xda   : > { %624 = vadd.xlane.f32.xlu2 %v596_v55  ;;  %608 = vadd.xlane.f32.xlu1 %v588_v56  ;;  %v534_v59 = vpop.xlane.xlu1 %533  ;;  %v563_v60 = vmul.f32 %v5113_v22, %v536_v58  ;;  %v3607_v55 = vor.u32 %v3836_v53, %v3606_v50  ;;  %v3586_v56 = vld [vmem:[#allocation8 + $0x28] sm:$0xf]  ;;  %v3831_v58 = vld [vmem:[#allocation8 + $0x38] sm:$0xf0] }
  0xdb   : > { %v520_v61 = vpop.xlane.xlu0 %519  ;;  %v562_v2 = vmul.f32 %v5113_v22, %v534_v59 }
  0xdc   : > { %v555_v62 = vmul.f32 %v5113_v22, %v520_v61  ;;  %v5163_v63 = vsub.f32 %v5086_v9, %v563_v60  ;;  %v3587_v60 = vor.u32 %v3831_v58, %v3586_v56 }
  0xdd   : > { %v5176_v5 = vsub.f32 %v5089_v10, %v562_v2 }
  0xde   : > { %v5166_v0 = vsub.f32 %v5092_v11, %v555_v62  ;;  %v595_v3 = vmul.f32 %v5163_v63, %v5163_v63 }
  0xdf   : > { %v594_v18 = vmul.f32 %v5176_v5, %v5176_v5 }
  0xe0   : > { %v587_v4 = vmul.f32 %v5166_v0, %v5166_v0 }
  0xe1   : > { %622 = vadd.xlane.f32.xlu0 %v595_v3  ;;  %v526_v6 = vpop.xlane.xlu2 %525 }
  0xe2   : > { %610 = vadd.xlane.f32.xlu2 %v589_v1  ;;  %606 = vadd.xlane.f32.xlu1 %v587_v4  ;;  %v558_v7 = vmul.f32 %v5113_v22, %v526_v6  ;;  %v544_v9 = vpop.xlane.xlu1 %543 }
  0xe3   : > { %v542_v8 = vpop.xlane.xlu0 %541  ;;  %v567_v19 = vmul.f32 %v5113_v22, %v544_v9 }
  0xe4   : > { %v566_v11 = vmul.f32 %v5113_v22, %v542_v8  ;;  %v5181_v16 = vsub.f32 %v5098_v12, %v558_v7 }
  0xe5   : > { %v5194_v12 = vsub.f32 %v5101_v13, %v567_v19  ;;  %v3686_v13 = vld [vmem:[#allocation8 + $0xf0] sm:$0xf]  ;;  %v3566_v19 = vld [vmem:[#allocation8] sm:$0xf] }
  0xe6   : > { %v5184_v17 = vsub.f32 %v5104_v14, %v566_v11  ;;  %v590_v10 = vmul.f32 %v5181_v16, %v5181_v16  ;;  %v3687_v32 = vor.u32 %v3856_v31, %v3686_v13  ;;  %v3722_v31 = vld [vmem:[#allocation8 + $0x128] sm:$0xf] }
  0xe7   : > { %v599_v24 = vmul.f32 %v5194_v12, %v5194_v12 }
  0xe8   : > { %v598_v20 = vmul.f32 %v5184_v17, %v5184_v17  ;;  %1157 = vmatpush.bf16.msra.mxu0 %v3687_v32  ;;  %3964 = vmatpush.bf16.msra.mxu2 %v3687_v32 }
  0xe9   : > { %612 = vadd.xlane.f32.xlu0 %v590_v10  ;;  %3965 = vmatpush.bf16.msra.mxu3 %v3687_v32  ;;  %v3826_v10 = vld [vmem:[#allocation8 + $0x10] sm:$0xf0] }
  0xea   : > { %620 = vadd.xlane.f32.xlu2 %v594_v18  ;;  %628 = vadd.xlane.f32.xlu1 %v598_v20 }
  0xeb   : > { %v528_v21 = vpop.xlane.xlu0 %527  ;;  %3963 = vmatpush.bf16.msra.mxu1 %v3687_v32  ;;  %v3863_v32 = vld [vmem:[#allocation8 + $0x138] sm:$0xf0] }
  0xec   : > { %v559_v14 = vmul.f32 %v5113_v22, %v528_v21  ;;  %v3723_v35 = vor.u32 %v3863_v32, %v3722_v31 }
  0xee   : > { %v5198_v23 = vsub.f32 %v5110_v15, %v559_v14  ;;  %v3666_v15 = vld [vmem:[#allocation8 + $0xc8] sm:$0xf]  ;;  %v3567_v14 = vor.u32 %v3826_v10, %v3566_v19  ;;  %v3702_v19 = vld [vmem:[#allocation8 + $0x100] sm:$0xf]  ;;  %v3858_v10 = vld [vmem:[#allocation8 + $0x110] sm:$0xf0] }
  0xef   : > { %v3667_v34 = vor.u32 %v3851_v33, %v3666_v15  ;;  %v3703_v31 = vor.u32 %v3858_v10, %v3702_v19 }
  0xf0   : > { %v591_v25 = vmul.f32 %v5198_v23, %v5198_v23 }
  0xf1   : > { %1158 = vmatpush.bf16.msra.mxu0 %v3667_v34  ;;  %3967 = vmatpush.bf16.msra.mxu2 %v3667_v34 }
  0xf2   : > { %630 = vadd.xlane.f32.xlu2 %v599_v24  ;;  %614 = vadd.xlane.f32.xlu1 %v591_v25 }
  0xf3   : > { %3968 = vmatpush.bf16.msra.mxu3 %v3667_v34  ;;  %3966 = vmatpush.bf16.msra.mxu1 %v3667_v34 }
  0xf5   : > { %1159 = vmatpush.bf16.msra.mxu0 %v3647_v37  ;;  %3970 = vmatpush.bf16.msra.mxu2 %v3647_v37 }
  0xf7   : > { %3971 = vmatpush.bf16.msra.mxu3 %v3647_v37  ;;  %3969 = vmatpush.bf16.msra.mxu1 %v3647_v37 }
  0xf9   : > { %1160 = vmatpush.bf16.msra.mxu0 %v3627_v43  ;;  %3973 = vmatpush.bf16.msra.mxu2 %v3627_v43 }
  0xfb   : > { %3974 = vmatpush.bf16.msra.mxu3 %v3627_v43  ;;  %3972 = vmatpush.bf16.msra.mxu1 %v3627_v43 }
  0xfd   : > { %1161 = vmatpush.bf16.msra.mxu0 %v3607_v55  ;;  %3976 = vmatpush.bf16.msra.mxu2 %v3607_v55 }
  0xff   : > { %3977 = vmatpush.bf16.msra.mxu3 %v3607_v55  ;;  %3975 = vmatpush.bf16.msra.mxu1 %v3607_v55 }
 0x101   : > { %1162 = vmatpush.bf16.msra.mxu0 %v3587_v60  ;;  %3979 = vmatpush.bf16.msra.mxu2 %v3587_v60 }
 0x103   : > { %3980 = vmatpush.bf16.msra.mxu3 %v3587_v60  ;;  %3978 = vmatpush.bf16.msra.mxu1 %v3587_v60 }
 0x105   : > { %1163 = vmatpush.bf16.msra.mxu0 %v3567_v14  ;;  %3982 = vmatpush.bf16.msra.mxu2 %v3567_v14 }
 0x107   : > { %3983 = vmatpush.bf16.msra.mxu3 %v3567_v14  ;;  %3981 = vmatpush.bf16.msra.mxu1 %v3567_v14 }
 0x109   : > { %1352 = vmatpush.bf16.msrb.mxu0 %v3723_v35 }
 0x10d   : > { %1353 = vmatpush.bf16.msrb.mxu0 %v3703_v31 }
 0x13c   : > { %v617_v44 = vpop.xlane.xlu0 %616 }
 0x13d   : > { %v601_v45 = vpop.xlane.xlu1 %600  ;;  %v640_v46 = vmul.f32 %v617_v44, %v5113_v22 }
 0x13e   : > { %v632_v47 = vmul.f32 %v601_v45, %v5113_v22 }
 0x13f   : > { %v5206_v48 = vadd.f32 1e-05, %v640_v46 }
 0x140   : > { %v5208_v54 = vadd.f32 1e-05, %v632_v47 }
 0x141   : > { %4135 = vrsqrt.f32 %v5206_v48  ;;  %vm750_vm1 = vweird.f32 %v5206_v48 }
 0x142   : > { %4137 = vrsqrt.f32 %v5208_v54  ;;  %vm670_vm4 = vweird.f32 %v5208_v54 }
 0x144   : > { %v627_v59 = vpop.xlane.xlu0 %626 }
 0x145   : > { %v619_v61 = vpop.xlane.xlu1 %618  ;;  %v603_v62 = vpop.xlane.xlu2 %602  ;;  %v645_v1 = vmul.f32 %v627_v59, %v5113_v22 }
 0x146   : > { %v641_v2 = vmul.f32 %v619_v61, %v5113_v22  ;;  %v633_v3 = vmul.f32 %v603_v62, %v5113_v22 }
 0x147   : > { %v5215_v4 = vpop.eup %4135  ;;  %v5217_v6 = vadd.f32 1e-05, %v645_v1  ;;  %v5285_v1 = vld [vmem:[#allocation5] ss:$0 sm:$0xff] }
 0x148   : > { %v5219_v7 = vpop.eup %4137  ;;  %v745_v8 = vmul.f32 %v5215_v4, %v5206_v48  ;;  %v5223_v9 = vadd.f32 1e-05, %v641_v2  ;;  %v5225_v11 = vadd.f32 1e-05, %v633_v3  ;;  %vm751_vm2 = vweird.f32 %v5215_v4 }
 0x149   : > { %v665_v18 = vmul.f32 %v5219_v7, %v5208_v54  ;;  %4139 = vrsqrt.f32 %v5217_v6  ;;  %vm671_vm3 = vweird.f32 %v5219_v7  ;;  %vm5257_vm5 = vmor %vm750_vm1, %vm751_vm2  ;;  %vm800_vm7 = vweird.f32 %v5217_v6 }
 0x14a   : > { %v746_v20 = vmul.f32 %v5215_v4, %v745_v8  ;;  %4141 = vrsqrt.f32 %v5223_v9  ;;  %vm5265_vm6 = vmor %vm670_vm4, %vm671_vm3  ;;  %vm760_vm9 = vweird.f32 %v5223_v9  ;;  %vm680_vm12 = vweird.f32 %v5225_v11 }
 0x14b   : > { %v666_v21 = vmul.f32 %v5219_v7, %v665_v18  ;;  %4143 = vrsqrt.f32 %v5225_v11 }
 0x14c   : > { %v747_v24 = vmul.f32 0.5, %v746_v20  ;;  %v605_v25 = vpop.xlane.xlu0 %604 }
 0x14d   : > { %v667_v26 = vmul.f32 0.5, %v666_v21  ;;  %v625_v27 = vpop.xlane.xlu2 %624  ;;  %v609_v30 = vpop.xlane.xlu1 %608  ;;  %v634_v13 = vmul.f32 %v605_v25, %v5113_v22 }
 0x14e   : > { %v748_v15 = vsub.f32 1.5, %v747_v24  ;;  %v644_v33 = vmul.f32 %v625_v27, %v5113_v22  ;;  %v636_v34 = vmul.f32 %v609_v30, %v5113_v22  ;;  %v5307_v27 = vld [vmem:[#allocation7] ss:$0 sm:$0xff] }
 0x14f   : > { %v5239_v36 = vpop.eup %4139  ;;  %v668_v37 = vsub.f32 1.5, %v667_v26  ;;  %v5275_v58 = vadd.f32 1e-05, %v634_v13 }
 0x150   : > { %v5242_v41 = vpop.eup %4141  ;;  %v749_v42 = vmul.f32 %v5215_v4, %v748_v15  ;;  %v795_v43 = vmul.f32 %v5239_v36, %v5217_v6  ;;  %v5247_v44 = vadd.f32 1e-05, %v644_v33  ;;  %v5263_v53 = vadd.f32 1e-05, %v636_v34 }
 0x151   : > { %v5249_v45 = vpop.eup %4143  ;;  %v669_v46 = vmul.f32 %v5219_v7, %v668_v37  ;;  %v755_v50 = vmul.f32 %v5242_v41, %v5223_v9  ;;  %vm801_vm8 = vweird.f32 %v5239_v36  ;;  %vm761_vm10 = vweird.f32 %v5242_v41 }
 0x152   : > { %v753_v54 = vsel %vm5257_vm5, %v5215_v4, %v749_v42  ;;  %v675_v48 = vmul.f32 %v5249_v45, %v5225_v11  ;;  %v796_v56 = vmul.f32 %v5239_v36, %v795_v43  ;;  %4145 = vrsqrt.f32 %v5247_v44  ;;  %vm5297_vm11 = vmor %vm800_vm7, %vm801_vm8 }
 0x153   : > { %v673_v59 = vsel %vm5265_vm6, %v5219_v7, %v669_v46  ;;  %v756_v60 = vmul.f32 %v5242_v41, %v755_v50  ;;  %v832_v2 = vmul.f32 %v753_v54, %v5117_v28  ;;  %4147 = vrsqrt.f32 %v5263_v53  ;;  %vm5318_vm14 = vmor %vm760_vm9, %vm761_vm10 }
 0x154   : > { %v676_v61 = vmul.f32 %v5249_v45, %v675_v48  ;;  %v797_v62 = vmul.f32 0.5, %v796_v56  ;;  %v824_v7 = vmul.f32 %v673_v59, %v5119_v29  ;;  %4149 = vrsqrt.f32 %v5275_v58  ;;  %v623_v25 = vpop.xlane.xlu0 %622 }
 0x155   : > { %v757_v3 = vmul.f32 0.5, %v756_v60  ;;  %v611_v4 = vpop.xlane.xlu2 %610  ;;  %v607_v21 = vpop.xlane.xlu1 %606  ;;  %vm681_vm13 = vweird.f32 %v5249_v45  ;;  %v852_v6 = vmul.f32 %v5285_v1, %v832_v2  ;;  %vm790_vm15 = vweird.f32 %v5247_v44 }
 0x156   : > { %v677_v8 = vmul.f32 0.5, %v676_v61  ;;  %v798_v18 = vsub.f32 1.5, %v797_v62  ;;  %v637_v29 = vmul.f32 %v611_v4, %v5113_v22  ;;  %v844_v32 = vmul.f32 %v5285_v1, %v824_v7  ;;  %vm682_vm1 = vmor %vm680_vm12, %vm681_vm13 }
 0x157   : > { %v758_v20 = vsub.f32 1.5, %v757_v3  ;;  %vm710_vm0 = vweird.f32 %v5263_v53  ;;  %v643_v42 = vmul.f32 %v623_v25, %v5113_v22  ;;  %v5348_v11 = vadd.f32 %v5307_v27, %v852_v6 }
 0x158   : > { %v678_v14 = vsub.f32 1.5, %v677_v8  ;;  %v799_v24 = vmul.f32 %v5239_v36, %v798_v18  ;;  %v5305_v26 = vpop.eup %4145  ;;  %v5311_v13 = vadd.f32 1e-05, %v637_v29  ;;  %vm690_vm2 = vweird.f32 %v5275_v58 }
 0x159   : > { %v759_v30 = vmul.f32 %v5242_v41, %v758_v20  ;;  %v785_v35 = vmul.f32 %v5305_v26, %v5247_v44  ;;  %v5330_v37 = vpop.eup %4147  ;;  %v864_v48 = vadd.f32 %v5307_v27, %v844_v32  ;;  %vm791_vm3 = vweird.f32 %v5305_v26 }
 0x15a   : > { %v679_v33 = vmul.f32 %v5249_v45, %v678_v14  ;;  %v803_v34 = vsel %vm5297_vm11, %v5239_v36, %v799_v24  ;;  %4151 = vrsqrt.f32 %v5311_v13  ;;  %v635_v36 = vmul.f32 %v607_v21, %v5113_v22  ;;  %v4150_v43 = vpop.eup %4149  ;;  %vm792_vm7 = vmor %vm790_vm15, %vm791_vm3 }
 0x15b   : > { %v763_v9 = vsel %vm5318_vm14, %v5242_v41, %v759_v30  ;;  %v837_v47 = vmul.f32 %v803_v34, %v5128_v38  ;;  %v786_v50 = vmul.f32 %v5305_v26, %v785_v35  ;;  %v705_v41 = vmul.f32 %v5330_v37, %v5263_v53 }
 0x15c   : > { %v683_v46 = vsel %vm682_vm1, %v5249_v45, %v679_v33  ;;  %v685_v54 = vmul.f32 %v4150_v43, %v5275_v58  ;;  %v833_v45 = vmul.f32 %v763_v9, %v5130_v39  ;;  %v5358_v61 = vadd.f32 1e-05, %v635_v36  ;;  %v613_v28 = vpop.xlane.xlu0 %612 }
 0x15d   : > { %v825_v55 = vmul.f32 %v683_v46, %v5132_v40  ;;  %v787_v56 = vmul.f32 0.5, %v786_v50  ;;  %v706_v38 = vmul.f32 %v5330_v37, %v705_v41  ;;  %v857_v40 = vmul.f32 %v5285_v1, %v837_v47  ;;  %v621_v4 = vpop.xlane.xlu2 %620  ;;  %v629_v39 = vpop.xlane.xlu1 %628 }
 0x15e   : > { %v686_v60 = vmul.f32 %v4150_v43, %v685_v54  ;;  %v5361_v3 = vadd.f32 1e-05, %v643_v42  ;;  %vm711_vm4 = vweird.f32 %v5330_v37  ;;  %vm691_vm5 = vweird.f32 %v4150_v43 }
 0x15f   : > { %v845_v59 = vmul.f32 %v5285_v1, %v825_v55  ;;  %v788_v62 = vsub.f32 1.5, %v787_v56  ;;  %v707_v2 = vmul.f32 0.5, %v706_v38  ;;  %4153 = vrsqrt.f32 %v5358_v61  ;;  %vm5384_vm8 = vmor %vm690_vm2, %vm691_vm5 }
 0x160   : > { %v5363_v7 = vpop.eup %4151  ;;  %v687_v8 = vmul.f32 0.5, %v686_v60  ;;  %vm720_vm6 = vweird.f32 %v5311_v13  ;;  %v853_v29 = vmul.f32 %v5285_v1, %v833_v45  ;;  %4155 = vrsqrt.f32 %v5361_v3  ;;  %vm712_vm9 = vmor %vm710_vm0, %vm711_vm4 }
 0x161   : > { %v865_v18 = vadd.f32 %v5307_v27, %v845_v59  ;;  %v789_v19 = vmul.f32 %v5305_v26, %v788_v62  ;;  %v708_v10 = vsub.f32 1.5, %v707_v2  ;;  %v715_v20 = vmul.f32 %v5363_v7, %v5311_v13 }
 0x162   : > { %v688_v21 = vsub.f32 1.5, %v687_v8  ;;  %v642_v14 = vmul.f32 %v621_v4, %v5113_v22  ;;  %v646_v44 = vmul.f32 %v629_v39, %v5113_v22  ;;  %v638_v58 = vmul.f32 %v613_v28, %v5113_v22 }
 0x163   : > { %v793_v24 = vsel %vm792_vm7, %v5305_v26, %v789_v19  ;;  %v709_v25 = vmul.f32 %v5330_v37, %v708_v10  ;;  %v716_v30 = vmul.f32 %v5363_v7, %v715_v20  ;;  %v5401_v35 = vpack.c.bf16 %v865_v18, %v864_v48 }
 0x164   : > { %v836_v31 = vmul.f32 %v793_v24, %v5143_v49  ;;  %v689_v26 = vmul.f32 %v4150_v43, %v688_v21  ;;  %v5395_v32 = vadd.f32 1e-05, %v642_v14  ;;  %v5399_v34 = vadd.f32 1e-05, %v646_v44 }
 0x165   : > { %v713_v15 = vsel %vm712_vm9, %v5330_v37, %v709_v25  ;;  %v717_v33 = vmul.f32 0.5, %v716_v30  ;;  %v5403_v9 = vpop.eup %4153  ;;  %vm721_vm10 = vweird.f32 %v5363_v7  ;;  %1164 = vmatmul.bf16.vlgmr.msra.gmra.mxu0 %v5401_v35  ;;  %v873_v50 = vadd.f32 %v5307_v27, %v853_v29  ;;  %v631_v60 = vpop.xlane.xlu2 %630 }
 0x166   : > { %v856_v49 = vmul.f32 %v5285_v1, %v836_v31  ;;  %v828_v36 = vmul.f32 %v713_v15, %v5148_v52  ;;  %v693_v53 = vsel %vm5384_vm8, %v4150_v43, %v689_v26  ;;  %4157 = vrsqrt.f32 %v5395_v32  ;;  %v5415_v47 = vpop.eup %4155  ;;  %vm722_vm12 = vmor %vm720_vm6, %vm721_vm10  ;;  %v3714_v15 = vld [vmem:[#allocation8 + $0x120] sm:$0xf] }
 0x167   : > { %v826_v42 = vmul.f32 %v693_v53, %v5146_v51  ;;  %v718_v46 = vsub.f32 1.5, %v717_v33  ;;  %v695_v37 = vmul.f32 %v5403_v9, %v5358_v61  ;;  %v877_v52 = vadd.f32 %v5307_v27, %v857_v40  ;;  %v615_v40 = vpop.xlane.xlu1 %614  ;;  %v3862_v33 = vld [vmem:[#allocation8 + $0x130] sm:$0xf0] }
 0x168   : > { %v848_v43 = vmul.f32 %v5285_v1, %v828_v36  ;;  %4159 = vrsqrt.f32 %v5399_v34  ;;  %vm700_vm11 = vweird.f32 %v5358_v61  ;;  %v775_v55 = vmul.f32 %v5415_v47, %v5361_v3 }
 0x169   : > { %v719_v51 = vmul.f32 %v5363_v7, %v718_v46  ;;  %v696_v41 = vmul.f32 %v5403_v9, %v695_v37  ;;  %v876_v54 = vadd.f32 %v5307_v27, %v856_v49  ;;  %vm701_vm13 = vweird.f32 %v5403_v9  ;;  %v3853_v46 = vld [vmem:[#allocation8 + $0xe8] sm:$0xf0] }
 0x16a   : > { %vm780_vm14 = vweird.f32 %v5361_v3  ;;  %v5431_v48 = vadd.f32 1e-05, %v638_v58  ;;  %v846_v56 = vmul.f32 %v5285_v1, %v826_v42  ;;  %v776_v59 = vmul.f32 %v5415_v47, %v775_v55  ;;  %vm5463_vm1 = vmor %vm700_vm11, %vm701_vm13  ;;  %v3682_v42 = vld [vmem:[#allocation8 + $0xd8] sm:$0xf]  ;;  %v3662_v55 = vld [vmem:[#allocation8 + $0xb0] sm:$0xf] }
 0x16b   : > { %v723_v38 = vsel %vm722_vm12, %v5363_v7, %v719_v51  ;;  %v697_v45 = vmul.f32 0.5, %v696_v41  ;;  %v5439_v13 = vadd.f32 %v5307_v27, %v848_v43  ;;  %v5444_v4 = vpack.c.bf16 %v873_v50, %v5348_v11  ;;  %v3694_v50 = vld [vmem:[#allocation8 + $0xf8] sm:$0xf] }
 0x16c   : > { %v5436_v62 = vpop.eup %4157  ;;  %v829_v2 = vmul.f32 %v723_v38, %v5158_v57  ;;  %4161 = vrsqrt.f32 %v5431_v48  ;;  %v777_v39 = vmul.f32 0.5, %v776_v59  ;;  %vm781_vm15 = vweird.f32 %v5415_v47 }
 0x16d   : > { %v698_v8 = vsub.f32 1.5, %v697_v45  ;;  %v765_v7 = vmul.f32 %v5436_v62, %v5395_v32  ;;  %vm770_vm0 = vweird.f32 %v5395_v32  ;;  %1184 = vmatmul.bf16.vlgmr.msra.gmra.mxu2 %v5444_v4  ;;  %v647_v57 = vmul.f32 %v631_v60, %v5113_v22  ;;  %vm5476_vm3 = vmor %vm780_vm14, %vm781_vm15 }
 0x16e   : > { %v5450_v18 = vpop.eup %4159  ;;  %v849_v19 = vmul.f32 %v5285_v1, %v829_v2  ;;  %v639_v11 = vmul.f32 %v615_v40, %v5113_v22  ;;  %v5456_v10 = vpack.c.bf16 %v877_v52, %v876_v54  ;;  %v778_v29 = vsub.f32 1.5, %v777_v39  ;;  %v3857_v52 = vld [vmem:[#allocation8 + $0x108] sm:$0xf0]  ;;  %v3848_v54 = vld [vmem:[#allocation8 + $0xc0] sm:$0xf0] }
 0x16f   : > { %v699_v20 = vmul.f32 %v5403_v9, %v698_v8  ;;  %v766_v21 = vmul.f32 %v5436_v62, %v765_v7  ;;  %v805_v14 = vmul.f32 %v5450_v18, %v5399_v34  ;;  %vm810_vm2 = vweird.f32 %v5399_v34  ;;  %v3860_v2 = vld [vmem:[#allocation8 + $0x124] sm:$0xf]  ;;  %v3716_v8 = vld [vmem:[#allocation8 + $0x134] sm:$0xf0]  ;;  %v3582_v34 = vld [vmem:[#allocation8 + $0x10] sm:$0xf] }
 0x170   : > { %v866_v22 = vadd.f32 %v5307_v27, %v846_v56  ;;  %vm730_vm4 = vweird.f32 %v5431_v48  ;;  %v5481_v24 = vadd.f32 1e-05, %v647_v57  ;;  %v5483_v25 = vadd.f32 1e-05, %v639_v11  ;;  %1194 = vmatmul.bf16.vlgmr.msra.gmra.mxu3 %v5456_v10  ;;  %v3859_v11 = vld [vmem:[#allocation8 + $0x11c] sm:$0xf] }
 0x171   : > { %v703_v6 = vsel %vm5463_vm1, %v5403_v9, %v699_v20  ;;  %v779_v30 = vmul.f32 %v5415_v47, %v778_v29  ;;  %v767_v44 = vmul.f32 0.5, %v766_v21  ;;  %v806_v3 = vmul.f32 %v5450_v18, %v805_v14  ;;  %v3674_v20 = vld [vmem:[#allocation8 + $0xd0] sm:$0xf]  ;;  %v3852_v21 = vld [vmem:[#allocation8 + $0xe0] sm:$0xf0] }
 0x172   : > { %v5491_v31 = vpop.eup %4161  ;;  %v869_v26 = vadd.f32 %v5307_v27, %v849_v19  ;;  %v827_v58 = vmul.f32 %v703_v6, %v5166_v0  ;;  %vm771_vm5 = vweird.f32 %v5436_v62  ;;  %4163 = vrsqrt.f32 %v5481_v24  ;;  %v3642_v14 = vld [vmem:[#allocation8 + $0x88] sm:$0xf]  ;;  %v3843_v6 = vld [vmem:[#allocation8 + $0x98] sm:$0xf0] }
 0x173   : > { %v783_v9 = vsel %vm5476_vm3, %v5415_v47, %v779_v30  ;;  %v768_v49 = vsub.f32 1.5, %v767_v44  ;;  %v807_v36 = vmul.f32 0.5, %v806_v3  ;;  %v725_v53 = vmul.f32 %v5491_v31, %v5431_v48  ;;  %vm772_vm7 = vmor %vm770_vm0, %vm771_vm5  ;;  %v3855_v30 = vld [vmem:[#allocation8 + $0xfc] sm:$0xf]  ;;  %v3688_v48 = vld [vmem:[#allocation8 + $0x104] sm:$0xf0] }
 0x174   : > { %v847_v37 = vmul.f32 %v5285_v1, %v827_v58  ;;  %v835_v0 = vmul.f32 %v783_v9, %v5163_v63  ;;  %vm811_vm6 = vweird.f32 %v5450_v18  ;;  %4165 = vrsqrt.f32 %v5483_v25 }
 0x175   : > { %v769_v43 = vmul.f32 %v5436_v62, %v768_v49  ;;  %v808_v47 = vsub.f32 1.5, %v807_v36  ;;  %v726_v51 = vmul.f32 %v5491_v31, %v725_v53  ;;  %v3715_v41 = vor.u32 %v3862_v33, %v3714_v15  ;;  %vm5534_vm9 = vmor %vm810_vm2, %vm811_vm6  ;;  %v3696_v15 = vld [vmem:[#allocation8 + $0x10c] sm:$0xf0]  ;;  %v3854_v33 = vld [vmem:[#allocation8 + $0xf4] sm:$0xf] }
 0x176   : > { %v867_v56 = vadd.f32 %v5307_v27, %v847_v37  ;;  %v855_v38 = vmul.f32 %v5285_v1, %v835_v0  ;;  %vm731_vm8 = vweird.f32 %v5491_v31  ;;  %v3683_v63 = vor.u32 %v3853_v46, %v3682_v42  ;;  %v3654_v36 = vld [vmem:[#allocation8 + $0xa8] sm:$0xf]  ;;  %v3847_v53 = vld [vmem:[#allocation8 + $0xb8] sm:$0xf0]  ;;  %v3622_v0 = vld [vmem:[#allocation8 + $0x60] sm:$0xf] }
 0x177   : > { %v773_v45 = vsel %vm772_vm7, %v5436_v62, %v769_v43  ;;  %v809_v59 = vmul.f32 %v5450_v18, %v808_v47  ;;  %v727_v60 = vmul.f32 0.5, %v726_v51  ;;  %1254 = vmatpush.bf16.msrb.mxu2 %v3715_v41  ;;  %v3695_v40 = vor.u32 %v3857_v52, %v3694_v50  ;;  %v3708_v62 = vld [vmem:[#allocation8 + $0x12c] sm:$0xf0]  ;;  %vm5548_vm10 = vmor %vm730_vm4, %vm731_vm8  ;;  %v3838_v50 = vld [vmem:[#allocation8 + $0x70] sm:$0xf0] }
 0x178   : > { %v5517_v39 = vpop.eup %4163  ;;  %v834_v7 = vmul.f32 %v773_v45, %v5176_v5  ;;  %1354 = vmatpush.bf16.msrb.mxu0 %v3683_v63  ;;  %v3663_v19 = vor.u32 %v3848_v54, %v3662_v55  ;;  %v5520_v32 = vpack.c.bf16 %v867_v56, %v866_v22  ;;  %v5523_v57 = vpack.c.bf16 %v869_v26, %v5439_v13  ;;  %v3850_v41 = vld [vmem:[#allocation8 + $0xd4] sm:$0xf]  ;;  %v3676_v55 = vld [vmem:[#allocation8 + $0xe4] sm:$0xf0]  ;;  %v3849_v54 = vld [vmem:[#allocation8 + $0xcc] sm:$0xf] }
 0x179   : > { %v728_v28 = vsub.f32 1.5, %v727_v60  ;;  %v815_v29 = vmul.f32 %v5517_v39, %v5481_v24  ;;  %v3719_v22 = vor.u32 %v3860_v2, %v3716_v8  ;;  %v813_v44 = vsel %vm5534_vm9, %v5450_v18, %v809_v59  ;;  %v3668_v59 = vld [vmem:[#allocation8 + $0xdc] sm:$0xf0]  ;;  %v3602_v2 = vld [vmem:[#allocation8 + $0x38] sm:$0xf] }
 0x17a   : > { %v5527_v61 = vpop.eup %4165  ;;  %v854_v5 = vmul.f32 %v5285_v1, %v834_v7  ;;  %1169 = vmatmul.bf16.gmra.mxu0 %v5520_v32  ;;  %1174 = vmatmul.bf16.vlgmr.msra.gmra.mxu1 %v5523_v57  ;;  %v875_v18 = vadd.f32 %v5307_v27, %v855_v38  ;;  %v3711_v49 = vor.u32 %v3859_v11, %v3708_v62  ;;  %vm821_vm11 = vweird.f32 %v5517_v39  ;;  %v3634_v60 = vld [vmem:[#allocation8 + $0x80] sm:$0xf]  ;;  %v3833_v8 = vld [vmem:[#allocation8 + $0x48] sm:$0xf0] }
 0x17b   : > { %v729_v3 = vmul.f32 %v5491_v31, %v728_v28  ;;  %v816_v26 = vmul.f32 %v5517_v39, %v815_v29  ;;  %v735_v58 = vmul.f32 %v5527_v61, %v5483_v25  ;;  %1255 = vmatpush.bf16.msrb.mxu2 %v3695_v40  ;;  %1303 = vmatpush.bf16.msrb.mxu3 %v3719_v22  ;;  %vm820_vm12 = vweird.f32 %v5481_v24  ;;  %v3842_v40 = vld [vmem:[#allocation8 + $0x90] sm:$0xf0]  ;;  %v3845_v62 = vld [vmem:[#allocation8 + $0xac] sm:$0xf]  ;;  %v3844_v22 = vld [vmem:[#allocation8 + $0xa4] sm:$0xf] }
 0x17c   : > { %v874_v9 = vadd.f32 %v5307_v27, %v854_v5  ;;  %1355 = vmatpush.bf16.msrb.mxu0 %v3663_v19  ;;  %v3675_v37 = vor.u32 %v3852_v21, %v3674_v20  ;;  %v838_v52 = vmul.f32 %v813_v44, %v5184_v17  ;;  %1205 = vmatpush.bf16.msrb.mxu1 %v3711_v49  ;;  %vm740_vm13 = vweird.f32 %v5483_v25  ;;  %v3656_v20 = vld [vmem:[#allocation8 + $0xbc] sm:$0xf0]  ;;  %vm822_vm15 = vmor %vm820_vm12, %vm821_vm11  ;;  %v3614_v44 = vld [vmem:[#allocation8 + $0x58] sm:$0xf] }
 0x17d   : > { %v817_v42 = vmul.f32 0.5, %v816_v26  ;;  %v736_v46 = vmul.f32 %v5527_v61, %v735_v58  ;;  %v733_v43 = vsel %vm5548_vm10, %v5491_v31, %v729_v3  ;;  %v3643_v47 = vor.u32 %v3843_v6, %v3642_v14  ;;  %v3648_v6 = vld [vmem:[#allocation8 + $0xb4] sm:$0xf0]  ;;  %v3837_v3 = vld [vmem:[#allocation8 + $0x68] sm:$0xf0] }
 0x17e   : > { %v3699_v51 = vor.u32 %v3855_v30, %v3696_v15  ;;  %v3691_v63 = vor.u32 %v3854_v33, %v3688_v48  ;;  %v3655_v45 = vor.u32 %v3847_v53, %v3654_v36  ;;  %v3623_v17 = vor.u32 %v3838_v50, %v3622_v0  ;;  %v3828_v26 = vld [vmem:[#allocation8 + $0x20] sm:$0xf0]  ;;  %v3839_v53 = vld [vmem:[#allocation8 + $0x7c] sm:$0xf] }
 0x17f   : > { %v818_v56 = vsub.f32 1.5, %v817_v42  ;;  %v737_v38 = vmul.f32 0.5, %v736_v46  ;;  %1256 = vmatpush.bf16.msrb.mxu2 %v3675_v37  ;;  %v5565_v31 = vpack.c.bf16 %v875_v18, %v874_v9  ;;  %vm741_vm14 = vweird.f32 %v5527_v61  ;;  %v3840_v25 = vld [vmem:[#allocation8 + $0x84] sm:$0xf]  ;;  %v3636_v18 = vld [vmem:[#allocation8 + $0x94] sm:$0xf0] }
 0x180   : > { %1356 = vmatpush.bf16.msrb.mxu0 %v3643_v47  ;;  %1304 = vmatpush.bf16.msrb.mxu3 %v3699_v51  ;;  %v3679_v11 = vor.u32 %v3850_v41, %v3676_v55  ;;  %v830_v28 = vmul.f32 %v733_v43, %v5181_v16  ;;  %v3671_v29 = vor.u32 %v3849_v54, %v3668_v59  ;;  %vm742_vm0 = vmor %vm740_vm13, %vm741_vm14  ;;  %v3628_v42 = vld [vmem:[#allocation8 + $0x8c] sm:$0xf0]  ;;  %v3835_v43 = vld [vmem:[#allocation8 + $0x5c] sm:$0xf] }
 0x181   : > { %v819_v7 = vmul.f32 %v5517_v39, %v818_v56  ;;  %v738_v19 = vsub.f32 1.5, %v737_v38  ;;  %1206 = vmatpush.bf16.msrb.mxu1 %v3691_v63  ;;  %1189 = vmatmul.bf16.gmra.mxu2 %v5565_v31  ;;  %v858_v21 = vmul.f32 %v5285_v1, %v838_v52  ;;  %v3635_v13 = vor.u32 %v3842_v40, %v3634_v60  ;;  %v3594_v37 = vld [vmem:[#allocation8 + $0x30] sm:$0xf]  ;;  %v3834_v55 = vld [vmem:[#allocation8 + $0x54] sm:$0xf] }
 0x182   : > { %v3603_v24 = vor.u32 %v3833_v8, %v3602_v2  ;;  %v3659_v30 = vor.u32 %v3845_v62, %v3656_v20  ;;  %v850_v58 = vmul.f32 %v5285_v1, %v830_v28  ;;  %v3651_v33 = vor.u32 %v3844_v22, %v3648_v6  ;;  %v3616_v47 = vld [vmem:[#allocation8 + $0x6c] sm:$0xf0]  ;;  %v3608_v54 = vld [vmem:[#allocation8 + $0x64] sm:$0xf0]  ;;  %v3827_v63 = vld [vmem:[#allocation8 + $0x18] sm:$0xf0] }
 0x183   : > { %v823_v14 = vsel %vm822_vm15, %v5517_v39, %v819_v7  ;;  %v739_v5 = vmul.f32 %v5527_v61, %v738_v19  ;;  %1257 = vmatpush.bf16.msrb.mxu2 %v3655_v45  ;;  %v878_v9 = vadd.f32 %v5307_v27, %v858_v21  ;;  %v3615_v49 = vor.u32 %v3837_v3, %v3614_v44  ;;  %v3574_v38 = vld [vmem:[#allocation8 + $0x8] sm:$0xf]  ;;  %v3588_v40 = vld [vmem:[#allocation8 + $0x3c] sm:$0xf0]  ;;  %v3825_v8 = vld [vmem:[#allocation8 + $0xc] sm:$0xf] }
 0x184   : > { %v839_v16 = vmul.f32 %v823_v14, %v5194_v12  ;;  %1357 = vmatpush.bf16.msrb.mxu0 %v3623_v17  ;;  %1305 = vmatpush.bf16.msrb.mxu3 %v3679_v11  ;;  %v3583_v36 = vor.u32 %v3828_v26, %v3582_v34  ;;  %v3639_v46 = vor.u32 %v3840_v25, %v3636_v18  ;;  %v3596_v45 = vld [vmem:[#allocation8 + $0x44] sm:$0xf0]  ;;  %v3829_v17 = vld [vmem:[#allocation8 + $0x2c] sm:$0xf]  ;;  %v3576_v7 = vld [vmem:[#allocation8 + $0x1c] sm:$0xf0] }
 0x185   : > { %v743_v39 = vsel %vm742_vm0, %v5527_v61, %v739_v5  ;;  %1207 = vmatpush.bf16.msrb.mxu1 %v3671_v29  ;;  %v870_v0 = vadd.f32 %v5307_v27, %v850_v58  ;;  %v3631_v51 = vor.u32 %v3839_v53, %v3628_v42  ;;  %v3619_v56 = vor.u32 %v3835_v43, %v3616_v47  ;;  %v3824_v11 = vld [vmem:[#allocation8 + $0x4] sm:$0xf]  ;;  %v3568_v62 = vld [vmem:[#allocation8 + $0x14] sm:$0xf0] }
 0x186   : > { %v859_v15 = vmul.f32 %v5285_v1, %v839_v16  ;;  %v831_v12 = vmul.f32 %v743_v39, %v5198_v23  ;;  %v3832_v23 = vld [vmem:[#allocation8 + $0x40] sm:$0xf0]  ;;  %v3611_v59 = vor.u32 %v3834_v55, %v3608_v54  ;;  %v3575_v60 = vor.u32 %v3827_v63, %v3574_v38 }
 0x187   : > { %1258 = vmatpush.bf16.msrb.mxu2 %v3635_v13  ;;  %v3595_v41 = vor.u32 %v3832_v23, %v3594_v37  ;;  %v3591_v19 = vor.u32 %v3829_v17, %v3588_v40  ;;  %v3579_v20 = vor.u32 %v3825_v8, %v3576_v7  ;;  %v3571_v28 = vor.u32 %v3824_v11, %v3568_v62 }
 0x188   : > { %v879_v48 = vadd.f32 %v5307_v27, %v859_v15  ;;  %v851_v61 = vmul.f32 %v5285_v1, %v831_v12  ;;  %1358 = vmatpush.bf16.msrb.mxu0 %v3603_v24  ;;  %1306 = vmatpush.bf16.msrb.mxu3 %v3659_v30 }
 0x189   : > { %1208 = vmatpush.bf16.msrb.mxu1 %v3651_v33 }
 0x18a   : > { %v871_v50 = vadd.f32 %v5307_v27, %v851_v61  ;;  %v5592_v52 = vpack.c.bf16 %v879_v48, %v878_v9  ;;  %v3830_v27 = vld [vmem:[#allocation8 + $0x34] sm:$0xf] }
 0x18b   : > { %1259 = vmatpush.bf16.msrb.mxu2 %v3615_v49  ;;  %v3599_v2 = vor.u32 %v3830_v27, %v3596_v45 }
 0x18c   : > { %1359 = vmatpush.bf16.msrb.mxu0 %v3583_v36  ;;  %v883_v1 = vpack.c.bf16 %v871_v50, %v870_v0  ;;  %1199 = vmatmul.bf16.gmra.mxu3 %v5592_v52 }
 0x18d   : > { %1307 = vmatpush.bf16.msrb.mxu3 %v3639_v46  ;;  %1209 = vmatpush.bf16.msrb.mxu1 %v3631_v51 }
 0x18e   : > { %1179 = vmatmul.bf16.gmra.mxu1 %v883_v1 }
 0x18f   : > { %1360 = vmatmul.bf16.vlgmr.msrb.gmra.mxu0 %v5401_v35  ;;  %1260 = vmatpush.bf16.msrb.mxu2 %v3595_v41 }
 0x191   : > { %1308 = vmatpush.bf16.msrb.mxu3 %v3619_v56  ;;  %1210 = vmatpush.bf16.msrb.mxu1 %v3611_v59 }
 0x193   : > { %1261 = vmatpush.bf16.msrb.mxu2 %v3575_v60 }
 0x195   : > { %1309 = vmatpush.bf16.msrb.mxu3 %v3599_v2  ;;  %1211 = vmatpush.bf16.msrb.mxu1 %v3591_v19 }
 0x196   : > { %1262 = vmatmul.bf16.vlgmr.msrb.gmra.mxu2 %v5401_v35 }
 0x199   : > { %1310 = vmatpush.bf16.msrb.mxu3 %v3579_v20  ;;  %1212 = vmatpush.bf16.msrb.mxu1 %v3571_v28 }
 0x19c   : > { %1311 = vmatmul.bf16.vlgmr.msrb.gmra.mxu3 %v5401_v35 }
 0x19e   : > { %1213 = vmatmul.bf16.vlgmr.msrb.gmra.mxu1 %v5401_v35  ;;  %v5612_v35 = vld [vmem:[#allocation10] sm:$0x1f] }
 0x19f   : > { %1365 = vmatmul.bf16.gmra.mxu0 %v5520_v32  ;;  %v5704_v19 = vperm.slane %v5612_v35, 4 }
 0x1a6   : > { %1267 = vmatmul.bf16.gmra.mxu2 %v5520_v32 }
 0x1ac   : > { %1316 = vmatmul.bf16.gmra.mxu3 %v5520_v32 }
 0x1ae   : > { %1218 = vmatmul.bf16.gmra.mxu1 %v5520_v32  ;;  %v5615_v32 = vperm.slane %v5612_v35, 0 }
 0x1af   : > { %1370 = vmatmul.bf16.gmra.mxu0 %v5523_v57 }
 0x1b6   : > { %1272 = vmatmul.bf16.gmra.mxu2 %v5523_v57 }
 0x1bc   : > { %1321 = vmatmul.bf16.gmra.mxu3 %v5523_v57 }
 0x1be   : > { %1223 = vmatmul.bf16.gmra.mxu1 %v5523_v57 }
 0x1bf   : > { %1375 = vmatmul.bf16.gmra.mxu0 %v883_v1 }
 0x1c6   : > { %1277 = vmatmul.bf16.gmra.mxu2 %v883_v1 }
 0x1cc   : > { %1326 = vmatmul.bf16.gmra.mxu3 %v883_v1 }
 0x1ce   : > { %1228 = vmatmul.bf16.gmra.mxu1 %v883_v1 }
 0x1cf   : > { %1380 = vmatmul.bf16.gmra.mxu0 %v5444_v4 }
 0x1d6   : > { %1282 = vmatmul.bf16.gmra.mxu2 %v5444_v4 }
 0x1dc   : > { %1331 = vmatmul.bf16.gmra.mxu3 %v5444_v4 }
 0x1de   : > { %1233 = vmatmul.bf16.gmra.mxu1 %v5444_v4 }
 0x1df   : > { %1385 = vmatmul.bf16.gmra.mxu0 %v5565_v31 }
 0x1e2   : > { %v1165_v57 = vpop.f32.mrf.mxu0 }
 0x1e3   : > { %v5618_v29 = vadd.f32 %v1165_v57, %v5615_v32 }
 0x1e5   : > { %v3724_v21 = vmul.f32 -1.442695, %v5618_v29 }
 0x1e6   : > { %1287 = vmatmul.bf16.gmra.mxu2 %v5565_v31 }
 0x1e7   : > { %4167 = vpow2.f32 %v3724_v21 }
 0x1ea   : > { %v1167_v14 = vpop.f32.mrf.mxu0 }
 0x1eb   : > { %v5626_v4 = vadd.f32 %v1167_v14, %v5615_v32 }
 0x1ec   : > { %1336 = vmatmul.bf16.gmra.mxu3 %v5565_v31 }
 0x1ed   : > { %v4168_v6 = vpop.eup %4167  ;;  %v3729_v16 = vmul.f32 -1.442695, %v5626_v4 }
 0x1ee   : > { %1238 = vmatmul.bf16.gmra.mxu1 %v5565_v31  ;;  %v5635_v30 = vadd.f32 1.0, %v4168_v6 }
 0x1ef   : > { %1390 = vmatmul.bf16.gmra.mxu0 %v5456_v10  ;;  %4169 = vpow2.f32 %v3729_v16 }
 0x1f0   : > { %v1185_v5 = vpop.f32.mrf.mxu2  ;;  %4171 = vrcp.f32 %v5635_v30  ;;  %v1730_v45 = vand.u32 2147483647, %v5635_v30  ;;  %vm1726_vm2 = vweird.f32 %v5635_v30  ;;  %v1732_v20 = vand.u32 2147483648, %v5635_v30 }
 0x1f1   : > { %v5629_v13 = vadd.f32 %v1185_v5, %v5615_v32 }
 0x1f2   : > { %vm5710_vm4 = vcmp.eq.f32.partialorder %v1730_v45, 8.507059e+37 }
 0x1f3   : > { %v1195_v22 = vpop.f32.mrf.mxu3  ;;  %v3764_v34 = vmul.f32 -1.442695, %v5629_v13 }
 0x1f4   : > { %v5633_v24 = vadd.f32 %v1195_v22, %v5615_v32 }
 0x1f5   : > { %v4170_v25 = vpop.eup %4169  ;;  %4173 = vpow2.f32 %v3764_v34 }
 0x1f6   : > { %1292 = vmatmul.bf16.gmra.mxu2 %v5456_v10  ;;  %v3784_v33 = vmul.f32 -1.442695, %v5633_v24  ;;  %v5657_v9 = vpop.eup %4171  ;;  %v5659_v49 = vadd.f32 1.0, %v4170_v25 }
 0x1f7   : > { %v1170_v31 = vpop.f32.mrf.mxu0  ;;  %v1175_v44 = vpop.f32.mrf.mxu1  ;;  %v1722_v46 = vmul.f32 %v5657_v9, %v5635_v30  ;;  %vm1727_vm1 = vweird.f32 %v5657_v9 }
 0x1f8   : > { %v5639_v3 = vadd.f32 %v1175_v44, %v5615_v32  ;;  %v1187_v39 = vpop.f32.mrf.mxu2  ;;  %v5647_v15 = vadd.f32 %v1170_v31, %v5615_v32  ;;  %4175 = vpow2.f32 %v3784_v33  ;;  %vm5706_vm3 = vmor %vm1726_vm2, %vm1727_vm1  ;;  %v1805_v22 = vand.u32 2147483647, %v5659_v49 }
 0x1f9   : > { %v5644_v26 = vadd.f32 %v1187_v39, %v5615_v32  ;;  %v1723_v43 = vsub.f32 1.0, %v1722_v46  ;;  %v1807_v25 = vand.u32 2147483648, %v5659_v49  ;;  %vm1801_vm5 = vweird.f32 %v5659_v49 }
 0x1fa   : > { %v3734_v18 = vmul.f32 -1.442695, %v5647_v15  ;;  %v3744_v53 = vmul.f32 -1.442695, %v5639_v3  ;;  %vm5748_vm7 = vcmp.eq.f32.partialorder %v1805_v22, 8.507059e+37 }
 0x1fb   : > { %v1197_v58 = vpop.f32.mrf.mxu3  ;;  %v3769_v36 = vmul.f32 -1.442695, %v5644_v26  ;;  %v4174_v42 = vpop.eup %4173  ;;  %v1724_v54 = vmul.f32 %v5657_v9, %v1723_v43 }
 0x1fc   : > { %1341 = vmatmul.bf16.gmra.mxu3 %v5456_v10  ;;  %v5651_v12 = vadd.f32 %v1197_v58, %v5615_v32  ;;  %4177 = vpow2.f32 %v3734_v18  ;;  %v5673_v50 = vadd.f32 1.0, %v4174_v42  ;;  %v1733_v58 = vor.u32 1.1754944e-38, %v1732_v20 }
 0x1fd   : > { %4179 = vrcp.f32 %v5659_v49  ;;  %v1725_v60 = vadd.f32 %v5657_v9, %v1724_v54 }
 0x1fe   : > { %1243 = vmatmul.bf16.gmra.mxu1 %v5456_v10  ;;  %v3789_v23 = vmul.f32 -1.442695, %v5651_v12  ;;  %4181 = vpow2.f32 %v3769_v36  ;;  %v4176_v0 = vpop.eup %4175  ;;  %v2332_v33 = vand.u32 2147483648, %v5673_v50  ;;  %v2330_v54 = vand.u32 2147483647, %v5673_v50 }
 0x1ff   : > { %1395 = vmatmul.bf16.gmra.mxu0 %v5592_v52  ;;  %v1172_v48 = vpop.f32.mrf.mxu0  ;;  %v1177_v61 = vpop.f32.mrf.mxu1  ;;  %4183 = vpow2.f32 %v3744_v53  ;;  %v5676_v1 = vadd.f32 1.0, %v4176_v0  ;;  %v1729_v14 = vsel %vm5706_vm3, %v5657_v9, %v1725_v60  ;;  %vm2326_vm8 = vweird.f32 %v5673_v50 }
 0x200   : > { %v5666_v10 = vadd.f32 %v1172_v48, %v5615_v32  ;;  %v5669_v37 = vadd.f32 %v1177_v61, %v5615_v32  ;;  %4185 = vpow2.f32 %v3789_v23  ;;  %v1734_v53 = vsel %vm5710_vm4, %v1733_v58, %v1729_v14 }
 0x201   : > { %4187 = vrcp.f32 %v5673_v50  ;;  %v2632_v46 = vand.u32 2147483648, %v5676_v1  ;;  %v5773_v60 = vmul.f32 %v1734_v53, %v5618_v29  ;;  %vm2626_vm10 = vweird.f32 %v5676_v1 }
 0x202   : > { %v4178_v51 = vpop.eup %4177  ;;  %4189 = vrcp.f32 %v5676_v1  ;;  %v3739_v2 = vmul.f32 -1.442695, %v5666_v10  ;;  %v3749_v6 = vmul.f32 -1.442695, %v5669_v37  ;;  %v2630_v29 = vand.u32 2147483647, %v5676_v1 }
 0x203   : > { %v5678_v41 = vpop.eup %4179  ;;  %v5683_v38 = vadd.f32 1.0, %v4178_v51  ;;  %v5790_v62 = vor.u32 1.1754944e-38, %v2632_v46  ;;  %vm5804_vm12 = vcmp.eq.f32.partialorder %v2330_v54, 8.507059e+37 }
 0x204   : > { %v1190_v47 = vpop.f32.mrf.mxu2  ;;  %v4182_v55 = vpop.eup %4181  ;;  %v1797_v63 = vmul.f32 %v5678_v41, %v5659_v49  ;;  %vm1802_vm6 = vweird.f32 %v5678_v41  ;;  %vm5817_vm14 = vcmp.eq.f32.partialorder %v2630_v29, 8.507059e+37 }
 0x205   : > { %v4184_v56 = vpop.eup %4183  ;;  %v5690_v59 = vadd.f32 1.0, %v4182_v55  ;;  %4191 = vrcp.f32 %v5683_v38  ;;  %v5727_v16 = vadd.f32 %v1190_v47, %v5615_v32  ;;  %vm5784_vm9 = vmor %vm1801_vm5, %vm1802_vm6  ;;  %vm1876_vm13 = vweird.f32 %v5683_v38 }
 0x206   : > { %1297 = vmatmul.bf16.gmra.mxu2 %v5592_v52  ;;  %v4186_v27 = vpop.eup %4185  ;;  %v5694_v17 = vadd.f32 1.0, %v4184_v56  ;;  %v5768_v56 = vor.u32 1.1754944e-38, %v2332_v33 }
 0x207   : > { %v5696_v40 = vpop.eup %4187  ;;  %v5701_v8 = vadd.f32 1.0, %v4186_v27  ;;  %4193 = vrcp.f32 %v5690_v59  ;;  %v3774_v61 = vmul.f32 -1.442695, %v5727_v16  ;;  %v2407_v33 = vand.u32 2147483648, %v5690_v59 }
 0x208   : > { %v5716_v21 = vpop.eup %4189  ;;  %v2322_v5 = vmul.f32 %v5696_v40, %v5673_v50  ;;  %4195 = vrcp.f32 %v5694_v17  ;;  %vm2327_vm11 = vweird.f32 %v5696_v40  ;;  %vm2401_vm15 = vweird.f32 %v5690_v59 }
 0x209   : > { %4197 = vpow2.f32 %v3739_v2  ;;  %v2622_v18 = vmul.f32 %v5716_v21, %v5676_v1  ;;  %vm2627_vm0 = vweird.f32 %v5716_v21  ;;  %vm5839_vm1 = vmor %vm2326_vm8, %vm2327_vm11  ;;  %vm2026_vm6 = vweird.f32 %v5694_v17 }
 0x20a   : > { %4199 = vrcp.f32 %v5701_v8  ;;  %v2323_v42 = vsub.f32 1.0, %v2322_v5  ;;  %vm5864_vm5 = vmor %vm2626_vm10, %vm2627_vm0 }
 0x20b   : > { %v1180_v7 = vpop.f32.mrf.mxu1  ;;  %v5740_v34 = vpop.eup %4191  ;;  %4201 = vpow2.f32 %v3749_v6  ;;  %v2623_v27 = vsub.f32 1.0, %v2622_v18  ;;  %v1880_v6 = vand.u32 2147483647, %v5683_v38 }
 0x20c   : > { %1346 = vmatmul.bf16.gmra.mxu3 %v5592_v52  ;;  %v1361_v28 = vpop.f32.mrf.mxu0  ;;  %v1192_v57 = vpop.f32.mrf.mxu2  ;;  %v5730_v30 = vadd.f32 %v1180_v7, %v5615_v32  ;;  %v1872_v43 = vmul.f32 %v5740_v34, %v5683_v38  ;;  %4203 = vpow2.f32 %v3774_v61  ;;  %v2324_v7 = vmul.f32 %v5696_v40, %v2323_v42 }
 0x20d   : > { %v5735_v44 = vadd.f32 %v1361_v28, %v5704_v19  ;;  %v5738_v39 = vadd.f32 %v1192_v57, %v5615_v32  ;;  %v5753_v36 = vpop.eup %4193  ;;  %v2624_v22 = vmul.f32 %v5716_v21, %v2623_v27  ;;  %v2405_v61 = vand.u32 2147483647, %v5690_v59 }
 0x20e   : > { %1248 = vmatmul.bf16.gmra.mxu1 %v5592_v52  ;;  %v1798_v52 = vsub.f32 1.0, %v1797_v63  ;;  %v5758_v23 = vpop.eup %4195  ;;  %v1808_v63 = vor.u32 1.1754944e-38, %v1807_v25  ;;  %v2397_v2 = vmul.f32 %v5753_v36, %v5690_v59  ;;  %v1873_v57 = vsub.f32 1.0, %v1872_v43 }
 0x20f   : > { %8296 = vst [vmem:[#allocation28_spill] sm:$0xff] %v5738_v39  ;;  %v1200_v9 = vpop.f32.mrf.mxu3  ;;  %v3728_v47 = vmul.f32 -1.442695, %v5735_v44  ;;  %v4198_v55 = vpop.eup %4197  ;;  %v2022_v49 = vmul.f32 %v5758_v23, %v5694_v17  ;;  %v2325_v18 = vadd.f32 %v5696_v40, %v2324_v7  ;;  %v1882_v42 = vand.u32 2147483648, %v5683_v38 }
 0x210   : > { %v1799_v31 = vmul.f32 %v5678_v41, %v1798_v52  ;;  %v5765_v51 = vadd.f32 %v1200_v9, %v5615_v32  ;;  %v5770_v45 = vpop.eup %4199  ;;  %v3754_v52 = vmul.f32 -1.442695, %v5730_v30  ;;  %v5797_v14 = vadd.f32 1.0, %v4198_v55 }
 0x211   : > { %4205 = vpow2.f32 %v3728_v47  ;;  %v4202_v5 = vpop.eup %4201  ;;  %v2023_v43 = vsub.f32 1.0, %v2022_v49  ;;  %v2625_v48 = vadd.f32 %v5716_v21, %v2624_v22  ;;  %vm1877_vm2 = vweird.f32 %v5740_v34 }
 0x212   : > { %v1800_v0 = vadd.f32 %v5678_v41, %v1799_v31  ;;  %8299 = vst [vmem:[#allocation29_spill] sm:$0xff] %v5765_v51  ;;  %v2697_v31 = vmul.f32 %v5770_v45, %v5701_v8  ;;  %4207 = vpow2.f32 %v3754_v52  ;;  %v4204_v46 = vpop.eup %4203  ;;  %v5824_v47 = vadd.f32 1.0, %v4202_v5  ;;  %vm5890_vm8 = vmor %vm1876_vm13, %vm1877_vm2 }
 0x213   : > { %v1182_v20 = vpop.f32.mrf.mxu1  ;;  %4209 = vrcp.f32 %v5797_v14  ;;  %v2408_v52 = vor.u32 1.1754944e-38, %v2407_v33  ;;  %vm5844_vm3 = vcmp.eq.f32.partialorder %v1880_v6, 8.507059e+37  ;;  %v2329_v50 = vsel %vm5839_vm1, %v5696_v40, %v2325_v18 }
 0x214   : > { %v1804_v28 = vsel %vm5784_vm9, %v5678_v41, %v1800_v0  ;;  %v2398_v41 = vsub.f32 1.0, %v2397_v2  ;;  %v5811_v25 = vadd.f32 %v1182_v20, %v5615_v32  ;;  %v1874_v0 = vmul.f32 %v5740_v34, %v1873_v57 }
 0x215   : > { %v1809_v9 = vsel %vm5748_vm7, %v1808_v63, %v1804_v28  ;;  %v2698_v63 = vsub.f32 1.0, %v2697_v31  ;;  %v5848_v20 = vadd.f32 1.0, %v4204_v46  ;;  %vm5856_vm4 = vcmp.eq.f32.partialorder %v2405_v61, 8.507059e+37 }
 0x216   : > { %8304 = vst [vmem:[#allocation30_spill] sm:$0xff] %v5811_v25  ;;  %v5830_v27 = vmul.f32 %v1809_v9, %v5626_v4  ;;  %v2399_v2 = vmul.f32 %v5753_v36, %v2398_v41  ;;  %v1883_v4 = vor.u32 1.1754944e-38, %v1882_v42  ;;  %v2024_v22 = vmul.f32 %v5758_v23, %v2023_v43 }
 0x217   : > { %v1202_v55 = vpop.f32.mrf.mxu3  ;;  %v4206_v54 = vpop.eup %4205  ;;  %4211 = vrcp.f32 %v5824_v47  ;;  %v2629_v40 = vsel %vm5864_vm5, %v5716_v21, %v2625_v48  ;;  %v2699_v6 = vmul.f32 %v5770_v45, %v2698_v63  ;;  %vm2402_vm7 = vweird.f32 %v5753_v36 }
 0x218   : > { %v5833_v7 = vadd.f32 1.0, %v4206_v54  ;;  %v5851_v28 = vadd.f32 %v1202_v55, %v5615_v32  ;;  %v4208_v57 = vpop.eup %4207  ;;  %v1875_v32 = vadd.f32 %v5740_v34, %v1874_v0  ;;  %v2400_v31 = vadd.f32 %v5753_v36, %v2399_v2  ;;  %vm5908_vm10 = vmor %vm2401_vm15, %vm2402_vm7 }
 0x219   : > { %v5877_v1 = vpop.eup %4209  ;;  %v2030_v41 = vand.u32 2147483647, %v5694_v17  ;;  %v2032_v33 = vand.u32 2147483648, %v5694_v17  ;;  %v2334_v21 = vsel %vm5804_vm12, %v5768_v56, %v2329_v50  ;;  %v2705_v9 = vand.u32 2147483647, %v5701_v8 }
 0x21a   : > { %8311 = vst [vmem:[#allocation31_spill] sm:$0xff] %v5851_v28  ;;  %4213 = vrcp.f32 %v5833_v7  ;;  %v5896_v61 = vadd.f32 1.0, %v4208_v57  ;;  %v2634_v42 = vsel %vm5817_vm14, %v5790_v62, %v2629_v40  ;;  %v1879_v56 = vsel %vm5890_vm8, %v5740_v34, %v1875_v32 }
 0x21b   : > { %4215 = vrcp.f32 %v5848_v20  ;;  %v2025_v38 = vadd.f32 %v5758_v23, %v2024_v22  ;;  %vm2027_vm9 = vweird.f32 %v5758_v23  ;;  %v2700_v46 = vadd.f32 %v5770_v45, %v2699_v6 }
 0x21c   : > { %vm2702_vm11 = vweird.f32 %v5770_v45  ;;  %v1947_v62 = vmul.f32 %v5877_v1, %v5797_v14  ;;  %v3779_v53 = vmul.f32 -1.442695, %v5738_v39  ;;  %v2404_v0 = vsel %vm5908_vm10, %v5753_v36, %v2400_v31  ;;  %vm5937_vm13 = vmor %vm2026_vm6, %vm2027_vm9  ;;  %v1363_v36 = vpop.f32.mrf.mxu0 }
 0x21d   : > { %v5917_v34 = vpop.eup %4211  ;;  %vm5922_vm12 = vcmp.eq.f32.partialorder %v2030_v41, 8.507059e+37  ;;  %v2033_v43 = vor.u32 1.1754944e-38, %v2032_v33  ;;  %v2707_v55 = vand.u32 2147483648, %v5701_v8  ;;  %v5930_v48 = vmul.f32 %v2334_v21, %v5629_v13  ;;  %v1263_v21 = vpop.f32.mrf.mxu2 }
 0x21e   : > { %v5933_v63 = vmul.f32 %v2634_v42, %v5633_v24  ;;  %vm2701_vm14 = vweird.f32 %v5701_v8  ;;  %4217 = vrcp.f32 %v5896_v61  ;;  %v1884_v11 = vsel %vm5844_vm3, %v1883_v4, %v1879_v56 }
 0x21f   : > { %8322 = vst [vmem:[#allocation32_spill] sm:$0xff] %v5930_v48  ;;  %v2029_v13 = vsel %vm5937_vm13, %v5758_v23, %v2025_v38  ;;  %vm5950_vm15 = vmor %vm2701_vm14, %vm2702_vm11  ;;  %vm5954_vm0 = vcmp.eq.f32.partialorder %v2705_v9, 8.507059e+37  ;;  %v2409_v29 = vsel %vm5856_vm4, %v2408_v52, %v2404_v0  ;;  %v1948_v4 = vsub.f32 1.0, %v1947_v62 }
 0x220   : > { %v5927_v54 = vpop.eup %4213  ;;  %8323 = vst [vmem:[#allocation33_spill] sm:$0xff] %v5933_v63  ;;  %v2704_v23 = vsel %vm5950_vm15, %v5770_v45, %v2700_v46  ;;  %4219 = vpow2.f32 %v3779_v53  ;;  %v2708_v50 = vor.u32 1.1754944e-38, %v2707_v55  ;;  %v1957_v5 = vand.u32 2147483648, %v5797_v14 }
 0x221   : > { %v1782_v8 = vmul.f32 %v5927_v54, %v5833_v7  ;;  %v5960_v57 = vpop.eup %4215  ;;  %v2097_v32 = vmul.f32 %v5917_v34, %v5824_v47  ;;  %v5971_v22 = vadd.f32 %v1363_v36, %v5704_v19  ;;  %v5974_v40 = vmul.f32 %v1884_v11, %v5647_v15 }
 0x222   : > { %v2034_v52 = vsel %vm5922_vm12, %v2033_v43, %v2029_v13  ;;  %v3794_v45 = vmul.f32 -1.442695, %v5765_v51  ;;  %v5980_v6 = vmul.f32 %v2409_v29, %v5644_v26  ;;  %v2709_v31 = vsel %vm5954_vm0, %v2708_v50, %v2704_v23 }
 0x223   : > { %v1783_v49 = vsub.f32 1.0, %v1782_v8  ;;  %v2472_v41 = vmul.f32 %v5960_v57, %v5848_v20  ;;  %v3759_v33 = vmul.f32 -1.442695, %v5811_v25  ;;  %v1949_v18 = vmul.f32 %v5877_v1, %v1948_v4 }
 0x224   : > { %8330 = vst [vmem:[#allocation34_spill] sm:$0xff] %v5980_v6  ;;  %v5987_v15 = vpop.eup %4217  ;;  %vm1951_vm1 = vweird.f32 %v5797_v14  ;;  %v1955_v9 = vand.u32 2147483647, %v5797_v14  ;;  %v2107_v26 = vand.u32 2147483648, %v5824_v47  ;;  %v5994_v42 = vmul.f32 %v2034_v52, %v5639_v3 }
 0x225   : > { %v5996_v56 = vor.u32 1.1754944e-38, %v1957_v5  ;;  %v2098_v38 = vsub.f32 1.0, %v2097_v32  ;;  %v3733_v58 = vmul.f32 -1.442695, %v5971_v22  ;;  %v6000_v62 = vmul.f32 %v2709_v31, %v5651_v12  ;;  %v1214_v32 = vpop.f32.mrf.mxu1 }
 0x226   : > { %v4220_v46 = vpop.eup %4219  ;;  %v2105_v53 = vand.u32 2147483647, %v5824_v47  ;;  %v1784_v0 = vmul.f32 %v5927_v54, %v1783_v49  ;;  %4221 = vpow2.f32 %v3794_v45  ;;  %v2473_v59 = vsub.f32 1.0, %v2472_v41 }
 0x227   : > { %8331 = vst [vmem:[#allocation35_spill] sm:$0xff] %v6000_v62  ;;  %v2482_v43 = vand.u32 2147483648, %v5848_v20  ;;  %v2172_v3 = vmul.f32 %v5987_v15, %v5896_v61  ;;  %4223 = vpow2.f32 %v3759_v33  ;;  %v1950_v55 = vadd.f32 %v5877_v1, %v1949_v18  ;;  %v1366_v33 = vpop.f32.mrf.mxu0 }
 0x228   : > { %vm1952_vm2 = vweird.f32 %v5877_v1  ;;  %vm2101_vm3 = vweird.f32 %v5824_v47  ;;  %v6010_v12 = vor.u32 1.1754944e-38, %v2107_v26  ;;  %v2480_v2 = vand.u32 2147483647, %v5848_v20  ;;  %v1312_v26 = vpop.f32.mrf.mxu3 }
 0x229   : > { %vm6013_vm4 = vcmp.eq.f32.partialorder %v1955_v9, 8.507059e+37  ;;  %v2099_v11 = vmul.f32 %v5917_v34, %v2098_v38  ;;  %vm2476_vm5 = vweird.f32 %v5848_v20  ;;  %v1790_v13 = vand.u32 2147483647, %v5833_v7  ;;  %vm6038_vm7 = vmor %vm1951_vm1, %vm1952_vm2 }
 0x22a   : > { %v6020_v24 = vadd.f32 1.0, %v4220_v46  ;;  %4225 = vpow2.f32 %v3733_v58  ;;  %v1785_v17 = vadd.f32 %v5927_v54, %v1784_v0  ;;  %vm1787_vm6 = vweird.f32 %v5927_v54 }
 0x22b   : > { %v6025_v8 = vperm.slane %v5612_v35, 2  ;;  %v6028_v29 = vperm.slane %v5612_v35, 1  ;;  %v2474_v23 = vmul.f32 %v5960_v57, %v2473_v59  ;;  %v6031_v4 = vor.u32 1.1754944e-38, %v2482_v43 }
 0x22c   : > { %v2173_v50 = vsub.f32 1.0, %v2172_v3  ;;  %v1792_v5 = vand.u32 2147483648, %v5833_v7  ;;  %v4222_v52 = vpop.eup %4221  ;;  %vm2102_vm8 = vweird.f32 %v5917_v34  ;;  %vm6043_vm9 = vcmp.eq.f32.partialorder %v2105_v53, 8.507059e+37 }
 0x22d   : > { %v2180_v31 = vand.u32 2147483647, %v5896_v61  ;;  %vm1786_vm10 = vweird.f32 %v5833_v7  ;;  %v6050_v41 = vadd.f32 %v1263_v21, %v6025_v8  ;;  %v4224_v18 = vpop.eup %4223  ;;  %v1954_v14 = vsel %vm6038_vm7, %v5877_v1, %v1950_v55  ;;  %v1265_v7 = vpop.f32.mrf.mxu2  ;;  %vm6095_vm15 = vmor %vm2101_vm3, %vm2102_vm8 }
 0x22e   : > { %vm2477_vm11 = vweird.f32 %v5960_v57  ;;  %vm6058_vm12 = vmor %vm1786_vm10, %vm1787_vm6  ;;  %vm6062_vm13 = vcmp.eq.f32.partialorder %v1790_v13, 8.507059e+37  ;;  %4227 = vrcp.f32 %v6020_v24  ;;  %v2100_v21 = vadd.f32 %v5917_v34, %v2099_v11 }
 0x22f   : > { %vm6068_vm14 = vcmp.eq.f32.partialorder %v2480_v2, 8.507059e+37  ;;  %v1789_v1 = vsel %vm6058_vm12, %v5927_v54, %v1785_v17  ;;  %v3726_v58 = vmul.f32 -1.442695, %v6050_v41  ;;  %v6077_v46 = vadd.f32 %v1214_v32, %v6028_v29  ;;  %vm6114_vm1 = vmor %vm2476_vm5, %vm2477_vm11 }
 0x230   : > { %v4226_v53 = vpop.eup %4225  ;;  %v2475_v0 = vadd.f32 %v5960_v57, %v2474_v23  ;;  %v2174_v59 = vmul.f32 %v5987_v15, %v2173_v50  ;;  %v1793_v43 = vor.u32 1.1754944e-38, %v1792_v5  ;;  %v6082_v3 = vadd.f32 %v1366_v33, %v5704_v19 }
 0x231   : > { %v6084_v55 = vadd.f32 1.0, %v4224_v18  ;;  %v6086_v2 = vadd.f32 1.0, %v4226_v53  ;;  %4229 = vpow2.f32 %v3726_v58  ;;  %v6089_v54 = vadd.f32 %v1265_v7, %v6025_v8  ;;  %v6136_v18 = vld [vmem:[%s8225_s5] ss:$0 sm:$0xff] }
 0x232   : > { %vm2176_vm0 = vweird.f32 %v5896_v61  ;;  %v2182_v13 = vand.u32 2147483648, %v5896_v61  ;;  %v1794_v17 = vsel %vm6062_vm13, %v1793_v43, %v1789_v1  ;;  %v3725_v23 = vmul.f32 -1.442695, %v6077_v46  ;;  %v6181_v53 = vld [vmem:[%s8226_s6] ss:$0 sm:$0xff] }
 0x233   : > { %v1959_v50 = vsel %vm6013_vm4, %v5996_v56, %v1954_v14  ;;  %v2104_v47 = vsel %vm6095_vm15, %v5917_v34, %v2100_v21  ;;  %4231 = vrcp.f32 %v6086_v2  ;;  %v3738_v32 = vmul.f32 -1.442695, %v6082_v3  ;;  %v6213_v34 = vld [vmem:[%s8226_s6 + $0x1] ss:$0 sm:$0xff] }
 0x234   : > { %v6120_v49 = vpop.eup %4227  ;;  %v2479_v56 = vsel %vm6114_vm1, %v5960_v57, %v2475_v0  ;;  %vm2177_vm2 = vweird.f32 %v5987_v15  ;;  %vm6126_vm3 = vcmp.eq.f32.partialorder %v2180_v31, 8.507059e+37  ;;  %v2557_v20 = vand.u32 2147483648, %v6020_v24 }
 0x235   : > { %v2175_v36 = vadd.f32 %v5987_v15, %v2174_v59  ;;  %v2925_v33 = vmul.f32 %v1794_v17, %v5735_v44  ;;  %4233 = vrcp.f32 %v6084_v55  ;;  %v3731_v57 = vmul.f32 -1.442695, %v6089_v54  ;;  %vm6160_vm4 = vmor %vm2176_vm0, %vm2177_vm2 }
 0x236   : > { %v6141_v31 = vmul.f32 %v1959_v50, %v5666_v10  ;;  %v2109_v14 = vsel %vm6043_vm9, %v6010_v12, %v2104_v47  ;;  %v2183_v9 = vor.u32 1.1754944e-38, %v2182_v13  ;;  %4235 = vpow2.f32 %v3725_v23 }
 0x237   : > { %v4230_v44 = vpop.eup %4229  ;;  %v2547_v7 = vmul.f32 %v6120_v49, %v6020_v24  ;;  %v6148_v21 = vadd.f32 1.0, %v4222_v52  ;;  %4237 = vpow2.f32 %v3738_v32  ;;  %v6151_v1 = vperm.slane %v5612_v35, 3  ;;  %v6167_v52 = vld [vmem:[%s8225_s5 + $0x1] ss:$0 sm:$0xff] }
 0x238   : > { %v2484_v10 = vsel %vm6068_vm14, %v6031_v4, %v2479_v56  ;;  %v6170_v45 = vor.u32 1.1754944e-38, %v2557_v20  ;;  %v6172_v58 = vadd.f32 1.0, %v4230_v44  ;;  %v2179_v61 = vsel %vm6160_vm4, %v5987_v15, %v2175_v36 }
 0x239   : > { %8350 = vst [vmem:[#allocation36_spill] sm:$0xff] %v6148_v21  ;;  %v4232_v4 = vpop.eup %4231  ;;  %v3067_v38 = vmul.f32 %v6136_v18, %v2925_v33  ;;  %4239 = vpow2.f32 %v3731_v57  ;;  %v6184_v0 = vadd.f32 %v1312_v26, %v6151_v1  ;;  %v6187_v59 = vmul.f32 %v2109_v14, %v5669_v37  ;;  %v1216_v14 = vpop.f32.mrf.mxu1 }
 0x23a   : > { %8353 = vst [vmem:[#allocation37_spill] sm:$0xff] %v6170_v45  ;;  %v1857_v43 = vmul.f32 %v4232_v4, %v6086_v2  ;;  %v6191_v11 = vmul.f32 -1.442695, %v5851_v28  ;;  %4241 = vrcp.f32 %v6172_v58  ;;  %v6197_v13 = vmul.f32 %v2484_v10, %v5727_v16  ;;  %v1368_v26 = vpop.f32.mrf.mxu0 }
 0x23b   : > { %v6194_v15 = vpop.eup %4233  ;;  %v2548_v17 = vsub.f32 1.0, %v2547_v7  ;;  %4243 = vrcp.f32 %v6148_v21  ;;  %v2184_v37 = vsel %vm6126_vm3, %v2183_v9, %v2179_v61  ;;  %v3151_v47 = vmul.f32 %v6167_v52, %v2925_v33 }
 0x23c   : > { %8354 = vst [vmem:[#allocation38_spill] sm:$0xff] %v6197_v13  ;;  %v4236_v50 = vpop.eup %4235  ;;  %v1858_v5 = vsub.f32 1.0, %v1857_v43  ;;  %v3727_v32 = vmul.f32 -1.442695, %v6184_v0  ;;  %v3085_v20 = vadd.f32 %v6181_v53, %v3067_v38  ;;  %v1865_v16 = vand.u32 2147483647, %v6086_v2 }
 0x23d   : > { %v4238_v56 = vpop.eup %4237  ;;  %v1867_v36 = vand.u32 2147483648, %v6086_v2  ;;  %v6208_v57 = vadd.f32 1.0, %v4236_v50  ;;  %vm1862_vm5 = vweird.f32 %v4232_v4  ;;  %v6218_v7 = vmul.f32 %v6120_v49, %v2548_v17 }
 0x23e   : > { %v1859_v9 = vmul.f32 %v4232_v4, %v1858_v5  ;;  %v6215_v33 = vadd.f32 1.0, %v4238_v56  ;;  %4245 = vpow2.f32 %v3727_v32  ;;  %v6222_v10 = vmul.f32 %v6194_v15, %v6084_v55  ;;  %v1268_v56 = vpop.f32.mrf.mxu2 }
 0x23f   : > { %v4240_v44 = vpop.eup %4239  ;;  %vm1861_vm6 = vweird.f32 %v6086_v2  ;;  %4247 = vrcp.f32 %v6208_v57  ;;  %v1762_v38 = vand.u32 2147483648, %v6172_v58  ;;  %v6231_v43 = vadd.f32 %v1216_v14, %v6028_v29 }
 0x240   : > { %v6226_v12 = vpop.eup %4241  ;;  %v1860_v61 = vadd.f32 %v4232_v4, %v1859_v9  ;;  %4249 = vrcp.f32 %v6215_v33  ;;  %v6236_v50 = vmul.f32 %v2184_v37, %v5730_v30  ;;  %vm1863_vm7 = vmor %vm1861_vm6, %vm1862_vm5  ;;  %v1868_v2 = vor.u32 1.1754944e-38, %v1867_v36 }
 0x241   : > { %v6233_v17 = vpop.eup %4243  ;;  %v1752_v5 = vmul.f32 %v6226_v12, %v6172_v58  ;;  %v6242_v32 = vadd.f32 %v1368_v26, %v5704_v19  ;;  %v3101_v9 = vmul.f32 0.00390625, %v3085_v20  ;;  %v3169_v23 = vadd.f32 %v6213_v34, %v3151_v47 }
 0x242   : > { %8355 = vst [vmem:[#allocation39_spill] sm:$0xff] %v6233_v17  ;;  %v1864_v14 = vsel %vm1863_vm7, %v4232_v4, %v1860_v61  ;;  %vm1866_vm8 = vcmp.eq.f32.partialorder %v1865_v16, 8.507059e+37  ;;  %v1760_v37 = vand.u32 2147483647, %v6172_v58  ;;  %v6247_v28 = vadd.f32 1.0, %v4240_v44 }
 0x243   : > { %v1869_v30 = vsel %vm1866_vm8, %v1868_v2, %v1864_v14  ;;  %v6250_v62 = vor.u32 1.1754944e-38, %v1762_v38  ;;  %v3730_v26 = vmul.f32 -1.442695, %v6231_v43  ;;  %v6254_v20 = vadd.f32 %v1268_v56, %v6025_v8 }
 0x244   : > { %v4246_v36 = vpop.eup %4245  ;;  %v2930_v51 = vmul.f32 %v1869_v30, %v5971_v22  ;;  %v1753_v47 = vsub.f32 1.0, %v1752_v5  ;;  %vm1741_vm9 = vweird.f32 %v6208_v57  ;;  %4251 = vrcp.f32 %v6247_v28 }
 0x245   : > { %v4248_v4 = vpop.eup %4247  ;;  %v3743_v16 = vmul.f32 -1.442695, %v6242_v32  ;;  %v1745_v2 = vand.u32 2147483647, %v6208_v57  ;;  %vm1756_vm10 = vweird.f32 %v6172_v58  ;;  %vm1757_vm11 = vweird.f32 %v6226_v12 }
 0x246   : > { %v4250_v44 = vpop.eup %4249  ;;  %v3068_v61 = vmul.f32 %v6136_v18, %v2930_v51  ;;  %v3152_v22 = vmul.f32 %v6167_v52, %v2930_v51  ;;  %v1737_v38 = vmul.f32 %v4248_v4, %v6208_v57  ;;  %v1747_v5 = vand.u32 2147483648, %v6208_v57  ;;  %v1314_v57 = vpop.f32.mrf.mxu3  ;;  %vm6318_vm4 = vmor %vm1756_vm10, %vm1757_vm11 }
 0x247   : > { %v1932_v56 = vmul.f32 %v4250_v44, %v6215_v33  ;;  %vm1936_vm12 = vweird.f32 %v6215_v33  ;;  %v1940_v51 = vand.u32 2147483647, %v6215_v33  ;;  %v1754_v63 = vmul.f32 %v6226_v12, %v1753_v47 }
 0x248   : > { %v3086_v14 = vadd.f32 %v6181_v53, %v3068_v61  ;;  %v3170_v30 = vadd.f32 %v6213_v34, %v3152_v22  ;;  %v1738_v35 = vsub.f32 1.0, %v1737_v38  ;;  %v1942_v6 = vand.u32 2147483648, %v6215_v33 }
 0x249   : > { %v1933_v13 = vsub.f32 1.0, %v1932_v56  ;;  %v6274_v39 = vadd.f32 1.0, %v4246_v36  ;;  %vm1742_vm13 = vweird.f32 %v4248_v4  ;;  %vm6278_vm14 = vcmp.eq.f32.partialorder %v1760_v37, 8.507059e+37 }
 0x24a   : > { %v3102_v48 = vmul.f32 0.00390625, %v3086_v14  ;;  %v3909_v45 = vpack.c.bf16 %v3170_v30, %v3169_v23  ;;  %v1739_v25 = vmul.f32 %v4248_v4, %v1738_v35  ;;  %v6276_v17 = vpop.eup %4251  ;;  %vm6282_vm15 = vcmp.eq.f32.partialorder %v1745_v2, 8.507059e+37  ;;  %vm1743_vm1 = vmor %vm1741_vm9, %vm1742_vm13 }
 0x24b   : > { %v1934_v47 = vmul.f32 %v4250_v44, %v1933_v13  ;;  %vm1937_vm0 = vweird.f32 %v4250_v44  ;;  %4253 = vrcp.f32 %v6274_v39  ;;  %v1748_v23 = vor.u32 1.1754944e-38, %v1747_v5 }
 0x24c   : > { %v3869_v36 = vpack.c.bf16 %v3102_v48, %v3101_v9  ;;  %3910 = vst [vmem:[%s6289_s30] sm:$0xff] %v3909_v45   ;;  %v1740_v35 = vadd.f32 %v4248_v4, %v1739_v25  ;;  %v1827_v37 = vmul.f32 %v6276_v17, %v6247_v28  ;;  %v1755_v38 = vadd.f32 %v6226_v12, %v1754_v63  ;;  %vm1938_vm3 = vmor %vm1936_vm12, %vm1937_vm0  ;;  %v1219_v9 = vpop.f32.mrf.mxu1 }
 0x24d   : > { %v1935_v13 = vadd.f32 %v4250_v44, %v1934_v47  ;;  %vm6297_vm2 = vcmp.eq.f32.partialorder %v1940_v51, 8.507059e+37  ;;  %v1943_v48 = vor.u32 1.1754944e-38, %v1942_v6  ;;  %4255 = vpow2.f32 %v3730_v26 }
 0x24e   : > { %3870 = vst [vmem:[%s6303_s1] sm:$0xff] %v3869_v36   ;;  %v1744_v25 = vsel %vm1743_vm1, %v4248_v4, %v1740_v35  ;;  %v1828_v63 = vsub.f32 1.0, %v1827_v37  ;;  %v3736_v45 = vmul.f32 -1.442695, %v6254_v20  ;;  %v1835_v56 = vand.u32 2147483647, %v6247_v28  ;;  %v1371_v36 = vpop.f32.mrf.mxu0 }
 0x24f   : > { %v1749_v5 = vsel %vm6282_vm15, %v1748_v23, %v1744_v25  ;;  %v1939_v6 = vsel %vm1938_vm3, %v4250_v44, %v1935_v13  ;;  %v1837_v14 = vand.u32 2147483648, %v6247_v28  ;;  %4257 = vpow2.f32 %v3743_v16 }
 0x250   : > { %v2922_v26 = vmul.f32 %v1749_v5, %v6077_v46  ;;  %v1944_v4 = vsel %vm6297_vm2, %v1943_v48, %v1939_v6  ;;  %v1829_v30 = vmul.f32 %v6276_v17, %v1828_v63  ;;  %v1759_v51 = vsel %vm6318_vm4, %v6226_v12, %v1755_v38 }
 0x251   : > { %v4254_v44 = vpop.eup %4253  ;;  %4259 = vpow2.f32 %v3736_v45  ;;  %v6330_v58 = vadd.f32 %v1314_v57, %v6151_v1  ;;  %v6333_v22 = vadd.f32 %v1219_v9, %v6028_v29  ;;  %v2935_v47 = vmul.f32 %v1944_v4, %v6082_v3  ;;  %v1270_v45 = vpop.f32.mrf.mxu2 }
 0x252   : > { %v3001_v46 = vpack.c.bf16 %v2922_v26, %v5773_v60  ;;  %vm1831_vm5 = vweird.f32 %v6247_v28  ;;  %v1767_v16 = vmul.f32 %v4254_v44, %v6274_v39  ;;  %v1830_v35 = vadd.f32 %v6276_v17, %v1829_v30 }
 0x253   : > { %vm1832_vm6 = vweird.f32 %v6276_v17  ;;  %vm6341_vm7 = vcmp.eq.f32.partialorder %v1835_v56, 8.507059e+37  ;;  %v3732_v23 = vmul.f32 -1.442695, %v6330_v58  ;;  %v4256_v37 = vpop.eup %4255  ;;  %v1764_v60 = vsel %vm6278_vm14, %v6250_v62, %v1759_v51 }
 0x254   : > { %3017 = vst [vmem:[%s6350_s22] sm:$0xff] %v3001_v46  ;;  %v1838_v3 = vor.u32 1.1754944e-38, %v1837_v14  ;;  %v1768_v38 = vsub.f32 1.0, %v1767_v16  ;;  %v1775_v13 = vand.u32 2147483647, %v6274_v39  ;;  %v1777_v2 = vand.u32 2147483648, %v6274_v39  ;;  %vm6366_vm8 = vmor %vm1831_vm5, %vm1832_vm6 }
 0x255   : > { %v6355_v48 = vadd.f32 1.0, %v4256_v37  ;;  %v3735_v25 = vmul.f32 -1.442695, %v6333_v22  ;;  %v6359_v63 = vadd.f32 %v1371_v36, %v5704_v19  ;;  %v4258_v61 = vpop.eup %4257  ;;  %v3069_v62 = vmul.f32 %v6136_v18, %v2935_v47 }
 0x256   : > { %v1769_v9 = vmul.f32 %v4254_v44, %v1768_v38  ;;  %vm1772_vm9 = vweird.f32 %v4254_v44  ;;  %4261 = vpow2.f32 %v3732_v23  ;;  %v3153_v6 = vmul.f32 %v6167_v52, %v2935_v47 }
 0x257   : > { %v4260_v5 = vpop.eup %4259  ;;  %v1834_v56 = vsel %vm6366_vm8, %v6276_v17, %v1830_v35  ;;  %vm1771_vm10 = vweird.f32 %v6274_v39  ;;  %4263 = vrcp.f32 %v6355_v48  ;;  %v6376_v28 = vadd.f32 1.0, %v4258_v61 }
 0x258   : > { %v1770_v14 = vadd.f32 %v4254_v44, %v1769_v9  ;;  %v6378_v33 = vadd.f32 1.0, %v4260_v5  ;;  %v6381_v26 = vadd.f32 %v1270_v45, %v6025_v8  ;;  %vm1773_vm11 = vmor %vm1771_vm10, %vm1772_vm9  ;;  %vm1776_vm12 = vcmp.eq.f32.partialorder %v1775_v13, 8.507059e+37 }
 0x259   : > { %v1778_v4 = vor.u32 1.1754944e-38, %v1777_v2  ;;  %4265 = vpow2.f32 %v3735_v25  ;;  %v3748_v30 = vmul.f32 -1.442695, %v6359_v63  ;;  %v3087_v17 = vadd.f32 %v6181_v53, %v3069_v62 }
 0x25a   : > { %v1839_v39 = vsel %vm6341_vm7, %v1838_v3, %v1834_v56  ;;  %v1774_v51 = vsel %vm1773_vm11, %v4254_v44, %v1770_v14  ;;  %4267 = vrcp.f32 %v6376_v28  ;;  %v8368_v46 = vsub.f32 1.0, %v6222_v10  ;;  %v1317_v3 = vpop.f32.mrf.mxu3 }
 0x25b   : > { %v1779_v16 = vsel %vm1776_vm12, %v1778_v4, %v1774_v51  ;;  %v1820_v36 = vand.u32 2147483647, %v6355_v48  ;;  %4269 = vrcp.f32 %v6378_v33  ;;  %v2923_v23 = vmul.f32 %v1764_v60, %v6050_v41 }
 0x25c   : > { %v6391_v47 = vmul.f32 %v6194_v15, %v8368_v46  ;;  %v4262_v35 = vpop.eup %4261  ;;  %v6397_v37 = vadd.f32 %v6213_v34, %v3153_v6  ;;  %v2924_v44 = vmul.f32 %v1779_v16, %v6184_v0  ;;  %v3741_v12 = vmul.f32 -1.442695, %v6381_v26 }
 0x25d   : > { %v4264_v10 = vpop.eup %4263  ;;  %v6402_v38 = vmul.f32 %v1839_v39, %v6089_v54  ;;  %v1822_v13 = vand.u32 2147483648, %v6355_v48  ;;  %v6405_v2 = vadd.f32 1.0, %v4262_v35  ;;  %4271 = vpow2.f32 %v3748_v30 }
 0x25e   : > { %v6407_v25 = vmul.f32 0.00390625, %v3087_v17  ;;  %v3033_v41 = vpack.c.bf16 %v2924_v44, %v2923_v23  ;;  %v1812_v60 = vmul.f32 %v4264_v10, %v6355_v48  ;;  %vm1816_vm13 = vweird.f32 %v6355_v48 }
 0x25f   : > { %v4266_v0 = vpop.eup %4265  ;;  %vm6411_vm14 = vcmp.eq.f32.partialorder %v1820_v36, 8.507059e+37  ;;  %v2015_v54 = vand.u32 2147483647, %v6376_v28  ;;  %4273 = vrcp.f32 %v6405_v2  ;;  %v6418_v61 = vadd.f32 %v1317_v3, %v6151_v1 }
 0x260   : > { %v4268_v62 = vpop.eup %4267  ;;  %3049 = vst [vmem:[%s6421_s3] sm:$0xff] %v3033_v41  ;;  %v1813_v57 = vsub.f32 1.0, %v1812_v60  ;;  %v2017_v9 = vand.u32 2147483648, %v6376_v28  ;;  %v6425_v5 = vadd.f32 1.0, %v4266_v0  ;;  %4275 = vpow2.f32 %v3741_v12 }
 0x261   : > { %v6427_v6 = vpop.eup %4269  ;;  %v1823_v56 = vor.u32 1.1754944e-38, %v1822_v13  ;;  %v2007_v14 = vmul.f32 %v4268_v62, %v6376_v28  ;;  %vm2011_vm15 = vweird.f32 %v6376_v28  ;;  %v1912_v4 = vand.u32 2147483648, %v6378_v33 }
 0x262   : > { %v1814_v30 = vmul.f32 %v4264_v10, %v1813_v57  ;;  %vm1817_vm0 = vweird.f32 %v4264_v10  ;;  %v1902_v17 = vmul.f32 %v6427_v6, %v6378_v33  ;;  %v1910_v39 = vand.u32 2147483647, %v6378_v33 }
 0x263   : > { %v4272_v51 = vpop.eup %4271  ;;  %v2008_v46 = vsub.f32 1.0, %v2007_v14  ;;  %vm6435_vm1 = vcmp.eq.f32.partialorder %v2015_v54, 8.507059e+37  ;;  %v1850_v36 = vand.u32 2147483647, %v6405_v2  ;;  %4277 = vrcp.f32 %v6425_v5  ;;  %vm1818_vm2 = vmor %vm1816_vm13, %vm1817_vm0 }
 0x264   : > { %v1815_v35 = vadd.f32 %v4264_v10, %v1814_v30  ;;  %v2018_v23 = vor.u32 1.1754944e-38, %v2017_v9  ;;  %v6441_v44 = vadd.f32 1.0, %v4272_v51  ;;  %v3737_v12 = vmul.f32 -1.442695, %v6418_v61 }
 0x265   : > { %v4274_v3 = vpop.eup %4273  ;;  %v2009_v13 = vmul.f32 %v4268_v62, %v2008_v46  ;;  %vm2012_vm3 = vweird.f32 %v4268_v62  ;;  %v1903_v41 = vsub.f32 1.0, %v1902_v17  ;;  %v6446_v60 = vor.u32 1.1754944e-38, %v1912_v4 }
 0x266   : > { %v4276_v0 = vpop.eup %4275  ;;  %v1819_v54 = vsel %vm1818_vm2, %v4264_v10, %v1815_v35  ;;  %v1842_v57 = vmul.f32 %v4274_v3, %v6405_v2  ;;  %vm1846_vm4 = vweird.f32 %v6405_v2  ;;  %v1852_v9 = vand.u32 2147483648, %v6405_v2  ;;  %vm2013_vm6 = vmor %vm2011_vm15, %vm2012_vm3 }
 0x267   : > { %v1824_v14 = vsel %vm6411_vm14, %v1823_v56, %v1819_v54  ;;  %v2010_v30 = vadd.f32 %v4268_v62, %v2009_v13  ;;  %vm6453_vm5 = vcmp.eq.f32.partialorder %v1850_v36, 8.507059e+37  ;;  %4279 = vrcp.f32 %v6441_v44  ;;  %v1221_v36 = vpop.f32.mrf.mxu1 }
 0x268   : > { %v2927_v4 = vmul.f32 %v1824_v14, %v6231_v43  ;;  %v1843_v10 = vsub.f32 1.0, %v1842_v57  ;;  %v1895_v17 = vand.u32 2147483647, %v6425_v5  ;;  %4281 = vpow2.f32 %v3737_v12 }
 0x269   : > { %v4278_v51 = vpop.eup %4277  ;;  %v2014_v45 = vsel %vm2013_vm6, %v4268_v62, %v2010_v30  ;;  %v1904_v56 = vmul.f32 %v6427_v6, %v1903_v41  ;;  %vm1907_vm7 = vweird.f32 %v6427_v6  ;;  %v6464_v46 = vadd.f32 1.0, %v4276_v0 }
 0x26a   : > { %v3002_v35 = vpack.c.bf16 %v2927_v4, %v5830_v27  ;;  %v2019_v43 = vsel %vm6435_vm1, %v2018_v23, %v2014_v45  ;;  %vm1906_vm8 = vweird.f32 %v6378_v33  ;;  %v1844_v28 = vmul.f32 %v4274_v3, %v1843_v10 }
 0x26b   : > { %vm1847_vm9 = vweird.f32 %v4274_v3  ;;  %v2940_v12 = vmul.f32 %v2019_v43, %v6242_v32  ;;  %v1853_v13 = vor.u32 1.1754944e-38, %v1852_v9  ;;  %v1887_v62 = vmul.f32 %v4278_v51, %v6425_v5  ;;  %vm6515_vm1 = vmor %vm1906_vm8, %vm1907_vm7 }
 0x26c   : > { %vm1891_vm10 = vweird.f32 %v6425_v5  ;;  %3018 = vst [vmem:[%s6350_s22 + $0x8] sm:$0xff] %v3002_v35  ;;  %v1845_v41 = vadd.f32 %v4274_v3, %v1844_v28  ;;  %vm6474_vm11 = vcmp.eq.f32.partialorder %v1895_v17, 8.507059e+37  ;;  %v1897_v27 = vand.u32 2147483648, %v6425_v5  ;;  %vm1848_vm12 = vmor %vm1846_vm4, %vm1847_vm9  ;;  %v1373_v17 = vpop.f32.mrf.mxu0  ;;  %v1273_v5 = vpop.f32.mrf.mxu2 }
 0x26d   : > { %v6480_v16 = vadd.f32 %v1221_v36, %v6028_v29  ;;  %v4280_v23 = vpop.eup %4279  ;;  %v3070_v54 = vmul.f32 %v6136_v18, %v2940_v12  ;;  %v3154_v32 = vmul.f32 %v6167_v52, %v2940_v12  ;;  %v1888_v57 = vsub.f32 1.0, %v1887_v62 }
 0x26e   : > { %4283 = vrcp.f32 %v6464_v46  ;;  %v4282_v9 = vpop.eup %4281  ;;  %v1905_v14 = vadd.f32 %v6427_v6, %v1904_v56  ;;  %vm6488_vm13 = vcmp.eq.f32.partialorder %v1910_v39, 8.507059e+37  ;;  %v1849_v4 = vsel %vm1848_vm12, %v4274_v3, %v1845_v41 }
 0x26f   : > { %vm1892_vm14 = vweird.f32 %v4278_v51  ;;  %v2082_v10 = vmul.f32 %v4280_v23, %v6441_v44  ;;  %v3088_v45 = vadd.f32 %v6181_v53, %v3070_v54  ;;  %v3172_v2 = vadd.f32 %v6213_v34, %v3154_v32 }
 0x270   : > { %v1854_v36 = vsel %vm6453_vm5, %v1853_v13, %v1849_v4  ;;  %v1889_v35 = vmul.f32 %v4278_v51, %v1888_v57  ;;  %v2090_v43 = vand.u32 2147483647, %v6441_v44  ;;  %v2092_v3 = vand.u32 2147483648, %v6441_v44  ;;  %vm1893_vm15 = vmor %vm1891_vm10, %vm1892_vm14 }
 0x271   : > { %v2929_v56 = vmul.f32 %v1854_v36, %v6330_v58  ;;  %v2083_v39 = vsub.f32 1.0, %v2082_v10  ;;  %v3104_v28 = vmul.f32 0.00390625, %v3088_v45  ;;  %v3914_v12 = vpack.c.bf16 %v3172_v2, %v6397_v37  ;;  %v1319_v10 = vpop.f32.mrf.mxu3  ;;  %v1224_v45 = vpop.f32.mrf.mxu1 }
 0x272   : > { %v1890_v62 = vadd.f32 %v4278_v51, %v1889_v35  ;;  %v6501_v41 = vadd.f32 1.0, %v4282_v9  ;;  %v1898_v48 = vor.u32 1.1754944e-38, %v1897_v27  ;;  %vm2087_vm0 = vweird.f32 %v4280_v23 }
 0x273   : > { %v3034_v54 = vpack.c.bf16 %v2929_v56, %v6402_v38  ;;  %v2084_v58 = vmul.f32 %v4280_v23, %v2083_v39  ;;  %v3874_v32 = vpack.c.bf16 %v3104_v28, %v6407_v25  ;;  %3953 = vst [vmem:[%s6289_s30 + $0x8] sm:$0xff] %v3914_v12   ;;  %vm2086_vm2 = vweird.f32 %v6441_v44 }
 0x274   : > { %v6507_v13 = vpop.eup %4283  ;;  %v1894_v38 = vsel %vm1893_vm15, %v4278_v51, %v1890_v62  ;;  %4285 = vrcp.f32 %v6501_v41  ;;  %v1909_v27 = vsel %vm6515_vm1, %v6427_v6, %v1905_v14  ;;  %vm2088_vm3 = vmor %vm2086_vm2, %vm2087_vm0  ;;  %vm2091_vm4 = vcmp.eq.f32.partialorder %v2090_v43, 8.507059e+37  ;;  %v1376_v39 = vpop.f32.mrf.mxu0 }
 0x275   : > { %3050 = vst [vmem:[%s6421_s3 + $0x8] sm:$0xff] %v3034_v54  ;;  %v1899_v25 = vsel %vm6474_vm11, %v1898_v48, %v1894_v38  ;;  %v2085_v57 = vadd.f32 %v4280_v23, %v2084_v58  ;;  %v1977_v33 = vmul.f32 %v6507_v13, %v6464_v46  ;;  %v2093_v44 = vor.u32 1.1754944e-38, %v2092_v3 }
 0x276   : > { %3946 = vst [vmem:[%s6303_s1 + $0x8] sm:$0xff] %v3874_v32   ;;  %v2932_v51 = vmul.f32 %v1899_v25, %v6333_v22  ;;  %v3740_v9 = vmul.f32 -1.442695, %v6480_v16  ;;  %v6534_v14 = vadd.f32 %v1373_v17, %v5704_v19  ;;  %v6537_v0 = vadd.f32 %v1273_v5, %v6025_v8  ;;  %v1275_v5 = vpop.f32.mrf.mxu2 }
 0x277   : > { %v2089_v4 = vsel %vm2088_vm3, %v4280_v23, %v2085_v57  ;;  %v1978_v6 = vsub.f32 1.0, %v1977_v33  ;;  %v1914_v22 = vsel %vm6488_vm13, %v6446_v60, %v1909_v27  ;;  %v6546_v23 = vadd.f32 %v6194_v15, %v6391_v47 }
 0x278   : > { %v3003_v36 = vpack.c.bf16 %v2932_v51, %v5974_v40  ;;  %v2094_v35 = vsel %vm2091_vm4, %v2093_v44, %v2089_v4  ;;  %4287 = vpow2.f32 %v3740_v9  ;;  %v3753_v56 = vmul.f32 -1.442695, %v6534_v14 }
 0x279   : > { %v1979_v3 = vmul.f32 %v6507_v13, %v1978_v6  ;;  %v3746_v30 = vmul.f32 -1.442695, %v6537_v0  ;;  %v6554_v60 = vadd.f32 %v1319_v10, %v6151_v1  ;;  %v6557_v40 = vadd.f32 %v1224_v45, %v6028_v29  ;;  %v1322_v45 = vpop.f32.mrf.mxu3 }
 0x27a   : > { %v4286_v43 = vpop.eup %4285  ;;  %3019 = vst [vmem:[%s6350_s22 + $0x10] sm:$0xff] %v3003_v36  ;;  %v6560_v47 = vmul.f32 %v1914_v22, %v6254_v20  ;;  %v2945_v28 = vmul.f32 %v2094_v35, %v6359_v63  ;;  %vm1981_vm5 = vweird.f32 %v6464_v46  ;;  %4289 = vpow2.f32 %v3753_v56 }
 0x27b   : > { %v1917_v12 = vmul.f32 %v4286_v43, %v6501_v41  ;;  %v3742_v62 = vmul.f32 -1.442695, %v6554_v60  ;;  %v3745_v54 = vmul.f32 -1.442695, %v6557_v40  ;;  %v6568_v48 = vadd.f32 %v1376_v39, %v5704_v19 }
 0x27c   : > { %vm1982_vm6 = vweird.f32 %v6507_v13  ;;  %v1985_v58 = vand.u32 2147483647, %v6464_v46  ;;  %v1987_v20 = vand.u32 2147483648, %v6464_v46  ;;  %v1980_v63 = vadd.f32 %v6507_v13, %v1979_v3  ;;  %v1226_v3 = vpop.f32.mrf.mxu1 }
 0x27d   : > { %v1918_v32 = vsub.f32 1.0, %v1917_v12  ;;  %v1925_v37 = vand.u32 2147483647, %v6501_v41  ;;  %v1927_v38 = vand.u32 2147483648, %v6501_v41  ;;  %4291 = vpow2.f32 %v3746_v30  ;;  %vm6585_vm8 = vmor %vm1981_vm5, %vm1982_vm6 }
 0x27e   : > { %v4288_v27 = vpop.eup %4287  ;;  %v3071_v25 = vmul.f32 %v6136_v18, %v2945_v28  ;;  %vm1922_vm7 = vweird.f32 %v4286_v43  ;;  %4293 = vpow2.f32 %v3742_v62  ;;  %v3155_v33 = vmul.f32 %v6167_v52, %v2945_v28 }
 0x27f   : > { %v1919_v57 = vmul.f32 %v4286_v43, %v1918_v32  ;;  %v6578_v51 = vadd.f32 1.0, %v4288_v27  ;;  %4295 = vpow2.f32 %v3745_v54  ;;  %v3758_v44 = vmul.f32 -1.442695, %v6568_v48 }
 0x280   : > { %vm6589_vm9 = vcmp.eq.f32.partialorder %v1985_v58, 8.507059e+37  ;;  %vm1921_vm10 = vweird.f32 %v6501_v41  ;;  %v6595_v10 = vadd.f32 %v1275_v5, %v6025_v8  ;;  %v4290_v22 = vpop.eup %4289  ;;  %v1984_v46 = vsel %vm6585_vm8, %v6507_v13, %v1980_v63  ;;  %v1378_v5 = vpop.f32.mrf.mxu0 }
 0x281   : > { %v1920_v6 = vadd.f32 %v4286_v43, %v1919_v57  ;;  %v1988_v36 = vor.u32 1.1754944e-38, %v1987_v20  ;;  %vm1923_vm11 = vmor %vm1921_vm10, %vm1922_vm7  ;;  %v1928_v35 = vor.u32 1.1754944e-38, %v1927_v38  ;;  %4297 = vrcp.f32 %v6578_v51 }
 0x282   : > { %v3089_v56 = vadd.f32 %v6181_v53, %v3071_v25  ;;  %vm1926_vm12 = vcmp.eq.f32.partialorder %v1925_v37, 8.507059e+37  ;;  %v6603_v41 = vadd.f32 1.0, %v4290_v22  ;;  %v6606_v28 = vadd.f32 %v6213_v34, %v3155_v33 }
 0x283   : > { %v1924_v39 = vsel %vm1923_vm11, %v4286_v43, %v1920_v6  ;;  %v4292_v30 = vpop.eup %4291  ;;  %4299 = vpow2.f32 %v3758_v44  ;;  %v6609_v13 = vadd.f32 %v1322_v45, %v6151_v1  ;;  %v1989_v54 = vsel %vm6589_vm9, %v1988_v36, %v1984_v46 }
 0x284   : > { %v1929_v12 = vsel %vm1926_vm12, %v1928_v35, %v1924_v39  ;;  %v4294_v62 = vpop.eup %4293  ;;  %4301 = vrcp.f32 %v6603_v41  ;;  %v3751_v43 = vmul.f32 -1.442695, %v6595_v10  ;;  %v1970_v32 = vand.u32 2147483647, %v6578_v51 }
 0x285   : > { %v2934_v58 = vmul.f32 %v1929_v12, %v6418_v61  ;;  %v4296_v20 = vpop.eup %4295  ;;  %v6617_v63 = vadd.f32 1.0, %v4292_v30  ;;  %v6619_v37 = vadd.f32 1.0, %v4294_v62  ;;  %v6622_v38 = vadd.f32 %v1226_v3, %v6028_v29 }
 0x286   : > { %v6624_v27 = vmul.f32 0.00390625, %v3089_v56  ;;  %v1972_v25 = vand.u32 2147483648, %v6578_v51  ;;  %v6628_v57 = vadd.f32 1.0, %v4296_v20  ;;  %v6631_v44 = vmul.f32 %v1989_v54, %v6381_v26 }
 0x287   : > { %v3035_v61 = vpack.c.bf16 %v2934_v58, %v6560_v47  ;;  %v4298_v33 = vpop.eup %4297  ;;  %v2165_v9 = vand.u32 2147483647, %v6603_v41  ;;  %4303 = vrcp.f32 %v6617_v63  ;;  %v3747_v4 = vmul.f32 -1.442695, %v6609_v13 }
 0x288   : > { %v1962_v6 = vmul.f32 %v4298_v33, %v6578_v51  ;;  %vm1966_vm13 = vweird.f32 %v6578_v51  ;;  %4305 = vrcp.f32 %v6619_v37  ;;  %v6641_v47 = vadd.f32 %v1378_v5, %v5704_v19 }
 0x289   : > { %3051 = vst [vmem:[%s6421_s3 + $0x10] sm:$0xff] %v3035_v61  ;;  %v4300_v45 = vpop.eup %4299  ;;  %vm6643_vm14 = vcmp.eq.f32.partialorder %v1970_v32, 8.507059e+37  ;;  %v2167_v22 = vand.u32 2147483648, %v6603_v41  ;;  %4307 = vpow2.f32 %v3751_v43  ;;  %v3750_v46 = vmul.f32 -1.442695, %v6622_v38 }
 0x28a   : > { %v4302_v36 = vpop.eup %4301  ;;  %v1963_v35 = vsub.f32 1.0, %v1962_v6  ;;  %v1973_v56 = vor.u32 1.1754944e-38, %v1972_v25  ;;  %vm2161_vm15 = vweird.f32 %v6603_v41  ;;  %4309 = vrcp.f32 %v6628_v57 }
 0x28b   : > { %v2157_v39 = vmul.f32 %v4302_v36, %v6603_v41  ;;  %vm6652_vm0 = vcmp.eq.f32.partialorder %v2165_v9, 8.507059e+37  ;;  %v2062_v30 = vand.u32 2147483648, %v6617_v63  ;;  %4311 = vpow2.f32 %v3747_v4 }
 0x28c   : > { %v1964_v12 = vmul.f32 %v4298_v33, %v1963_v35  ;;  %vm1967_vm1 = vweird.f32 %v4298_v33  ;;  %v2000_v62 = vand.u32 2147483647, %v6619_v37  ;;  %v6658_v54 = vadd.f32 1.0, %v4300_v45 }
 0x28d   : > { %v6660_v58 = vpop.eup %4303  ;;  %v2158_v43 = vsub.f32 1.0, %v2157_v39  ;;  %v2168_v20 = vor.u32 1.1754944e-38, %v2167_v22  ;;  %v2060_v32 = vand.u32 2147483647, %v6617_v63  ;;  %4313 = vpow2.f32 %v3750_v46  ;;  %vm1968_vm3 = vmor %vm1966_vm13, %vm1967_vm1 }
 0x28e   : > { %v4306_v5 = vpop.eup %4305  ;;  %v1965_v61 = vadd.f32 %v4298_v33, %v1964_v12  ;;  %v2052_v25 = vmul.f32 %v6660_v58, %v6617_v63  ;;  %vm1996_vm2 = vweird.f32 %v6619_v37  ;;  %v2002_v9 = vand.u32 2147483648, %v6619_v37 }
 0x28f   : > { %v4308_v4 = vpop.eup %4307  ;;  %v2159_v6 = vmul.f32 %v4302_v36, %v2158_v43  ;;  %vm2162_vm4 = vweird.f32 %v4302_v36  ;;  %vm2056_vm5 = vweird.f32 %v6617_v63  ;;  %v6670_v45 = vor.u32 1.1754944e-38, %v2062_v30 }
 0x290   : > { %v1992_v22 = vmul.f32 %v4306_v5, %v6619_v37  ;;  %v4310_v46 = vpop.eup %4309  ;;  %v1969_v35 = vsel %vm1968_vm3, %v4298_v33, %v1965_v61  ;;  %v2053_v39 = vsub.f32 1.0, %v2052_v25  ;;  %vm6673_vm6 = vcmp.eq.f32.partialorder %v2000_v62, 8.507059e+37  ;;  %vm2163_vm8 = vmor %vm2161_vm15, %vm2162_vm4 }
 0x291   : > { %vm2041_vm7 = vweird.f32 %v6628_v57  ;;  %4315 = vrcp.f32 %v6658_v54  ;;  %v4312_v51 = vpop.eup %4311  ;;  %v1974_v43 = vsel %vm6643_vm14, %v1973_v56, %v1969_v35  ;;  %v2160_v2 = vadd.f32 %v4302_v36, %v2159_v6 }
 0x292   : > { %v1993_v30 = vsub.f32 1.0, %v1992_v22  ;;  %v2037_v17 = vmul.f32 %v4310_v46, %v6628_v57  ;;  %v2937_v21 = vmul.f32 %v1974_v43, %v6480_v16  ;;  %v2054_v33 = vmul.f32 %v6660_v58, %v2053_v39 }
 0x293   : > { %v2003_v62 = vor.u32 1.1754944e-38, %v2002_v9  ;;  %v6687_v61 = vadd.f32 1.0, %v4308_v4  ;;  %v4314_v25 = vpop.eup %4313  ;;  %vm2252_vm9 = vweird.f32 %v6194_v15  ;;  %v2164_v26 = vsel %vm2163_vm8, %v4302_v36, %v2160_v2 }
 0x294   : > { %v1994_v56 = vmul.f32 %v4306_v5, %v1993_v30  ;;  %vm1997_vm10 = vweird.f32 %v4306_v5  ;;  %v2038_v6 = vsub.f32 1.0, %v2037_v17  ;;  %v3004_v22 = vpack.c.bf16 %v2937_v21, %v6141_v31 }
 0x295   : > { %v2169_v16 = vsel %vm6652_vm0, %v2168_v20, %v2164_v26  ;;  %v2045_v41 = vand.u32 2147483647, %v6628_v57  ;;  %v2047_v35 = vand.u32 2147483648, %v6628_v57  ;;  %vm2251_vm11 = vweird.f32 %v6084_v55  ;;  %vm1998_vm14 = vmor %vm1996_vm2, %vm1997_vm10 }
 0x296   : > { %v2950_v9 = vmul.f32 %v2169_v16, %v6534_v14  ;;  %vm2057_vm12 = vweird.f32 %v6660_v58  ;;  %vm6698_vm13 = vcmp.eq.f32.partialorder %v2060_v32, 8.507059e+37  ;;  %v1995_v17 = vadd.f32 %v4306_v5, %v1994_v56  ;;  %3020 = vst [vmem:[%s6350_s22 + $0x18] sm:$0xff] %v3004_v22  ;;  %vm6756_vm4 = vmor %vm2251_vm11, %vm2252_vm9 }
 0x297   : > { %v2039_v36 = vmul.f32 %v4310_v46, %v2038_v6  ;;  %v6702_v31 = vpop.eup %4315  ;;  %v2055_v21 = vadd.f32 %v6660_v58, %v2054_v33  ;;  %vm2042_vm15 = vweird.f32 %v4310_v46  ;;  %4317 = vrcp.f32 %v6687_v61  ;;  %vm6720_vm0 = vmor %vm2056_vm5, %vm2057_vm12 }
 0x298   : > { %v6710_v14 = vadd.f32 1.0, %v4312_v51  ;;  %v3072_v3 = vmul.f32 %v6136_v18, %v2950_v9  ;;  %v3156_v20 = vmul.f32 %v6167_v52, %v2950_v9  ;;  %v1999_v32 = vsel %vm1998_vm14, %v4306_v5, %v1995_v17  ;;  %vm2043_vm2 = vmor %vm2041_vm7, %vm2042_vm15 }
 0x299   : > { %v6714_v4 = vadd.f32 1.0, %v4314_v25  ;;  %v2004_v37 = vsel %vm6673_vm6, %v2003_v62, %v1999_v32  ;;  %v2040_v51 = vadd.f32 %v4310_v46, %v2039_v36  ;;  %vm2046_vm1 = vcmp.eq.f32.partialorder %v2045_v41, 8.507059e+37 }
 0x29a   : > { %v2232_v18 = vmul.f32 %v6702_v31, %v6658_v54  ;;  %v3090_v52 = vadd.f32 %v6181_v53, %v3072_v3  ;;  %v3174_v5 = vadd.f32 %v6213_v34, %v3156_v20  ;;  %v2939_v43 = vmul.f32 %v2004_v37, %v6554_v60 }
 0x29b   : > { %v2048_v63 = vor.u32 1.1754944e-38, %v2047_v35  ;;  %v2059_v12 = vsel %vm6720_vm0, %v6660_v58, %v2055_v21  ;;  %v2044_v30 = vsel %vm2043_vm2, %v4310_v46, %v2040_v51  ;;  %v2240_v62 = vand.u32 2147483647, %v6658_v54  ;;  %v1278_v58 = vpop.f32.mrf.mxu2  ;;  %v1229_v21 = vpop.f32.mrf.mxu1 }
 0x29c   : > { %v2233_v33 = vsub.f32 1.0, %v2232_v18  ;;  %v3106_v25 = vmul.f32 0.00390625, %v3090_v52  ;;  %v3919_v53 = vpack.c.bf16 %v3174_v5, %v6606_v28  ;;  %v3036_v34 = vpack.c.bf16 %v2939_v43, %v6631_v44 }
 0x29d   : > { %v2049_v60 = vsel %vm2046_vm1, %v2048_v63, %v2044_v30  ;;  %v6740_v26 = vpop.eup %4317  ;;  %v2242_v6 = vand.u32 2147483648, %v6658_v54  ;;  %4319 = vrcp.f32 %v6710_v14  ;;  %vm2237_vm3 = vweird.f32 %v6702_v31 }
 0x29e   : > { %v2942_v57 = vmul.f32 %v2049_v60, %v6557_v40  ;;  %v2234_v56 = vmul.f32 %v6702_v31, %v2233_v33  ;;  %v3879_v46 = vpack.c.bf16 %v3106_v25, %v6624_v27  ;;  %3954 = vst [vmem:[%s6289_s30 + $0x10] sm:$0xff] %v3919_v53   ;;  %v2127_v28 = vmul.f32 %v6740_v26, %v6687_v61  ;;  %v1324_v40 = vpop.f32.mrf.mxu3 }
 0x29f   : > { %v2137_v44 = vand.u32 2147483648, %v6687_v61  ;;  %4321 = vpow2.f32 %v6191_v11  ;;  %v2064_v27 = vsel %vm6698_vm13, %v6670_v45, %v2059_v12  ;;  %3052 = vst [vmem:[%s6421_s3 + $0x18] sm:$0xff] %v3036_v34  ;;  %v2254_v35 = vsel %vm6756_vm4, %v6194_v15, %v6546_v23 }
 0x2a0   : > { %v3005_v16 = vpack.c.bf16 %v2942_v57, %v5994_v42  ;;  %v2235_v41 = vadd.f32 %v6702_v31, %v2234_v56  ;;  %v8397_v9 = vand.u32 2147483648, %v6084_v55  ;;  %3947 = vst [vmem:[%s6303_s1 + $0x10] sm:$0xff] %v3879_v46   ;;  %vm2236_vm5 = vweird.f32 %v6658_v54 }
 0x2a1   : > { %4323 = vrcp.f32 %v6714_v4  ;;  %vm6781_vm6 = vmor %vm2236_vm5, %vm2237_vm3  ;;  %vm6785_vm7 = vcmp.eq.f32.partialorder %v2240_v62, 8.507059e+37  ;;  %v2243_v45 = vor.u32 1.1754944e-38, %v2242_v6  ;;  %v2128_v2 = vsub.f32 1.0, %v2127_v28 }
 0x2a2   : > { %v6773_v17 = vor.u32 1.1754944e-38, %v8397_v9  ;;  %3021 = vst [vmem:[%s6350_s22 + $0x20] sm:$0xff] %v3005_v16  ;;  %v2135_v36 = vand.u32 2147483647, %v6687_v61  ;;  %v6791_v54 = vmul.f32 %v2064_v27, %v6537_v0  ;;  %v2239_v3 = vsel %vm6781_vm6, %v6702_v31, %v2235_v41  ;;  %v1381_v0 = vpop.f32.mrf.mxu0 }
 0x2a3   : > { %v6796_v20 = vor.u32 1.1754944e-38, %v2137_v44  ;;  %v3763_v32 = vmul.f32 -1.442695, %v6641_v47  ;;  %v4320_v39 = vpop.eup %4319  ;;  %vm2132_vm8 = vweird.f32 %v6740_v26  ;;  %v2077_v37 = vand.u32 2147483648, %v6710_v14  ;;  %v1280_v6 = vpop.f32.mrf.mxu2 }
 0x2a4   : > { %v6802_v51 = vadd.f32 %v1278_v58, %v6025_v8  ;;  %v6805_v18 = vadd.f32 %v1324_v40, %v6151_v1  ;;  %vm2131_vm9 = vweird.f32 %v6687_v61  ;;  %v2067_v31 = vmul.f32 %v4320_v39, %v6710_v14 }
 0x2a5   : > { %vm2071_vm10 = vweird.f32 %v6710_v14  ;;  %v2075_v52 = vand.u32 2147483647, %v6710_v14  ;;  %4325 = vpow2.f32 %v3763_v32  ;;  %v6811_v5 = vpop.eup %4321  ;;  %v2244_v43 = vsel %vm6785_vm7, %v2243_v45, %v2239_v3  ;;  %v1231_v3 = vpop.f32.mrf.mxu1  ;;  %vm6863_vm2 = vmor %vm2131_vm9, %vm2132_vm8 }
 0x2a6   : > { %v2129_v63 = vmul.f32 %v6740_v26, %v2128_v2  ;;  %v3756_v12 = vmul.f32 -1.442695, %v6802_v51  ;;  %v3752_v30 = vmul.f32 -1.442695, %v6805_v18  ;;  %v2068_v62 = vsub.f32 1.0, %v2067_v31  ;;  %v1327_v28 = vpop.f32.mrf.mxu3 }
 0x2a7   : > { %v4324_v33 = vpop.eup %4323  ;;  %vm2116_vm11 = vweird.f32 %v6714_v4  ;;  %v6820_v25 = vadd.f32 %v1229_v21, %v6028_v29  ;;  %v6823_v53 = vadd.f32 %v1381_v0, %v5704_v19  ;;  %v2078_v34 = vor.u32 1.1754944e-38, %v2077_v37  ;;  %v6856_v37 = vld [vmem:[%s8225_s5] ss:$0 sm:$0xff] }
 0x2a8   : > { %v2112_v60 = vmul.f32 %v4324_v33, %v6714_v4  ;;  %v2120_v57 = vand.u32 2147483647, %v6714_v4  ;;  %v2122_v56 = vand.u32 2147483648, %v6714_v4  ;;  %v2955_v58 = vmul.f32 %v2244_v43, %v6568_v48  ;;  %v6884_v4 = vld [vmem:[%s8225_s5 + $0x1] ss:$0 sm:$0xff] }
 0x2a9   : > { %v2069_v46 = vmul.f32 %v4320_v39, %v2068_v62  ;;  %vm2072_vm12 = vweird.f32 %v4320_v39  ;;  %4327 = vpow2.f32 %v3756_v12  ;;  %v2130_v44 = vadd.f32 %v6740_v26, %v2129_v63 }
 0x2aa   : > { %vm6830_vm13 = vcmp.eq.f32.partialorder %v2135_v36, 8.507059e+37  ;;  %v2113_v27 = vsub.f32 1.0, %v2112_v60  ;;  %4329 = vpow2.f32 %v3752_v30  ;;  %v3755_v16 = vmul.f32 -1.442695, %v6820_v25  ;;  %vm2073_vm0 = vmor %vm2071_vm10, %vm2072_vm12 }
 0x2ab   : > { %v4326_v41 = vpop.eup %4325  ;;  %v2070_v9 = vadd.f32 %v4320_v39, %v2069_v46  ;;  %vm2117_vm14 = vweird.f32 %v4324_v33  ;;  %v3768_v42 = vmul.f32 -1.442695, %v6823_v53  ;;  %v6837_v48 = vadd.f32 %v1280_v6, %v6025_v8 }
 0x2ac   : > { %v8404_v11 = vand.u32 2147483647, %v6084_v55  ;;  %v2114_v2 = vmul.f32 %v4324_v33, %v2113_v27  ;;  %v6847_v36 = vadd.f32 1.0, %v4326_v41  ;;  %4331 = vpow2.f32 %v3755_v16  ;;  %vm2118_vm3 = vmor %vm2116_vm11, %vm2117_vm14 }
 0x2ad   : > { %v6850_v21 = vadd.f32 %v1327_v28, %v6151_v1  ;;  %v2074_v32 = vsel %vm2073_vm0, %v4320_v39, %v2070_v9  ;;  %vm2076_vm1 = vcmp.eq.f32.partialorder %v2075_v52, 8.507059e+37  ;;  %4333 = vpow2.f32 %v3768_v42 }
 0x2ae   : > { %vm6841_vm15 = vcmp.eq.f32.partialorder %v8404_v11, 8.507059e+37  ;;  %v3761_v55 = vmul.f32 -1.442695, %v6837_v48  ;;  %v3073_v14 = vmul.f32 %v6856_v37, %v2955_v58  ;;  %v2079_v39 = vsel %vm2076_vm1, %v2078_v34, %v2074_v32 }
 0x2af   : > { %v2115_v31 = vadd.f32 %v4324_v33, %v2114_v2  ;;  %4335 = vrcp.f32 %v6847_v36  ;;  %v4328_v52 = vpop.eup %4327  ;;  %v2944_v43 = vmul.f32 %v2079_v39, %v6609_v13  ;;  %vm2121_vm5 = vcmp.eq.f32.partialorder %v2120_v57, 8.507059e+37 }
 0x2b0   : > { %v2123_v63 = vor.u32 1.1754944e-38, %v2122_v56  ;;  %v6873_v12 = vadd.f32 %v1231_v3, %v6028_v29  ;;  %v4330_v61 = vpop.eup %4329  ;;  %v2134_v30 = vsel %vm6863_vm2, %v6740_v26, %v2130_v44  ;;  %v6878_v34 = vadd.f32 1.0, %v4328_v52  ;;  %v6891_v26 = vld [vmem:[%s8226_s6] ss:$0 sm:$0xff] }
 0x2b1   : > { %v2119_v62 = vsel %vm2118_vm3, %v4324_v33, %v2115_v31  ;;  %v3757_v13 = vmul.f32 -1.442695, %v6850_v21  ;;  %v3157_v60 = vmul.f32 %v6884_v4, %v2955_v58  ;;  %v3037_v57 = vpack.c.bf16 %v2944_v43, %v6791_v54 }
 0x2b2   : > { %v2124_v56 = vsel %vm2121_vm5, %v2123_v63, %v2119_v62  ;;  %4337 = vpow2.f32 %v3761_v55  ;;  %v4332_v6 = vpop.eup %4331  ;;  %v3091_v33 = vadd.f32 %v6891_v26, %v3073_v14  ;;  %v2315_v28 = vand.u32 2147483647, %v6847_v36 }
 0x2b3   : > { %v2947_v46 = vmul.f32 %v2124_v56, %v6622_v38  ;;  %4339 = vrcp.f32 %v6878_v34  ;;  %v4334_v44 = vpop.eup %4333  ;;  %v2139_v54 = vsel %vm6830_vm13, %v6796_v20, %v2134_v30  ;;  %3053 = vst [vmem:[%s6421_s3 + $0x20] sm:$0xff] %v3037_v57  ;;  %v6901_v58 = vadd.f32 1.0, %v4330_v61 }
 0x2b4   : > { %v6903_v27 = vadd.f32 1.0, %v4332_v6  ;;  %v3760_v16 = vmul.f32 -1.442695, %v6873_v12  ;;  %v2317_v9 = vand.u32 2147483648, %v6847_v36  ;;  %v6908_v42 = vadd.f32 1.0, %v4334_v44 }
 0x2b5   : > { %v4336_v41 = vpop.eup %4335  ;;  %v3006_v38 = vpack.c.bf16 %v2947_v46, %v6187_v59  ;;  %4341 = vpow2.f32 %v3757_v13  ;;  %v6912_v40 = vadd.f32 %v6120_v49, %v6218_v7  ;;  %v6922_v20 = vsel %vm6841_vm15, %v6773_v17, %v2254_v35  ;;  %v6931_v7 = vld [vmem:[%s8226_s6 + $0x1] ss:$0 sm:$0xff] }
 0x2b6   : > { %v2307_v59 = vmul.f32 %v4336_v41, %v6847_v36  ;;  %4343 = vrcp.f32 %v6901_v58  ;;  %v6926_v11 = vmul.f32 0.00390625, %v3091_v33  ;;  %v6934_v22 = vadd.f32 %v6931_v7, %v3157_v60 }
 0x2b7   : > { %v6937_v15 = vmul.f32 %v2139_v54, %v6595_v10  ;;  %3022 = vst [vmem:[%s6350_s22 + $0x28] sm:$0xff] %v3006_v38  ;;  %4345 = vrcp.f32 %v6903_v27  ;;  %vm2311_vm4 = vweird.f32 %v6847_v36  ;;  %vm6942_vm6 = vcmp.eq.f32.partialorder %v2315_v28, 8.507059e+37 }
 0x2b8   : > { %v4338_v23 = vpop.eup %4337  ;;  %v2308_v35 = vsub.f32 1.0, %v2307_v59  ;;  %4347 = vpow2.f32 %v3760_v16  ;;  %v2318_v2 = vor.u32 1.1754944e-38, %v2317_v9  ;;  %v2150_v3 = vand.u32 2147483647, %v6901_v58 }
 0x2b9   : > { %v6946_v45 = vpop.eup %4339  ;;  %v2152_v10 = vand.u32 2147483648, %v6901_v58  ;;  %4349 = vrcp.f32 %v6908_v42  ;;  %vm2312_vm7 = vweird.f32 %v4336_v41  ;;  %vm2206_vm8 = vweird.f32 %v6878_v34 }
 0x2ba   : > { %v2309_v32 = vmul.f32 %v4336_v41, %v2308_v35  ;;  %v2202_v55 = vmul.f32 %v6946_v45, %v6878_v34  ;;  %v2195_v14 = vand.u32 2147483647, %v6903_v27  ;;  %v2210_v39 = vand.u32 2147483647, %v6878_v34  ;;  %vm2313_vm11 = vmor %vm2311_vm4, %vm2312_vm7 }
 0x2bb   : > { %v4342_v0 = vpop.eup %4341  ;;  %v2212_v31 = vand.u32 2147483648, %v6878_v34  ;;  %v2197_v52 = vand.u32 2147483648, %v6903_v27  ;;  %v6958_v43 = vadd.f32 1.0, %v4338_v23  ;;  %vm2146_vm9 = vweird.f32 %v6901_v58 }
 0x2bc   : > { %v4344_v63 = vpop.eup %4343  ;;  %v2310_v61 = vadd.f32 %v4336_v41, %v2309_v32  ;;  %v2203_v30 = vsub.f32 1.0, %v2202_v55  ;;  %vm2191_vm10 = vweird.f32 %v6903_v27  ;;  %vm2207_vm12 = vweird.f32 %v6946_v45 }
 0x2bd   : > { %v4346_v62 = vpop.eup %4345  ;;  %v2142_v13 = vmul.f32 %v4344_v63, %v6901_v58  ;;  %vm6967_vm13 = vcmp.eq.f32.partialorder %v2150_v3, 8.507059e+37  ;;  %v2153_v57 = vor.u32 1.1754944e-38, %v2152_v10  ;;  %vm6973_vm14 = vcmp.eq.f32.partialorder %v2195_v14, 8.507059e+37  ;;  %vm6998_vm5 = vmor %vm2206_vm8, %vm2207_vm12 }
 0x2be   : > { %v4348_v56 = vpop.eup %4347  ;;  %v2314_v6 = vsel %vm2313_vm11, %v4336_v41, %v2310_v61  ;;  %v2204_v33 = vmul.f32 %v6946_v45, %v2203_v30  ;;  %v2187_v46 = vmul.f32 %v4346_v62, %v6903_v27  ;;  %vm2552_vm15 = vweird.f32 %v6120_v49 }
 0x2bf   : > { %v6977_v36 = vpop.eup %4349  ;;  %v2319_v44 = vsel %vm6942_vm6, %v2318_v2, %v2314_v6  ;;  %v2143_v54 = vsub.f32 1.0, %v2142_v13  ;;  %v2198_v16 = vor.u32 1.1754944e-38, %v2197_v52  ;;  %vm2386_vm0 = vweird.f32 %v6908_v42  ;;  %v1383_v13 = vpop.f32.mrf.mxu0 }
 0x2c0   : > { %4351 = vrcp.f32 %v6958_v43  ;;  %v2960_v41 = vmul.f32 %v2319_v44, %v6641_v47  ;;  %v2188_v38 = vsub.f32 1.0, %v2187_v46  ;;  %v2382_v9 = vmul.f32 %v6977_v36, %v6908_v42  ;;  %v8423_v47 = vld [vmem:[#allocation30_spill] sm:$0xff] }
 0x2c1   : > { %v2390_v59 = vand.u32 2147483647, %v6908_v42  ;;  %vm2551_vm1 = vweird.f32 %v6020_v24  ;;  %v2205_v23 = vadd.f32 %v6946_v45, %v2204_v33  ;;  %v2144_v35 = vmul.f32 %v4344_v63, %v2143_v54 }
 0x2c2   : > { %vm2147_vm2 = vweird.f32 %v4344_v63  ;;  %v6990_v17 = vadd.f32 1.0, %v4342_v0  ;;  %v3074_v2 = vmul.f32 %v6856_v37, %v2960_v41  ;;  %v3158_v3 = vmul.f32 %v6884_v4, %v2960_v41 }
 0x2c3   : > { %v2189_v10 = vmul.f32 %v4346_v62, %v2188_v38  ;;  %vm2192_vm3 = vweird.f32 %v4346_v62  ;;  %v2145_v32 = vadd.f32 %v4344_v63, %v2144_v35  ;;  %v2383_v55 = vsub.f32 1.0, %v2382_v9  ;;  %vm2148_vm4 = vmor %vm2146_vm9, %vm2147_vm2  ;;  %v1283_v38 = vpop.f32.mrf.mxu2 }
 0x2c4   : > { %v2392_v14 = vand.u32 2147483648, %v6908_v42  ;;  %v7003_v0 = vadd.f32 1.0, %v4348_v56  ;;  %v3092_v52 = vadd.f32 %v6891_v26, %v3074_v2  ;;  %v3176_v61 = vadd.f32 %v6931_v7, %v3158_v3  ;;  %vm2193_vm7 = vmor %vm2191_vm10, %vm2192_vm3  ;;  %v8421_v2 = vld [vmem:[#allocation36_spill] sm:$0xff]  ;;  %v8422_v3 = vld [vmem:[#allocation39_spill] sm:$0xff] }
 0x2c5   : > { %v2190_v30 = vadd.f32 %v4346_v62, %v2189_v10  ;;  %vm2387_vm6 = vweird.f32 %v6977_v36  ;;  %v2209_v33 = vsel %vm6998_vm5, %v6946_v45, %v2205_v23  ;;  %v2149_v56 = vsel %vm2148_vm4, %v4344_v63, %v2145_v32  ;;  %vm7056_vm10 = vmor %vm2551_vm1, %vm2552_vm15 }
 0x2c6   : > { %v7010_v6 = vpop.eup %4351  ;;  %v2384_v46 = vmul.f32 %v6977_v36, %v2383_v55  ;;  %4353 = vrcp.f32 %v6990_v17  ;;  %v3108_v58 = vmul.f32 0.00390625, %v3092_v52  ;;  %v3924_v44 = vpack.c.bf16 %v3176_v61, %v6934_v22  ;;  %vm7040_vm9 = vmor %vm2386_vm0, %vm2387_vm6 }
 0x2c7   : > { %v2154_v54 = vsel %vm6967_vm13, %v2153_v57, %v2149_v56  ;;  %v2194_v41 = vsel %vm2193_vm7, %v4346_v62, %v2190_v30  ;;  %v2277_v63 = vmul.f32 %v7010_v6, %v6958_v43  ;;  %vm2211_vm8 = vcmp.eq.f32.partialorder %v2210_v39, 8.507059e+37  ;;  %v1234_v30 = vpop.f32.mrf.mxu1  ;;  %v1386_v56 = vpop.f32.mrf.mxu0 }
 0x2c8   : > { %v2949_v9 = vmul.f32 %v2154_v54, %v6805_v18  ;;  %v2199_v45 = vsel %vm6973_vm14, %v2198_v16, %v2194_v41  ;;  %v2385_v27 = vadd.f32 %v6977_v36, %v2384_v46  ;;  %v3884_v23 = vpack.c.bf16 %v3108_v58, %v6926_v11  ;;  %3955 = vst [vmem:[%s6289_s30 + $0x18] sm:$0xff] %v3924_v44  }
 0x2c9   : > { %v2213_v22 = vor.u32 1.1754944e-38, %v2212_v31  ;;  %v2952_v18 = vmul.f32 %v2199_v45, %v6820_v25  ;;  %v2287_v34 = vand.u32 2147483648, %v6958_v43  ;;  %v7050_v31 = vadd.f32 %v1383_v13, %v5704_v19  ;;  %v1329_v25 = vpop.f32.mrf.mxu3 }
 0x2ca   : > { %v3038_v11 = vpack.c.bf16 %v2949_v9, %v6937_v15  ;;  %v2389_v39 = vsel %vm7040_vm9, %v6977_v36, %v2385_v27  ;;  %3948 = vst [vmem:[%s6303_s1 + $0x18] sm:$0xff] %v3884_v23   ;;  %v2393_v57 = vor.u32 1.1754944e-38, %v2392_v14  ;;  %4355 = vrcp.f32 %v7003_v0 }
 0x2cb   : > { %v2214_v15 = vsel %vm2211_vm8, %v2213_v22, %v2209_v33  ;;  %v3007_v60 = vpack.c.bf16 %v2952_v18, %v6236_v50  ;;  %v2554_v36 = vsel %vm7056_vm10, %v6120_v49, %v6912_v40  ;;  %vm2391_vm11 = vcmp.eq.f32.partialorder %v2390_v59, 8.507059e+37  ;;  %v1285_v9 = vpop.f32.mrf.mxu2 }
 0x2cc   : > { %v4354_v28 = vpop.eup %4353  ;;  %3054 = vst [vmem:[%s6421_s3 + $0x28] sm:$0xff] %v3038_v11  ;;  %v2278_v16 = vsub.f32 1.0, %v2277_v63  ;;  %v2225_v35 = vand.u32 2147483647, %v6990_v17  ;;  %v7071_v10 = vmul.f32 %v8422_v3, %v8421_v2  ;;  %v7075_v50 = vmul.f32 %v6922_v20, %v8423_v47 }
 0x2cd   : > { %3023 = vst [vmem:[%s6350_s22 + $0x30] sm:$0xff] %v3007_v60  ;;  %v2394_v32 = vsel %vm2391_vm11, %v2393_v57, %v2389_v39  ;;  %v2217_v55 = vmul.f32 %v4354_v28, %v6990_v17  ;;  %v7080_v14 = vmul.f32 %v2214_v15, %v6802_v51  ;;  %v2285_v59 = vand.u32 2147483647, %v6958_v43 }
 0x2ce   : > { %v7083_v52 = vor.u32 1.1754944e-38, %v2287_v34  ;;  %v2227_v61 = vand.u32 2147483648, %v6990_v17  ;;  %vm2281_vm12 = vweird.f32 %v6958_v43  ;;  %vm2282_vm13 = vweird.f32 %v7010_v6 }
 0x2cf   : > { %v2218_v20 = vsub.f32 1.0, %v2217_v55  ;;  %v3773_v13 = vmul.f32 -1.442695, %v7050_v31  ;;  %v7090_v33 = vadd.f32 %v1283_v38, %v6025_v8  ;;  %v2965_v51 = vmul.f32 %v2394_v32, %v6823_v53  ;;  %vm7138_vm4 = vmor %vm2281_vm12, %vm2282_vm13 }
 0x2d0   : > { %v2279_v46 = vmul.f32 %v7010_v6, %v2278_v16  ;;  %vm2221_vm14 = vweird.f32 %v6990_v17  ;;  %vm7095_vm15 = vcmp.eq.f32.partialorder %v2225_v35, 8.507059e+37  ;;  %v4356_v44 = vpop.eup %4355  ;;  %vm2222_vm0 = vweird.f32 %v4354_v28 }
 0x2d1   : > { %v2219_v54 = vmul.f32 %v4354_v28, %v2218_v20  ;;  %4357 = vpow2.f32 %v3773_v13  ;;  %v3766_v41 = vmul.f32 -1.442695, %v7090_v33  ;;  %v2228_v38 = vor.u32 1.1754944e-38, %v2227_v61  ;;  %vm2223_vm3 = vmor %vm2221_vm14, %vm2222_vm0 }
 0x2d2   : > { %v2262_v45 = vmul.f32 %v4356_v44, %v7003_v0  ;;  %vm2266_vm1 = vweird.f32 %v7003_v0  ;;  %v2270_v53 = vand.u32 2147483647, %v7003_v0  ;;  %v7104_v63 = vadd.f32 %v1329_v25, %v6151_v1  ;;  %v1332_v25 = vpop.f32.mrf.mxu3 }
 0x2d3   : > { %v2220_v27 = vadd.f32 %v4354_v28, %v2219_v54  ;;  %4359 = vpow2.f32 %v3766_v41  ;;  %v7107_v23 = vadd.f32 %v1234_v30, %v6028_v29  ;;  %v8426_v22 = vand.u32 2147483647, %v6020_v24  ;;  %v1388_v54 = vpop.f32.mrf.mxu0  ;;  %v1288_v40 = vpop.f32.mrf.mxu2 }
 0x2d4   : > { %v2280_v62 = vadd.f32 %v7010_v6, %v2279_v46  ;;  %v2263_v11 = vsub.f32 1.0, %v2262_v45  ;;  %v7119_v39 = vadd.f32 %v1386_v56, %v5704_v19  ;;  %v7122_v34 = vadd.f32 %v1285_v9, %v6025_v8  ;;  %v1236_v56 = vpop.f32.mrf.mxu1 }
 0x2d5   : > { %vm7111_vm2 = vcmp.eq.f32.partialorder %v8426_v22, 8.507059e+37  ;;  %v2224_v15 = vsel %vm2223_vm3, %v4354_v28, %v2220_v27  ;;  %v2272_v24 = vand.u32 2147483648, %v7003_v0  ;;  %v3762_v60 = vmul.f32 -1.442695, %v7104_v63 }
 0x2d6   : > { %v3765_v57 = vmul.f32 -1.442695, %v7107_v23  ;;  %v2229_v16 = vsel %vm7095_vm15, %v2228_v38, %v2224_v15  ;;  %v2264_v17 = vmul.f32 %v4356_v44, %v2263_v11  ;;  %vm2267_vm5 = vweird.f32 %v4356_v44 }
 0x2d7   : > { %v3778_v35 = vmul.f32 -1.442695, %v7119_v39  ;;  %v4358_v47 = vpop.eup %4357  ;;  %v3075_v32 = vmul.f32 %v6856_v37, %v2965_v51  ;;  %v2954_v55 = vmul.f32 %v2229_v16, %v6850_v21  ;;  %4361 = vpow2.f32 %v3762_v60  ;;  %vm2268_vm6 = vmor %vm2266_vm1, %vm2267_vm5 }
 0x2d8   : > { %v3771_v28 = vmul.f32 -1.442695, %v7122_v34  ;;  %v3159_v61 = vmul.f32 %v6884_v4, %v2965_v51  ;;  %v2265_v20 = vadd.f32 %v4356_v44, %v2264_v17  ;;  %v7142_v13 = vadd.f32 1.0, %v4358_v47 }
 0x2d9   : > { %4363 = vpow2.f32 %v3765_v57  ;;  %v4360_v21 = vpop.eup %4359  ;;  %v3039_v46 = vpack.c.bf16 %v2954_v55, %v7080_v14  ;;  %v2273_v51 = vor.u32 1.1754944e-38, %v2272_v24  ;;  %v7149_v58 = vadd.f32 %v1332_v25, %v6151_v1 }
 0x2da   : > { %4365 = vpow2.f32 %v3778_v35  ;;  %v2284_v41 = vsel %vm7138_vm4, %v7010_v6, %v2280_v62  ;;  %v2269_v9 = vsel %vm2268_vm6, %v4356_v44, %v2265_v20  ;;  %vm2271_vm7 = vcmp.eq.f32.partialorder %v2270_v53, 8.507059e+37  ;;  %v8431_v53 = vld [vmem:[#allocation37_spill] sm:$0xff]  ;;  %v1334_v18 = vpop.f32.mrf.mxu3 }
 0x2db   : > { %4367 = vrcp.f32 %v7142_v13  ;;  %3055 = vst [vmem:[%s6421_s3 + $0x30] sm:$0xff] %v3039_v46  ;;  %v2274_v14 = vsel %vm2271_vm7, %v2273_v51, %v2269_v9  ;;  %v7156_v38 = vadd.f32 1.0, %v4360_v21  ;;  %v7159_v0 = vadd.f32 %v1236_v56, %v6028_v29 }
 0x2dc   : > { %4369 = vpow2.f32 %v3771_v28  ;;  %v3093_v45 = vadd.f32 %v6891_v26, %v3075_v32  ;;  %vm2286_vm8 = vcmp.eq.f32.partialorder %v2285_v59, 8.507059e+37  ;;  %v2957_v27 = vmul.f32 %v2274_v14, %v6873_v12 }
 0x2dd   : > { %v7166_v6 = vadd.f32 %v1388_v54, %v5704_v19  ;;  %v4362_v44 = vpop.eup %4361  ;;  %v7176_v22 = vsel %vm7111_vm2, %v8431_v53, %v2554_v36  ;;  %v2289_v62 = vsel %vm2286_vm8, %v7083_v52, %v2284_v41  ;;  %4371 = vrcp.f32 %v7156_v38 }
 0x2de   : > { %v3767_v12 = vmul.f32 -1.442695, %v7149_v58  ;;  %v3008_v59 = vpack.c.bf16 %v2957_v27, %v7075_v50  ;;  %v2465_v42 = vand.u32 2147483647, %v7142_v13  ;;  %v2467_v11 = vand.u32 2147483648, %v7142_v13 }
 0x2df   : > { %v4364_v43 = vpop.eup %4363  ;;  %v7184_v49 = vadd.f32 1.0, %v4362_v44  ;;  %v2773_v25 = vsub.f32 1.0, %v7071_v10  ;;  %v7188_v52 = vadd.f32 %v6931_v7, %v3159_v61  ;;  %v3770_v24 = vmul.f32 -1.442695, %v7159_v0 }
 0x2e0   : > { %v4366_v36 = vpop.eup %4365  ;;  %v7190_v15 = vadd.f32 1.0, %v4364_v43  ;;  %v7193_v50 = vmul.f32 0.00390625, %v3093_v45  ;;  %v7196_v57 = vmul.f32 %v2289_v62, %v6837_v48  ;;  %3024 = vst [vmem:[%s6350_s22 + $0x38] sm:$0xff] %v3008_v59  ;;  %v3783_v16 = vmul.f32 -1.442695, %v7166_v6 }
 0x2e1   : > { %v4368_v60 = vpop.eup %4367  ;;  %4373 = vrcp.f32 %v7184_v49  ;;  %v7204_v47 = vadd.f32 %v1288_v40, %v6025_v8  ;;  %v7207_v32 = vadd.f32 %v1334_v18, %v6151_v1  ;;  %vm2461_vm9 = vweird.f32 %v7142_v13 }
 0x2e2   : > { %v4370_v17 = vpop.eup %4369  ;;  %v2457_v35 = vmul.f32 %v4368_v60, %v7142_v13  ;;  %4375 = vrcp.f32 %v7190_v15  ;;  %vm7210_vm10 = vcmp.eq.f32.partialorder %v2465_v42, 8.507059e+37  ;;  %v2468_v55 = vor.u32 1.1754944e-38, %v2467_v11 }
 0x2e3   : > { %4377 = vpow2.f32 %v3767_v12  ;;  %v7214_v28 = vpop.eup %4371  ;;  %v7216_v30 = vadd.f32 1.0, %v4366_v36  ;;  %v7218_v20 = vadd.f32 1.0, %v4370_v17  ;;  %v2360_v21 = vand.u32 2147483647, %v7156_v38 }
 0x2e4   : > { %v2458_v61 = vsub.f32 1.0, %v2457_v35  ;;  %4379 = vpow2.f32 %v3770_v24  ;;  %v2352_v56 = vmul.f32 %v7214_v28, %v7156_v38  ;;  %v2300_v46 = vand.u32 2147483647, %v7184_v49  ;;  %v8440_v35 = vld [vmem:[#allocation32_spill] sm:$0xff] }
 0x2e5   : > { %4381 = vpow2.f32 %v3783_v16  ;;  %vm2462_vm11 = vweird.f32 %v4368_v60  ;;  %v2302_v54 = vand.u32 2147483648, %v7184_v49  ;;  %v2362_v14 = vand.u32 2147483648, %v7156_v38 }
 0x2e6   : > { %v2459_v51 = vmul.f32 %v4368_v60, %v2458_v61  ;;  %4383 = vrcp.f32 %v7216_v30  ;;  %v2353_v9 = vsub.f32 1.0, %v2352_v56  ;;  %v2345_v45 = vand.u32 2147483647, %v7190_v15  ;;  %vm2463_vm12 = vmor %vm2461_vm9, %vm2462_vm11 }
 0x2e7   : > { %v4374_v41 = vpop.eup %4373  ;;  %4385 = vrcp.f32 %v7218_v20  ;;  %v2347_v62 = vand.u32 2147483648, %v7190_v15  ;;  %v7232_v12 = vmul.f32 -1.442695, %v7204_v47  ;;  %vm2296_vm13 = vweird.f32 %v7184_v49 }
 0x2e8   : > { %v4376_v27 = vpop.eup %4375  ;;  %v2460_v44 = vadd.f32 %v4368_v60, %v2459_v51  ;;  %v2292_v53 = vmul.f32 %v4374_v41, %v7184_v49  ;;  %vm7237_vm14 = vcmp.eq.f32.partialorder %v2300_v46, 8.507059e+37  ;;  %vm2341_vm15 = vweird.f32 %v7190_v15 }
 0x2e9   : > { %v4378_v43 = vpop.eup %4377  ;;  %v2337_v42 = vmul.f32 %v4376_v27, %v7190_v15  ;;  %v2354_v18 = vmul.f32 %v7214_v28, %v2353_v9  ;;  %v2303_v24 = vor.u32 1.1754944e-38, %v2302_v54  ;;  %vm2356_vm0 = vweird.f32 %v7156_v38 }
 0x2ea   : > { %v4380_v11 = vpop.eup %4379  ;;  %v2464_v40 = vsel %vm2463_vm12, %v4368_v60, %v2460_v44  ;;  %v2293_v36 = vsub.f32 1.0, %v2292_v53  ;;  %vm2357_vm1 = vweird.f32 %v7214_v28  ;;  %vm7248_vm2 = vcmp.eq.f32.partialorder %v2345_v45, 8.507059e+37 }
 0x2eb   : > { %v4382_v16 = vpop.eup %4381  ;;  %v2469_v13 = vsel %vm7210_vm10, %v2468_v55, %v2464_v40  ;;  %v2338_v17 = vsub.f32 1.0, %v2337_v42  ;;  %vm2297_vm3 = vweird.f32 %v4374_v41  ;;  %v2348_v46 = vor.u32 1.1754944e-38, %v2347_v62  ;;  %vm7292_vm8 = vmor %vm2356_vm0, %vm2357_vm1 }
 0x2ec   : > { %v7252_v61 = vpop.eup %4383  ;;  %v2970_v60 = vmul.f32 %v2469_v13, %v7050_v31  ;;  %v2294_v56 = vmul.f32 %v4374_v41, %v2293_v36  ;;  %vm2342_vm5 = vweird.f32 %v4376_v27  ;;  %v2540_v54 = vand.u32 2147483647, %v7216_v30  ;;  %vm2298_vm4 = vmor %vm2296_vm13, %vm2297_vm3 }
 0x2ed   : > { %v7255_v51 = vpop.eup %4385  ;;  %v2339_v48 = vmul.f32 %v4376_v27, %v2338_v17  ;;  %v2532_v55 = vmul.f32 %v7252_v61, %v7216_v30  ;;  %v2355_v44 = vadd.f32 %v7214_v28, %v2354_v18  ;;  %v7267_v40 = vadd.f32 1.0, %v4378_v43  ;;  %vm2343_vm6 = vmor %vm2341_vm15, %vm2342_vm5 }
 0x2ee   : > { %v3076_v9 = vmul.f32 %v6856_v37, %v2970_v60  ;;  %v3160_v45 = vmul.f32 %v6884_v4, %v2970_v60  ;;  %v2295_v53 = vadd.f32 %v4374_v41, %v2294_v56  ;;  %v2427_v42 = vmul.f32 %v7255_v51, %v7218_v20 }
 0x2ef   : > { %v2340_v31 = vadd.f32 %v4376_v27, %v2339_v48  ;;  %v2533_v62 = vsub.f32 1.0, %v2532_v55  ;;  %vm2537_vm7 = vweird.f32 %v7252_v61  ;;  %v2542_v59 = vand.u32 2147483648, %v7216_v30 }
 0x2f0   : > { %v3094_v36 = vadd.f32 %v6891_v26, %v3076_v9  ;;  %v3178_v13 = vadd.f32 %v6931_v7, %v3160_v45  ;;  %v2299_v17 = vsel %vm2298_vm4, %v4374_v41, %v2295_v53  ;;  %v2428_v43 = vsub.f32 1.0, %v2427_v42 }
 0x2f1   : > { %v2304_v49 = vsel %vm7237_vm14, %v2303_v24, %v2299_v17  ;;  %v2344_v18 = vsel %vm2343_vm6, %v4376_v27, %v2340_v31  ;;  %v2534_v60 = vmul.f32 %v7252_v61, %v2533_v62  ;;  %4387 = vrcp.f32 %v7267_v40 }
 0x2f2   : > { %v3110_v56 = vmul.f32 0.00390625, %v3094_v36  ;;  %v3929_v48 = vpack.c.bf16 %v3178_v13, %v7188_v52  ;;  %v2959_v55 = vmul.f32 %v2304_v49, %v7104_v63  ;;  %v2349_v41 = vsel %vm7248_vm2, %v2348_v46, %v2344_v18 }
 0x2f3   : > { %v2962_v15 = vmul.f32 %v2349_v41, %v7107_v23  ;;  %v2535_v9 = vadd.f32 %v7252_v61, %v2534_v60  ;;  %vm2536_vm9 = vweird.f32 %v7216_v30  ;;  %v2429_v52 = vmul.f32 %v7255_v51, %v2428_v43 }
 0x2f4   : > { %v3889_v27 = vpack.c.bf16 %v3110_v56, %v7193_v50  ;;  %3956 = vst [vmem:[%s6289_s30 + $0x20] sm:$0xff] %v3929_v48   ;;  %v3040_v23 = vpack.c.bf16 %v2959_v55, %v7196_v57  ;;  %v2359_v50 = vsel %vm7292_vm8, %v7214_v28, %v2355_v44  ;;  %vm2361_vm10 = vcmp.eq.f32.partialorder %v2360_v21, 8.507059e+37  ;;  %vm7309_vm11 = vmor %vm2536_vm9, %vm2537_vm7 }
 0x2f5   : > { %v2363_v24 = vor.u32 1.1754944e-38, %v2362_v14  ;;  %v3009_v46 = vpack.c.bf16 %v2962_v15, %v8440_v35  ;;  %v2539_v28 = vsel %vm7309_vm11, %v7252_v61, %v2535_v9  ;;  %vm7317_vm12 = vcmp.eq.f32.partialorder %v2540_v54, 8.507059e+37  ;;  %v1290_v15 = vpop.f32.mrf.mxu2 }
 0x2f6   : > { %3949 = vst [vmem:[%s6303_s1 + $0x20] sm:$0xff] %v3889_v27   ;;  %v7321_v21 = vadd.f32 1.0, %v4380_v11  ;;  %v7323_v38 = vadd.f32 1.0, %v4382_v16  ;;  %v2543_v14 = vor.u32 1.1754944e-38, %v2542_v59  ;;  %v2437_v45 = vand.u32 2147483648, %v7218_v20  ;;  %v8445_v16 = vld [vmem:[#allocation28_spill] sm:$0xff] }
 0x2f7   : > { %3056 = vst [vmem:[%s6421_s3 + $0x38] sm:$0xff] %v3040_v23  ;;  %v2375_v44 = vand.u32 2147483647, %v7267_v40  ;;  %4389 = vpow2.f32 %v7232_v12  ;;  %v2364_v53 = vsel %vm2361_vm10, %v2363_v24, %v2359_v50  ;;  %v7331_v61 = vadd.f32 %v7255_v51, %v2429_v52  ;;  %v4388_v11 = vpop.eup %4387 }
 0x2f8   : > { %3025 = vst [vmem:[%s6350_s22 + $0x40] sm:$0xff] %v3009_v46  ;;  %vm2432_vm13 = vweird.f32 %v7255_v51  ;;  %4391 = vrcp.f32 %v7321_v21  ;;  %v7337_v54 = vmul.f32 %v7176_v22, %v8445_v16  ;;  %v7342_v31 = vmul.f32 %v8422_v3, %v2773_v25  ;;  %v1239_v22 = vpop.f32.mrf.mxu1 }
 0x2f9   : > { %v2544_v12 = vsel %vm7317_vm12, %v2543_v14, %v2539_v28  ;;  %v2377_v62 = vand.u32 2147483648, %v7267_v40  ;;  %vm2431_vm14 = vweird.f32 %v7218_v20  ;;  %v2435_v42 = vand.u32 2147483647, %v7218_v20  ;;  %v1391_v20 = vpop.f32.mrf.mxu0  ;;  %v1337_v14 = vpop.f32.mrf.mxu3 }
 0x2fa   : > { %v2367_v36 = vmul.f32 %v4388_v11, %v7267_v40  ;;  %4393 = vrcp.f32 %v7323_v38  ;;  %v7352_v13 = vmul.f32 %v2364_v53, %v7090_v33  ;;  %vm7354_vm15 = vmor %vm2431_vm14, %vm2432_vm13  ;;  %v7358_v25 = vor.u32 1.1754944e-38, %v2437_v45 }
 0x2fb   : > { %vm2371_vm0 = vweird.f32 %v7267_v40  ;;  %vm7361_vm1 = vcmp.eq.f32.partialorder %v2375_v44, 8.507059e+37  ;;  %v7366_v49 = vmul.f32 %v2544_v12, %v7119_v39  ;;  %v2434_v33 = vsel %vm7354_vm15, %v7255_v51, %v7331_v61 }
 0x2fc   : > { %v2368_v18 = vsub.f32 1.0, %v2367_v36  ;;  %v3772_v60 = vmul.f32 -1.442695, %v7207_v32  ;;  %v2378_v56 = vor.u32 1.1754944e-38, %v2377_v62  ;;  %v2420_v48 = vand.u32 2147483647, %v7321_v21 }
 0x2fd   : > { %v4390_v43 = vpop.eup %4389  ;;  %v2422_v55 = vand.u32 2147483648, %v7321_v21  ;;  %v7376_v41 = vadd.f32 %v1239_v22, %v6028_v29  ;;  %vm2372_vm2 = vweird.f32 %v4388_v11  ;;  %v7381_v51 = vadd.f32 %v1391_v20, %v5704_v19 }
 0x2fe   : > { %v4392_v39 = vpop.eup %4391  ;;  %v2369_v9 = vmul.f32 %v4388_v11, %v2368_v18  ;;  %v7378_v59 = vadd.f32 1.0, %v4390_v43  ;;  %vm7383_vm3 = vcmp.eq.f32.partialorder %v2435_v42, 8.507059e+37  ;;  %vm2416_vm5 = vweird.f32 %v7321_v21  ;;  %vm2373_vm4 = vmor %vm2371_vm0, %vm2372_vm2 }
 0x2ff   : > { %v2412_v63 = vmul.f32 %v4392_v39, %v7321_v21  ;;  %4395 = vpow2.f32 %v3772_v60  ;;  %v3775_v23 = vmul.f32 -1.442695, %v7376_v41  ;;  %v3077_v50 = vmul.f32 %v6856_v37, %v7366_v49 }
 0x300   : > { %v4394_v52 = vpop.eup %4393  ;;  %v2370_v24 = vadd.f32 %v4388_v11, %v2369_v9  ;;  %4397 = vrcp.f32 %v7378_v59  ;;  %v7394_v35 = vadd.f32 %v1290_v15, %v6025_v8  ;;  %vm7398_vm6 = vcmp.eq.f32.partialorder %v2420_v48, 8.507059e+37 }
 0x301   : > { %v2413_v46 = vsub.f32 1.0, %v2412_v63  ;;  %v2423_v28 = vor.u32 1.1754944e-38, %v2422_v55  ;;  %v2607_v30 = vmul.f32 %v4394_v52, %v7323_v38  ;;  %v2617_v44 = vand.u32 2147483648, %v7323_v38 }
 0x302   : > { %v2374_v45 = vsel %vm2373_vm4, %v4388_v11, %v2370_v24  ;;  %4399 = vpow2.f32 %v3775_v23  ;;  %v3788_v53 = vmul.f32 -1.442695, %v7381_v51  ;;  %vm2417_vm7 = vweird.f32 %v4392_v39  ;;  %v1241_v23 = vpop.f32.mrf.mxu1 }
 0x303   : > { %v2379_v61 = vsel %vm7361_vm1, %v2378_v56, %v2374_v45  ;;  %v2414_v40 = vmul.f32 %v4392_v39, %v2413_v46  ;;  %v2608_v16 = vsub.f32 1.0, %v2607_v30  ;;  %v3781_v62 = vmul.f32 -1.442695, %v7394_v35  ;;  %vm2418_vm9 = vmor %vm2416_vm5, %vm2417_vm7  ;;  %v8454_v46 = vld [vmem:[#allocation34_spill] sm:$0xff]  ;;  %v1393_v45 = vpop.f32.mrf.mxu0 }
 0x304   : > { %v2964_v12 = vmul.f32 %v2379_v61, %v7149_v58  ;;  %4401 = vpow2.f32 %v3788_v53  ;;  %v7410_v42 = vadd.f32 %v1337_v14, %v6151_v1  ;;  %vm2612_vm8 = vweird.f32 %v4394_v52 }
 0x305   : > { %v4396_v11 = vpop.eup %4395  ;;  %v2415_v36 = vadd.f32 %v4392_v39, %v2414_v40  ;;  %v2609_v22 = vmul.f32 %v4394_v52, %v2608_v16  ;;  %v2615_v10 = vand.u32 2147483647, %v7323_v38  ;;  %vm2611_vm10 = vweird.f32 %v7323_v38 }
 0x306   : > { %v7413_v17 = vpop.eup %4397  ;;  %v3041_v20 = vpack.c.bf16 %v2964_v12, %v7352_v13  ;;  %v7419_v58 = vadd.f32 1.0, %v4396_v11  ;;  %4403 = vpow2.f32 %v3781_v62  ;;  %v3777_v56 = vmul.f32 -1.442695, %v7410_v42  ;;  %vm2613_vm11 = vmor %vm2611_vm10, %vm2612_vm8 }
 0x307   : > { %v2419_v18 = vsel %vm2418_vm9, %v4392_v39, %v2415_v36  ;;  %v2610_v60 = vadd.f32 %v4394_v52, %v2609_v22  ;;  %v2502_v43 = vmul.f32 %v7413_v17, %v7378_v59  ;;  %v2439_v13 = vsel %vm7383_vm3, %v7358_v25, %v2434_v33 }
 0x308   : > { %v4400_v48 = vpop.eup %4399  ;;  %3057 = vst [vmem:[%s6421_s3 + $0x40] sm:$0xff] %v3041_v20  ;;  %v2424_v21 = vsel %vm7398_vm6, %v2423_v28, %v2419_v18  ;;  %v2618_v38 = vor.u32 1.1754944e-38, %v2617_v44  ;;  %4405 = vrcp.f32 %v7419_v58  ;;  %v3161_v55 = vmul.f32 %v6884_v4, %v7366_v49 }
 0x309   : > { %v2967_v15 = vmul.f32 %v2424_v21, %v7159_v0  ;;  %v2614_v39 = vsel %vm2613_vm11, %v4394_v52, %v2610_v60  ;;  %vm2616_vm12 = vcmp.eq.f32.partialorder %v2615_v10, 8.507059e+37  ;;  %v3095_v25 = vadd.f32 %v6891_v26, %v3077_v50 }
 0x30a   : > { %v4402_v9 = vpop.eup %4401  ;;  %v2619_v33 = vsel %vm2616_vm12, %v2618_v38, %v2614_v39  ;;  %v2503_v27 = vsub.f32 1.0, %v2502_v43  ;;  %v7436_v63 = vadd.f32 1.0, %v4400_v48  ;;  %v7440_v24 = vadd.f32 %v8422_v3, %v7342_v31 }
 0x30b   : > { %v3010_v57 = vpack.c.bf16 %v2967_v15, %v8454_v46  ;;  %v2980_v49 = vmul.f32 %v2619_v33, %v7166_v6  ;;  %4407 = vpow2.f32 %v3777_v56  ;;  %v7445_v52 = vmul.f32 %v2439_v13, %v7122_v34  ;;  %v1244_v15 = vpop.f32.mrf.mxu1 }
 0x30c   : > { %v4404_v0 = vpop.eup %4403  ;;  %v2510_v50 = vand.u32 2147483647, %v7378_v59  ;;  %v2512_v28 = vand.u32 2147483648, %v7378_v59  ;;  %4409 = vrcp.f32 %v7436_v63  ;;  %v7453_v14 = vadd.f32 1.0, %v4402_v9 }
 0x30d   : > { %3026 = vst [vmem:[%s6350_s22 + $0x48] sm:$0xff] %v3010_v57  ;;  %v3078_v30 = vmul.f32 %v6856_v37, %v2980_v49  ;;  %v3162_v31 = vmul.f32 %v6884_v4, %v2980_v49  ;;  %v7456_v6 = vadd.f32 %v1241_v23, %v6028_v29  ;;  %v3111_v34 = vmul.f32 0.00390625, %v3095_v25  ;;  %v1293_v49 = vpop.f32.mrf.mxu2 }
 0x30e   : > { %v4406_v44 = vpop.eup %4405  ;;  %v3179_v53 = vadd.f32 %v6931_v7, %v3161_v55  ;;  %v2504_v61 = vmul.f32 %v7413_v17, %v2503_v27  ;;  %v7460_v40 = vadd.f32 1.0, %v4404_v0  ;;  %vm2506_vm13 = vweird.f32 %v7378_v59 }
 0x30f   : > { %v3096_v16 = vadd.f32 %v6891_v26, %v3078_v30  ;;  %v3180_v37 = vadd.f32 %v6931_v7, %v3162_v31  ;;  %v2442_v4 = vmul.f32 %v4406_v44, %v7419_v58  ;;  %v2513_v12 = vor.u32 1.1754944e-38, %v2512_v28 }
 0x310   : > { %v2450_v62 = vand.u32 2147483647, %v7419_v58  ;;  %4411 = vrcp.f32 %v7453_v14  ;;  %v7469_v11 = vadd.f32 %v1393_v45, %v5704_v19  ;;  %vm7471_vm14 = vcmp.eq.f32.partialorder %v2510_v50, 8.507059e+37 }
 0x311   : > { %v4408_v36 = vpop.eup %4407  ;;  %v3112_v22 = vmul.f32 0.00390625, %v3096_v16  ;;  %v3934_v10 = vpack.c.bf16 %v3180_v37, %v3179_v53  ;;  %v2443_v7 = vsub.f32 1.0, %v2442_v4  ;;  %v3780_v20 = vmul.f32 -1.442695, %v7456_v6 }
 0x312   : > { %v4410_v18 = vpop.eup %4409  ;;  %v2505_v60 = vadd.f32 %v7413_v17, %v2504_v61  ;;  %vm2507_vm15 = vweird.f32 %v7413_v17  ;;  %v2452_v43 = vand.u32 2147483648, %v7419_v58  ;;  %4413 = vrcp.f32 %v7460_v40 }
 0x313   : > { %v3894_v56 = vpack.c.bf16 %v3112_v22, %v3111_v34  ;;  %3957 = vst [vmem:[%s6289_s30 + $0x28] sm:$0xff] %v3934_v10   ;;  %v2444_v48 = vmul.f32 %v4406_v44, %v2443_v7  ;;  %vm2447_vm0 = vweird.f32 %v4406_v44  ;;  %v2487_v13 = vmul.f32 %v4410_v18, %v7436_v63  ;;  %vm7492_vm3 = vmor %vm2506_vm13, %vm2507_vm15 }
 0x314   : > { %vm2446_vm1 = vweird.f32 %v7419_v58  ;;  %vm7483_vm2 = vcmp.eq.f32.partialorder %v2450_v62, 8.507059e+37  ;;  %v2495_v38 = vand.u32 2147483647, %v7436_v63  ;;  %v2497_v55 = vand.u32 2147483648, %v7436_v63  ;;  %v1339_v62 = vpop.f32.mrf.mxu3 }
 0x315   : > { %3950 = vst [vmem:[%s6303_s1 + $0x28] sm:$0xff] %v3894_v56   ;;  %v2445_v39 = vadd.f32 %v4406_v44, %v2444_v48  ;;  %v2488_v9 = vsub.f32 1.0, %v2487_v13  ;;  %v7496_v25 = vadd.f32 1.0, %v4408_v36  ;;  %4415 = vpow2.f32 %v3780_v20  ;;  %vm2448_vm5 = vmor %vm2446_vm1, %vm2447_vm0 }
 0x316   : > { %v7498_v58 = vpop.eup %4411  ;;  %v2509_v33 = vsel %vm7492_vm3, %v7413_v17, %v2505_v60  ;;  %v2453_v27 = vor.u32 1.1754944e-38, %v2452_v43  ;;  %vm2491_vm4 = vweird.f32 %v7436_v63  ;;  %v3793_v59 = vmul.f32 -1.442695, %v7469_v11 }
 0x317   : > { %v2449_v23 = vsel %vm2448_vm5, %v4406_v44, %v2445_v39  ;;  %v2489_v46 = vmul.f32 %v4410_v18, %v2488_v9  ;;  %vm2492_vm6 = vweird.f32 %v4410_v18  ;;  %v2682_v57 = vmul.f32 %v7498_v58, %v7453_v14 }
 0x318   : > { %v7507_v0 = vpop.eup %4413  ;;  %v2454_v50 = vsel %vm7483_vm2, %v2453_v27, %v2449_v23  ;;  %vm7511_vm7 = vcmp.eq.f32.partialorder %v2495_v38, 8.507059e+37  ;;  %v2498_v28 = vor.u32 1.1754944e-38, %v2497_v55  ;;  %4417 = vrcp.f32 %v7496_v25  ;;  %vm2493_vm8 = vmor %vm2491_vm4, %vm2492_vm6 }
 0x319   : > { %v2969_v30 = vmul.f32 %v2454_v50, %v7207_v32  ;;  %v2490_v31 = vadd.f32 %v4410_v18, %v2489_v46  ;;  %v2683_v45 = vsub.f32 1.0, %v2682_v57  ;;  %v2577_v44 = vmul.f32 %v7507_v0, %v7460_v40 }
 0x31a   : > { %v2514_v34 = vsel %vm7471_vm14, %v2513_v12, %v2509_v33  ;;  %vm2686_vm9 = vweird.f32 %v7453_v14  ;;  %4419 = vpow2.f32 %v3793_v59  ;;  %v7525_v53 = vadd.f32 %v1293_v49, %v6025_v8 }
 0x31b   : > { %v4416_v61 = vpop.eup %4415  ;;  %v3042_v32 = vpack.c.bf16 %v2969_v30, %v7445_v52  ;;  %v2494_v16 = vsel %vm2493_vm8, %v4410_v18, %v2490_v31  ;;  %v2684_v37 = vmul.f32 %v7498_v58, %v2683_v45  ;;  %v2578_v4 = vsub.f32 1.0, %v2577_v44  ;;  %v1396_v44 = vpop.f32.mrf.mxu0 }
 0x31c   : > { %v2499_v12 = vsel %vm7511_vm7, %v2498_v28, %v2494_v16  ;;  %vm2687_vm10 = vweird.f32 %v7498_v58  ;;  %v2690_v63 = vand.u32 2147483647, %v7453_v14  ;;  %v7533_v36 = vadd.f32 1.0, %v4416_v61  ;;  %v7659_v28 = vld [vmem:[%s8225_s5 + $0x1] ss:$0 sm:$0xff] }
 0x31d   : > { %3058 = vst [vmem:[%s6421_s3 + $0x48] sm:$0xff] %v3042_v32  ;;  %v2972_v22 = vmul.f32 %v2499_v12, %v7376_v41  ;;  %v2685_v10 = vadd.f32 %v7498_v58, %v2684_v37  ;;  %v2692_v52 = vand.u32 2147483648, %v7453_v14  ;;  %v2585_v26 = vand.u32 2147483647, %v7460_v40  ;;  %v8463_v41 = vld [vmem:[#allocation38_spill] sm:$0xff]  ;;  %vm7554_vm11 = vmor %vm2686_vm9, %vm2687_vm10 }
 0x31e   : > { %v4418_v7 = vpop.eup %4417  ;;  %v2579_v20 = vmul.f32 %v7507_v0, %v2578_v4  ;;  %4421 = vrcp.f32 %v7533_v36  ;;  %v3786_v18 = vmul.f32 -1.442695, %v7525_v53  ;;  %v7544_v60 = vadd.f32 %v1339_v62, %v6151_v1 }
 0x31f   : > { %v7547_v43 = vmul.f32 %v2514_v34, %v7204_v47  ;;  %v3011_v56 = vpack.c.bf16 %v2972_v22, %v8463_v41  ;;  %vm2581_vm12 = vweird.f32 %v7460_v40  ;;  %v2517_v13 = vmul.f32 %v4418_v7, %v7496_v25 }
 0x320   : > { %v4420_v21 = vpop.eup %4419  ;;  %v2689_v47 = vsel %vm7554_vm11, %v7498_v58, %v2685_v10  ;;  %vm2691_vm13 = vcmp.eq.f32.partialorder %v2690_v63, 8.507059e+37  ;;  %v2587_v38 = vand.u32 2147483648, %v7460_v40  ;;  %v2525_v55 = vand.u32 2147483647, %v7496_v25 }
 0x321   : > { %3027 = vst [vmem:[%s6350_s22 + $0x50] sm:$0xff] %v3011_v56  ;;  %v2693_v14 = vor.u32 1.1754944e-38, %v2692_v52  ;;  %v2518_v39 = vsub.f32 1.0, %v2517_v13  ;;  %v2527_v9 = vand.u32 2147483648, %v7496_v25  ;;  %v7567_v33 = vadd.f32 1.0, %v4420_v21  ;;  %v1246_v21 = vpop.f32.mrf.mxu1 }
 0x322   : > { %v2580_v27 = vadd.f32 %v7507_v0, %v2579_v20  ;;  %vm2582_vm14 = vweird.f32 %v7507_v0  ;;  %vm7571_vm15 = vcmp.eq.f32.partialorder %v2585_v26, 8.507059e+37  ;;  %4423 = vpow2.f32 %v3786_v18 }
 0x323   : > { %v3782_v58 = vmul.f32 -1.442695, %v7544_v60  ;;  %v2694_v23 = vsel %vm2691_vm13, %v2693_v14, %v2689_v47  ;;  %v2519_v46 = vmul.f32 %v4418_v7, %v2518_v39  ;;  %vm2522_vm0 = vweird.f32 %v4418_v7  ;;  %vm7587_vm3 = vmor %vm2581_vm12, %vm2582_vm14 }
 0x324   : > { %v7577_v57 = vadd.f32 %v1244_v15, %v6028_v29  ;;  %v4422_v49 = vpop.eup %4421  ;;  %v2588_v50 = vor.u32 1.1754944e-38, %v2587_v38  ;;  %vm2521_vm1 = vweird.f32 %v7496_v25  ;;  %vm7580_vm2 = vcmp.eq.f32.partialorder %v2525_v55, 8.507059e+37  ;;  %v1295_v25 = vpop.f32.mrf.mxu2  ;;  %v7625_v38 = vld [vmem:[%s8225_s5] ss:$0 sm:$0xff] }
 0x325   : > { %4425 = vrcp.f32 %v7567_v33  ;;  %v2520_v30 = vadd.f32 %v4418_v7, %v2519_v46  ;;  %v2528_v31 = vor.u32 1.1754944e-38, %v2527_v9  ;;  %v2562_v45 = vmul.f32 %v4422_v49, %v7533_v36  ;;  %vm2523_vm4 = vmor %vm2521_vm1, %vm2522_vm0 }
 0x326   : > { %vm2566_vm5 = vweird.f32 %v7533_v36  ;;  %v2985_v34 = vmul.f32 %v2694_v23, %v7381_v51  ;;  %v2570_v61 = vand.u32 2147483647, %v7533_v36  ;;  %v2572_v40 = vand.u32 2147483648, %v7533_v36 }
 0x327   : > { %4427 = vpow2.f32 %v3782_v58  ;;  %v2584_v32 = vsel %vm7587_vm3, %v7507_v0, %v2580_v27  ;;  %v2524_v16 = vsel %vm2523_vm4, %v4418_v7, %v2520_v30  ;;  %v2563_v37 = vsub.f32 1.0, %v2562_v45  ;;  %v1342_v0 = vpop.f32.mrf.mxu3 }
 0x328   : > { %v3785_v4 = vmul.f32 -1.442695, %v7577_v57  ;;  %v4424_v62 = vpop.eup %4423  ;;  %v2529_v12 = vsel %vm7580_vm2, %v2528_v31, %v2524_v16  ;;  %vm2567_vm6 = vweird.f32 %v4422_v49  ;;  %v7604_v51 = vadd.f32 %v1396_v44, %v5704_v19 }
 0x329   : > { %v7607_v63 = vadd.f32 %v1295_v25, %v6025_v8  ;;  %v2974_v22 = vmul.f32 %v2529_v12, %v7410_v42  ;;  %v2564_v10 = vmul.f32 %v4422_v49, %v2563_v37  ;;  %v7610_v52 = vadd.f32 1.0, %v4424_v62  ;;  %vm2568_vm8 = vmor %vm2566_vm5, %vm2567_vm6 }
 0x32a   : > { %4429 = vpow2.f32 %v3785_v4  ;;  %vm7612_vm7 = vcmp.eq.f32.partialorder %v2570_v61, 8.507059e+37  ;;  %v2573_v20 = vor.u32 1.1754944e-38, %v2572_v40  ;;  %v3798_v18 = vmul.f32 -1.442695, %v7604_v51 }
 0x32b   : > { %v4426_v26 = vpop.eup %4425  ;;  %v3791_v41 = vmul.f32 -1.442695, %v7607_v63  ;;  %v2589_v56 = vsel %vm7571_vm15, %v2588_v50, %v2584_v32  ;;  %v3043_v42 = vpack.c.bf16 %v2974_v22, %v7547_v43  ;;  %v2565_v48 = vadd.f32 %v4422_v49, %v2564_v10  ;;  %v7653_v50 = vld [vmem:[%s8226_s6] ss:$0 sm:$0xff] }
 0x32c   : > { %v2757_v13 = vmul.f32 %v4426_v26, %v7567_v33  ;;  %v3079_v55 = vmul.f32 %v7625_v38, %v2985_v34  ;;  %v2765_v15 = vand.u32 2147483647, %v7567_v33  ;;  %4431 = vrcp.f32 %v7610_v52 }
 0x32d   : > { %v4428_v47 = vpop.eup %4427  ;;  %v7634_v43 = vadd.f32 %v1342_v0, %v6151_v1  ;;  %3059 = vst [vmem:[%s6421_s3 + $0x50] sm:$0xff] %v3043_v42  ;;  %v2569_v14 = vsel %vm2568_vm8, %v4422_v49, %v2565_v48  ;;  %4433 = vpow2.f32 %v3798_v18  ;;  %v2767_v59 = vand.u32 2147483648, %v7567_v33 }
 0x32e   : > { %v2758_v39 = vsub.f32 1.0, %v2757_v13  ;;  %v7637_v9 = vadd.f32 1.0, %v4428_v47  ;;  %v2574_v27 = vsel %vm7612_vm7, %v2573_v20, %v2569_v14  ;;  %4435 = vpow2.f32 %v3791_v41 }
 0x32f   : > { %v7643_v36 = vadd.f32 %v1246_v21, %v6028_v29  ;;  %v2977_v23 = vmul.f32 %v2574_v27, %v7456_v6  ;;  %vm2762_vm9 = vweird.f32 %v4426_v26  ;;  %v7648_v49 = vadd.f32 1.0, %v6811_v5 }
 0x330   : > { %v4430_v58 = vpop.eup %4429  ;;  %v2759_v46 = vmul.f32 %v4426_v26, %v2758_v39  ;;  %4437 = vrcp.f32 %v7637_v9  ;;  %v3097_v17 = vadd.f32 %v7653_v50, %v3079_v55  ;;  %v3163_v6 = vmul.f32 %v7659_v28, %v2985_v34 }
 0x331   : > { %v7662_v30 = vadd.f32 1.0, %v4430_v58  ;;  %v3012_v5 = vpack.c.bf16 %v2977_v23, %v7337_v54  ;;  %vm2761_vm10 = vweird.f32 %v7567_v33  ;;  %v3787_v45 = vmul.f32 -1.442695, %v7634_v43 }
 0x332   : > { %v2760_v31 = vadd.f32 %v4426_v26, %v2759_v46  ;;  %v7667_v44 = vpop.eup %4431  ;;  %v7670_v25 = vmul.f32 %v2589_v56, %v7394_v35  ;;  %vm2763_vm11 = vmor %vm2761_vm10, %vm2762_vm9  ;;  %vm2766_vm12 = vcmp.eq.f32.partialorder %v2765_v15, 8.507059e+37  ;;  %v2768_v61 = vor.u32 1.1754944e-38, %v2767_v59  ;;  %v7681_v35 = vld [vmem:[%s8226_s6 + $0x1] ss:$0 sm:$0xff] }
 0x333   : > { %4439 = vrcp.f32 %v7662_v30  ;;  %v4434_v34 = vpop.eup %4433  ;;  %3028 = vst [vmem:[%s6350_s22 + $0x58] sm:$0xff] %v3012_v5  ;;  %v2652_v54 = vmul.f32 %v7667_v44, %v7610_v52  ;;  %v2662_v33 = vand.u32 2147483648, %v7610_v52  ;;  %v3790_v32 = vmul.f32 -1.442695, %v7643_v36 }
 0x334   : > { %v2764_v40 = vsel %vm2763_vm11, %v4426_v26, %v2760_v31  ;;  %v4436_v16 = vpop.eup %4435  ;;  %v3113_v37 = vmul.f32 0.00390625, %v3097_v17  ;;  %v3181_v4 = vadd.f32 %v7681_v35, %v3163_v6  ;;  %v7684_v12 = vadd.f32 1.0, %v4434_v34 }
 0x335   : > { %v2769_v62 = vsel %vm2766_vm12, %v2768_v61, %v2764_v40  ;;  %v2653_v0 = vsub.f32 1.0, %v2652_v54  ;;  %v7687_v26 = vadd.f32 1.0, %v4436_v16  ;;  %4441 = vpow2.f32 %v3787_v45 }
 0x336   : > { %v4438_v22 = vpop.eup %4437  ;;  %v2990_v10 = vmul.f32 %v2769_v62, %v7469_v11  ;;  %vm2656_vm13 = vweird.f32 %v7610_v52  ;;  %v2660_v7 = vand.u32 2147483647, %v7610_v52  ;;  %4443 = vrcp.f32 %v7684_v12  ;;  %v8481_v52 = vld [vmem:[#allocation33_spill] sm:$0xff] }
 0x337   : > { %v2592_v20 = vmul.f32 %v4438_v22, %v7637_v9  ;;  %v7695_v56 = vor.u32 1.1754944e-38, %v2662_v33  ;;  %4445 = vpow2.f32 %v3790_v32  ;;  %vm2777_vm14 = vweird.f32 %v8422_v3 }
 0x338   : > { %v3080_v18 = vmul.f32 %v7625_v38, %v2990_v10  ;;  %v3164_v41 = vmul.f32 %v7659_v28, %v2990_v10  ;;  %v2654_v42 = vmul.f32 %v7667_v44, %v2653_v0  ;;  %v2602_v13 = vand.u32 2147483648, %v7637_v9 }
 0x339   : > { %v4440_v11 = vpop.eup %4439  ;;  %v2593_v48 = vsub.f32 1.0, %v2592_v20  ;;  %4447 = vrcp.f32 %v7687_v26  ;;  %vm2596_vm15 = vweird.f32 %v7637_v9  ;;  %vm2776_vm0 = vweird.f32 %v8421_v2 }
 0x33a   : > { %v3098_v21 = vadd.f32 %v7653_v50, %v3080_v18  ;;  %v3182_v47 = vadd.f32 %v7681_v35, %v3164_v41  ;;  %v2637_v55 = vmul.f32 %v4440_v11, %v7662_v30  ;;  %vm2597_vm1 = vweird.f32 %v4438_v22  ;;  %v1398_v18 = vpop.f32.mrf.mxu0  ;;  %vm7757_vm10 = vmor %vm2776_vm0, %vm2777_vm14 }
 0x33b   : > { %v2594_v15 = vmul.f32 %v4438_v22, %v2593_v48  ;;  %v2600_v14 = vand.u32 2147483647, %v7637_v9  ;;  %v2645_v39 = vand.u32 2147483647, %v7662_v30  ;;  %v4442_v27 = vpop.eup %4441  ;;  %v2647_v46 = vand.u32 2147483648, %v7662_v30  ;;  %vm2598_vm3 = vmor %vm2596_vm15, %vm2597_vm1 }
 0x33c   : > { %v3114_v59 = vmul.f32 0.00390625, %v3098_v21  ;;  %v3939_v58 = vpack.c.bf16 %v3182_v47, %v3181_v4  ;;  %v2638_v23 = vsub.f32 1.0, %v2637_v55  ;;  %v7709_v17 = vpop.eup %4443  ;;  %v2655_v6 = vadd.f32 %v7667_v44, %v2654_v42  ;;  %v1344_v21 = vpop.f32.mrf.mxu3 }
 0x33d   : > { %vm2657_vm2 = vweird.f32 %v7667_v44  ;;  %v2595_v5 = vadd.f32 %v4438_v22, %v2594_v15  ;;  %v2603_v31 = vor.u32 1.1754944e-38, %v2602_v13  ;;  %v4446_v45 = vpop.eup %4445  ;;  %vm2642_vm5 = vweird.f32 %v4440_v11 }
 0x33e   : > { %v3899_v61 = vpack.c.bf16 %v3114_v59, %v3113_v37  ;;  %3958 = vst [vmem:[%s6289_s30 + $0x30] sm:$0xff] %v3939_v58   ;;  %v2639_v34 = vmul.f32 %v4440_v11, %v2638_v23  ;;  %v2832_v40 = vmul.f32 %v7709_v17, %v7684_v12  ;;  %vm2601_vm4 = vcmp.eq.f32.partialorder %v2600_v14, 8.507059e+37  ;;  %vm7731_vm8 = vmor %vm2656_vm13, %vm2657_vm2  ;;  %v1249_v58 = vpop.f32.mrf.mxu1 }
 0x33f   : > { %v7719_v54 = vpop.eup %4447  ;;  %v2599_v33 = vsel %vm2598_vm3, %v4438_v22, %v2595_v5  ;;  %vm2641_vm6 = vweird.f32 %v7662_v30  ;;  %vm7722_vm7 = vcmp.eq.f32.partialorder %v2645_v39, 8.507059e+37  ;;  %v2648_v4 = vor.u32 1.1754944e-38, %v2647_v46  ;;  %v1298_v22 = vpop.f32.mrf.mxu2 }
 0x340   : > { %3951 = vst [vmem:[%s6303_s1 + $0x30] sm:$0xff] %v3899_v61   ;;  %v2604_v16 = vsel %vm2601_vm4, %v2603_v31, %v2599_v33  ;;  %v2640_v37 = vadd.f32 %v4440_v11, %v2639_v34  ;;  %v2833_v62 = vsub.f32 1.0, %v2832_v40  ;;  %v2659_v30 = vsel %vm7731_vm8, %v7667_v44, %v2655_v6  ;;  %vm2643_vm9 = vmor %vm2641_vm6, %vm2642_vm5 }
 0x341   : > { %v2979_v10 = vmul.f32 %v2604_v16, %v7544_v60  ;;  %v2840_v0 = vand.u32 2147483647, %v7684_v12  ;;  %v7741_v20 = vadd.f32 1.0, %v4442_v27  ;;  %v2727_v48 = vmul.f32 %v7719_v54, %v7687_v26 }
 0x342   : > { %v2644_v41 = vsel %vm2643_vm9, %v4440_v11, %v2640_v37  ;;  %v2834_v42 = vmul.f32 %v7709_v17, %v2833_v62  ;;  %v7746_v13 = vadd.f32 1.0, %v4446_v45  ;;  %v2842_v47 = vand.u32 2147483648, %v7684_v12 }
 0x343   : > { %v3044_v44 = vpack.c.bf16 %v2979_v10, %v7670_v25  ;;  %v2649_v60 = vsel %vm7722_vm7, %v2648_v4, %v2644_v41  ;;  %4449 = vrcp.f32 %v7741_v20  ;;  %v2780_v55 = vand.u32 2147483647, %v8421_v2 }
 0x344   : > { %vm2661_vm11 = vcmp.eq.f32.partialorder %v2660_v7, 8.507059e+37  ;;  %v2982_v25 = vmul.f32 %v2649_v60, %v7577_v57  ;;  %v7766_v15 = vadd.f32 %v1398_v18, %v5704_v19  ;;  %v2779_v14 = vsel %vm7757_vm10, %v8422_v3, %v7440_v24  ;;  %v8490_v3 = vld [vmem:[#allocation35_spill] sm:$0xff] }
 0x345   : > { %v8480_v39 = vand.u32 2147483648, %v8421_v2  ;;  %v2664_v59 = vsel %vm2661_vm11, %v7695_v56, %v2659_v30  ;;  %3060 = vst [vmem:[%s6421_s3 + $0x58] sm:$0xff] %v3044_v44  ;;  %4451 = vrcp.f32 %v7746_v13  ;;  %v2835_v19 = vadd.f32 %v7709_v17, %v2834_v42  ;;  %v1347_v30 = vpop.f32.mrf.mxu3  ;;  %v8491_v42 = vld [vmem:[#allocation29_spill] sm:$0xff] }
 0x346   : > { %v3013_v57 = vpack.c.bf16 %v2982_v25, %v8481_v52  ;;  %vm2837_vm12 = vweird.f32 %v7709_v17  ;;  %v2728_v7 = vsub.f32 1.0, %v2727_v48  ;;  %4453 = vrcp.f32 %v7648_v49 }
 0x347   : > { %v7774_v27 = vor.u32 1.1754944e-38, %v8480_v39  ;;  %vm2836_vm13 = vweird.f32 %v7684_v12  ;;  %vm7784_vm14 = vcmp.eq.f32.partialorder %v2840_v0, 8.507059e+37  ;;  %v2843_v56 = vor.u32 1.1754944e-38, %v2842_v47  ;;  %v1300_v32 = vpop.f32.mrf.mxu2 }
 0x348   : > { %v7789_v23 = vmul.f32 %v2664_v59, %v7525_v53  ;;  %3029 = vst [vmem:[%s6350_s22 + $0x60] sm:$0xff] %v3013_v57  ;;  %v2735_v46 = vand.u32 2147483647, %v7687_v26  ;;  %v3803_v6 = vmul.f32 -1.442695, %v7766_v15  ;;  %v7795_v5 = vadd.f32 %v1298_v22, %v6025_v8  ;;  %vm7797_vm15 = vmor %vm2836_vm13, %vm2837_vm12 }
 0x349   : > { %v4450_v31 = vpop.eup %4449  ;;  %vm2731_vm0 = vweird.f32 %v7687_v26  ;;  %vm2732_vm1 = vweird.f32 %v7719_v54  ;;  %v2737_v53 = vand.u32 2147483648, %v7687_v26  ;;  %v7805_v12 = vadd.f32 %v1344_v21, %v6151_v1 }
 0x34a   : > { %v7808_v61 = vadd.f32 %v1249_v58, %v6028_v29  ;;  %v2839_v34 = vsel %vm7797_vm15, %v7709_v17, %v2835_v19  ;;  %v2729_v40 = vmul.f32 %v7719_v54, %v2728_v7  ;;  %v2667_v33 = vmul.f32 %v4450_v31, %v7741_v20  ;;  %vm7849_vm8 = vmor %vm2731_vm0, %vm2732_vm1 }
 0x34b   : > { %vm2671_vm2 = vweird.f32 %v7741_v20  ;;  %v4452_v9 = vpop.eup %4451  ;;  %v2675_v16 = vand.u32 2147483647, %v7741_v20  ;;  %4455 = vpow2.f32 %v3803_v6  ;;  %v3796_v37 = vmul.f32 -1.442695, %v7795_v5 }
 0x34c   : > { %v3792_v4 = vmul.f32 -1.442695, %v7805_v12  ;;  %v2668_v62 = vsub.f32 1.0, %v2667_v33  ;;  %v2677_v22 = vand.u32 2147483648, %v7741_v20  ;;  %v2712_v17 = vmul.f32 %v4452_v9, %v7746_v13  ;;  %v7822_v10 = vpop.eup %4453 }
 0x34d   : > { %vm2716_vm3 = vweird.f32 %v7746_v13  ;;  %v2844_v0 = vsel %vm7784_vm14, %v2843_v56, %v2839_v34  ;;  %4457 = vpow2.f32 %v3796_v37  ;;  %v3795_v18 = vmul.f32 -1.442695, %v7808_v61 }
 0x34e   : > { %v7828_v41 = vadd.f32 %v1300_v32, %v6025_v8  ;;  %vm7830_vm5 = vcmp.eq.f32.partialorder %v2780_v55, 8.507059e+37  ;;  %v2669_v48 = vmul.f32 %v4450_v31, %v2668_v62  ;;  %vm2672_vm4 = vweird.f32 %v4450_v31 }
 0x34f   : > { %v2713_v21 = vsub.f32 1.0, %v2712_v17  ;;  %4459 = vpow2.f32 %v3792_v4  ;;  %v2720_v44 = vand.u32 2147483647, %v7746_v13  ;;  %v2722_v60 = vand.u32 2147483648, %v7746_v13  ;;  %vm2673_vm7 = vmor %vm2671_vm2, %vm2672_vm4 }
 0x350   : > { %4461 = vpow2.f32 %v3795_v18  ;;  %v7837_v47 = vadd.f32 %v1347_v30, %v6151_v1  ;;  %v2730_v25 = vadd.f32 %v7719_v54, %v2729_v40  ;;  %v2670_v8 = vadd.f32 %v4450_v31, %v2669_v48 }
 0x351   : > { %v2714_v39 = vmul.f32 %v4452_v9, %v2713_v21  ;;  %vm2717_vm6 = vweird.f32 %v4452_v9  ;;  %v4456_v55 = vpop.eup %4455  ;;  %v2995_v59 = vmul.f32 %v2844_v0, %v7604_v51  ;;  %v2678_v52 = vor.u32 1.1754944e-38, %v2677_v22 }
 0x352   : > { %v3801_v57 = vmul.f32 -1.442695, %v7828_v41  ;;  %v3797_v19 = vmul.f32 -1.442695, %v7837_v47  ;;  %v2674_v58 = vsel %vm2673_vm7, %v4450_v31, %v2670_v8  ;;  %vm2676_vm9 = vcmp.eq.f32.partialorder %v2675_v16, 8.507059e+37  ;;  %vm2718_vm11 = vmor %vm2716_vm3, %vm2717_vm6 }
 0x353   : > { %v2715_v2 = vadd.f32 %v4452_v9, %v2714_v39  ;;  %v7853_v51 = vadd.f32 1.0, %v4456_v55  ;;  %v4458_v20 = vpop.eup %4457  ;;  %v2679_v56 = vsel %vm2676_vm9, %v2678_v52, %v2674_v58  ;;  %vm2721_vm12 = vcmp.eq.f32.partialorder %v2720_v44, 8.507059e+37 }
 0x354   : > { %v2723_v6 = vor.u32 1.1754944e-38, %v2722_v60  ;;  %4463 = vpow2.f32 %v3797_v19  ;;  %v2734_v34 = vsel %vm7849_vm8, %v7719_v54, %v2730_v25  ;;  %v2984_v40 = vmul.f32 %v2679_v56, %v7634_v43 }
 0x355   : > { %v4460_v45 = vpop.eup %4459  ;;  %v2719_v31 = vsel %vm2718_vm11, %v4452_v9, %v2715_v2  ;;  %4465 = vrcp.f32 %v7853_v51  ;;  %v3081_v32 = vmul.f32 %v7625_v38, %v2995_v59  ;;  %v7863_v13 = vadd.f32 1.0, %v4458_v20 }
 0x356   : > { %v4462_v33 = vpop.eup %4461  ;;  %v2724_v16 = vsel %vm2721_vm12, %v2723_v6, %v2719_v31  ;;  %4467 = vpow2.f32 %v3801_v57  ;;  %v3045_v37 = vpack.c.bf16 %v2984_v40, %v7789_v23  ;;  %v7867_v62 = vadd.f32 1.0, %v4460_v45  ;;  %v1349_v23 = vpop.f32.mrf.mxu3 }
 0x357   : > { %v2987_v4 = vmul.f32 %v2724_v16, %v7643_v36  ;;  %v7869_v54 = vadd.f32 1.0, %v4462_v33  ;;  %v2784_v43 = vsel %vm7830_vm5, %v7774_v27, %v2779_v14  ;;  %v2738_v9 = vor.u32 1.1754944e-38, %v2737_v53  ;;  %v1251_v36 = vpop.f32.mrf.mxu1 }
 0x358   : > { %4469 = vrcp.f32 %v7863_v13  ;;  %v7884_v22 = vmul.f32 %v7822_v10, %v7648_v49  ;;  %vm2736_vm13 = vcmp.eq.f32.partialorder %v2735_v46, 8.507059e+37  ;;  %3061 = vst [vmem:[%s6421_s3 + $0x60] sm:$0xff] %v3045_v37  ;;  %v3099_v14 = vadd.f32 %v7653_v50, %v3081_v32 }
 0x359   : > { %v3014_v24 = vpack.c.bf16 %v2987_v4, %v8490_v3  ;;  %4471 = vrcp.f32 %v7867_v62  ;;  %v3165_v27 = vmul.f32 %v7659_v28, %v2995_v59  ;;  %v2739_v53 = vsel %vm2736_vm13, %v2738_v9, %v2734_v34 }
 0x35a   : > { %v4464_v11 = vpop.eup %4463  ;;  %4473 = vrcp.f32 %v7869_v54  ;;  %v7896_v30 = vadd.f32 %v1251_v36, %v6028_v29  ;;  %v7899_v26 = vadd.f32 %v1349_v23, %v6151_v1  ;;  %v2915_v18 = vand.u32 2147483647, %v7853_v51 }
 0x35b   : > { %v4466_v17 = vpop.eup %4465  ;;  %3030 = vst [vmem:[%s6350_s22 + $0x68] sm:$0xff] %v3014_v24  ;;  %v7904_v48 = vmul.f32 %v2784_v43, %v8491_v42  ;;  %v2848_v21 = vsub.f32 1.0, %v7884_v22  ;;  %v7908_v44 = vmul.f32 %v2739_v53, %v7607_v63  ;;  %v2917_v60 = vand.u32 2147483648, %v7853_v51 }
 0x35c   : > { %v4468_v46 = vpop.eup %4467  ;;  %v2907_v0 = vmul.f32 %v4466_v17, %v7853_v51  ;;  %v7913_v1 = vmul.f32 0.00390625, %v3099_v14  ;;  %v7916_v25 = vadd.f32 %v7681_v35, %v3165_v27  ;;  %v7918_v39 = vadd.f32 1.0, %v4464_v11 }
 0x35d   : > { %vm2911_vm10 = vweird.f32 %v7853_v51  ;;  %v3800_v59 = vmul.f32 -1.442695, %v7896_v30  ;;  %v7925_v52 = vmul.f32 -1.442695, %v7899_v26  ;;  %vm2912_vm14 = vweird.f32 %v4466_v17 }
 0x35e   : > { %v7911_v29 = vpop.eup %4469  ;;  %v2908_v8 = vsub.f32 1.0, %v2907_v0  ;;  %vm7927_vm15 = vcmp.eq.f32.partialorder %v2915_v18, 8.507059e+37  ;;  %v2918_v2 = vor.u32 1.1754944e-38, %v2917_v60  ;;  %vm2746_vm0 = vweird.f32 %v7867_v62  ;;  %vm2913_vm1 = vmor %vm2911_vm10, %vm2912_vm14 }
 0x35f   : > { %v4472_v55 = vpop.eup %4471  ;;  %v2802_v63 = vmul.f32 %v7911_v29, %v7863_v13  ;;  %v2750_v20 = vand.u32 2147483647, %v7867_v62  ;;  %v2752_v34 = vand.u32 2147483648, %v7867_v62  ;;  %4475 = vrcp.f32 %v7918_v39 }
 0x360   : > { %v4474_v57 = vpop.eup %4473  ;;  %v2909_v19 = vmul.f32 %v4466_v17, %v2908_v8  ;;  %v2742_v58 = vmul.f32 %v4472_v55, %v7867_v62  ;;  %v7941_v33 = vadd.f32 1.0, %v4468_v46  ;;  %4477 = vpow2.f32 %v3800_v59 }
 0x361   : > { %v2787_v56 = vmul.f32 %v4474_v57, %v7869_v54  ;;  %v2803_v40 = vsub.f32 1.0, %v2802_v63  ;;  %vm2747_vm2 = vweird.f32 %v4472_v55  ;;  %v2797_v37 = vand.u32 2147483648, %v7869_v54 }
 0x362   : > { %v2910_v6 = vadd.f32 %v4466_v17, %v2909_v19  ;;  %v2743_v45 = vsub.f32 1.0, %v2742_v58  ;;  %vm2806_vm3 = vweird.f32 %v7863_v13  ;;  %vm2792_vm5 = vweird.f32 %v4474_v57  ;;  %vm2748_vm7 = vmor %vm2746_vm0, %vm2747_vm2 }
 0x363   : > { %v2788_v31 = vsub.f32 1.0, %v2787_v56  ;;  %v2795_v43 = vand.u32 2147483647, %v7869_v54  ;;  %vm7951_vm4 = vcmp.eq.f32.partialorder %v2750_v20, 8.507059e+37  ;;  %vm2791_vm6 = vweird.f32 %v7869_v54 }
 0x364   : > { %v2914_v32 = vsel %vm2913_vm1, %v4466_v17, %v2910_v6  ;;  %v2744_v16 = vmul.f32 %v4472_v55, %v2743_v45  ;;  %v2804_v3 = vmul.f32 %v7911_v29, %v2803_v40  ;;  %v2753_v24 = vor.u32 1.1754944e-38, %v2752_v34  ;;  %vm2793_vm8 = vmor %vm2791_vm6, %vm2792_vm5 }
 0x365   : > { %v2919_v4 = vsel %vm7927_vm15, %v2918_v2, %v2914_v32  ;;  %v2789_v51 = vmul.f32 %v4474_v57, %v2788_v31  ;;  %4479 = vrcp.f32 %v7941_v33  ;;  %v7961_v14 = vpop.eup %4475  ;;  %v2798_v54 = vor.u32 1.1754944e-38, %v2797_v37 }
 0x366   : > { %v3000_v9 = vmul.f32 %v2919_v4, %v7766_v15  ;;  %v2745_v36 = vadd.f32 %v4472_v55, %v2744_v16  ;;  %v4478_v17 = vpop.eup %4477  ;;  %v2812_v62 = vand.u32 2147483648, %v7863_v13  ;;  %vm2796_vm9 = vcmp.eq.f32.partialorder %v2795_v43, 8.507059e+37 }
 0x367   : > { %v2790_v11 = vadd.f32 %v4474_v57, %v2789_v51  ;;  %v2805_v60 = vadd.f32 %v7911_v29, %v2804_v3  ;;  %vm2807_vm11 = vweird.f32 %v7911_v29  ;;  %v7991_v63 = vadd.f32 1.0, %v4478_v17 }
 0x368   : > { %v3082_v15 = vmul.f32 %v7625_v38, %v3000_v9  ;;  %v3166_v27 = vmul.f32 %v7659_v28, %v3000_v9  ;;  %v2749_v53 = vsel %vm2748_vm7, %v4472_v55, %v2745_v36  ;;  %4481 = vpow2.f32 %v7925_v52  ;;  %vm8007_vm12 = vmor %vm2806_vm3, %vm2807_vm11 }
 0x369   : > { %v2754_v46 = vsel %vm7951_vm4, %v2753_v24, %v2749_v53  ;;  %v2794_v0 = vsel %vm2793_vm8, %v4474_v57, %v2790_v11  ;;  %v2810_v57 = vand.u32 2147483647, %v7863_v13  ;;  %v2827_v7 = vand.u32 2147483648, %v7918_v39 }
 0x36a   : > { %v3100_v38 = vadd.f32 %v7653_v50, %v3082_v15  ;;  %v3184_v28 = vadd.f32 %v7681_v35, %v3166_v27  ;;  %v2989_v18 = vmul.f32 %v2754_v46, %v7805_v12  ;;  %v2799_v42 = vsel %vm2796_vm9, %v2798_v54, %v2794_v0 }
 0x36b   : > { %v2992_v8 = vmul.f32 %v2799_v42, %v7808_v61  ;;  %v2817_v50 = vmul.f32 %v7961_v14, %v7918_v39  ;;  %v7994_v59 = vpop.eup %4479  ;;  %4483 = vrcp.f32 %v7991_v63  ;;  %vm2822_vm13 = vweird.f32 %v7961_v14 }
 0x36c   : > { %v3116_v35 = vmul.f32 0.00390625, %v3100_v38  ;;  %v3944_v12 = vpack.c.bf16 %v3184_v28, %v7916_v25  ;;  %v3046_v55 = vpack.c.bf16 %v2989_v18, %v7908_v44  ;;  %v2813_v52 = vor.u32 1.1754944e-38, %v2812_v62 }
 0x36d   : > { %v3015_v61 = vpack.c.bf16 %v2992_v8, %v7904_v48  ;;  %v2818_v19 = vsub.f32 1.0, %v2817_v50  ;;  %v2809_v48 = vsel %vm8007_vm12, %v7911_v29, %v2805_v60  ;;  %v8027_v58 = vmul.f32 %v7994_v59, %v7941_v33 }
 0x36e   : > { %v3904_v25 = vpack.c.bf16 %v3116_v35, %v7913_v1  ;;  %3959 = vst [vmem:[%s6289_s30 + $0x38] sm:$0xff] %v3944_v12   ;;  %v2825_v1 = vand.u32 2147483647, %v7918_v39  ;;  %v2849_v29 = vmul.f32 %v7822_v10, %v2848_v21  ;;  %vm2811_vm10 = vcmp.eq.f32.partialorder %v2810_v57, 8.507059e+37 }
 0x36f   : > { %3062 = vst [vmem:[%s6421_s3 + $0x68] sm:$0xff] %v3046_v55  ;;  %v2819_v13 = vmul.f32 %v7961_v14, %v2818_v19  ;;  %vm2821_vm14 = vweird.f32 %v7918_v39  ;;  %v2814_v20 = vsel %vm2811_vm10, %v2813_v52, %v2809_v48  ;;  %v2828_v6 = vor.u32 1.1754944e-38, %v2827_v7 }
 0x370   : > { %3952 = vst [vmem:[%s6303_s1 + $0x38] sm:$0xff] %v3904_v25   ;;  %vm8043_vm15 = vmor %vm2821_vm14, %vm2822_vm13  ;;  %s4665_s1 = scalar_lea.hbm %s8498_s10, 256 }
 0x371   : > { %3031 = vst [vmem:[%s6350_s22 + $0x70] sm:$0xff] %v3015_v61  ;;  %v2820_v2 = vadd.f32 %v7961_v14, %v2819_v13  ;;  %p4667_p11 = scmp.lt.s32.totalorder %s4665_s1, %s4661_s12 }
 0x373   : > { %p4668_p12 = por %p4667_p11, %p4666_p10 }
 0x375   : > { %p4669_p13 = pnand %p4668_p12, %p4664_p8 }
 0x377   : > { %4672 = shalt.err (!%p4669_p13)
}
 0x378   : > { %s4854_s21 = smov 64   ;;  %s4855_s17 = smov 4   ;;  %v4482_v22 = vpop.eup %4481  ;;  %v2824_v21 = vsel %vm8043_vm15, %v7961_v14, %v2820_v2  ;;  %vm8068_vm0 = vcmp.eq.f32.partialorder %v2825_v1, 8.507059e+37 }
 0x379   : > { %4003 = dma.vmem_to_hbm [thread:$0]  (%p5024_p5), %s8013_s11, 1024, %s8022_s4, %s8049_s13, %s4854_s21, %s4854_s21, %s4855_s17  }
 0x37a   : > { %s3218_s0 = scalar_lea.sflag [#allocation4], %s5049_s2  ;;  %s4687_s1 = sshra.s32 %s8031_s23, 4  ;;  %s4688_s1 = int_to_ptr.hbm [resolvable:$true] %s4687_s1 }
 0x37b   : > { %s4689_s28 = scalar_lea.hbm %s4688_s1, 64  ;;  %s4693_s11 = scalar_lea.hbm %s8499_s27, 256 }
 0x37c   : > { %p4690_p0 = scmp.ne.s32.totalorder %s4688_s1, %s4689_s28  ;;  %p4694_p9 = scmp.lt.s32.totalorder %s4688_s1, %s8499_s27 }
 0x37d   : > { %p4695_p2 = scmp.lt.s32.totalorder %s4693_s11, %s4689_s28 }
 0x37e   : > { %p4691_p3 = pnand %p4690_p0, %p5024_p5 }
 0x37f   : > { %p4696_p1 = por %p4695_p2, %p4694_p9 }
 0x380   : > { %p4692_p7 = pneg %p4691_p3 }
 0x382   : > { %p4697_p4 = pnand %p4696_p1, %p4692_p7 }
 0x384   : > { %4700 = shalt.err (!%p4697_p4)
}
 0x385   : > { %4002 = dma.vmem_to_hbm [thread:$0]  (%p5024_p5), %s8029_s8, 1024, %s8031_s23, %s3218_s0, %s4854_s21, %s4854_s21, %s4855_s17   ;;  %v4484_v45 = vpop.eup %4483  ;;  %vm2852_vm1 = vweird.f32 %v7822_v10  ;;  %v2878_v34 = vsub.f32 1.0, %v8027_v58  ;;  %v2829_v40 = vsel %vm8068_vm0, %v2828_v6, %v2824_v21  ;;  %v8090_v31 = vadd.f32 1.0, %v4482_v22  ;;  %v8510_v46 = vld [vmem:[#allocation31_spill] sm:$0xff] }
 0x386   : > { %s8507_s9 = sshll.u32 %s8492_s7, 6  ;;  %s8508_s1 = sshll.u32 %s4827_s16, 5  ;;  %v2850_v32 = vadd.f32 %v7822_v10, %v2849_v29  ;;  %v2993_v16 = vmul.f32 %v2814_v20, %v7795_v5  ;;  %v2994_v37 = vmul.f32 %v2829_v40, %v7837_v47  ;;  %v2862_v4 = vmul.f32 %v4484_v45, %v7991_v63 }
 0x387   : > { %s8096_s28 = sadd.s32 %s8508_s1, %s8507_s9  ;;  %v2857_v51 = vand.u32 2147483648, %v7648_v49  ;;  %4485 = vrcp.f32 %v8090_v31  ;;  %vm2851_vm2 = vweird.f32 %v7648_v49  ;;  %v2855_v43 = vand.u32 2147483647, %v7648_v49  ;;  %s8509_s23 = sld [smem:[#allocation47_spill]] }
 0x388   : > { %v3047_v9 = vpack.c.bf16 %v2994_v37, %v2993_v16  ;;  %v2863_v36 = vsub.f32 1.0, %v2862_v4  ;;  %s3817_s16 = sshll.u32 %s8096_s28, 2  ;;  %vm2853_vm3 = vmor %vm2851_vm2, %vm2852_vm1  ;;  %v2879_v5 = vmul.f32 %v7994_v59, %v2878_v34  ;;  %v2872_v47 = vand.u32 2147483648, %v7991_v63  ;;  %s3286_s17 = sshll.u32 %s6350_s22, 4  ;;  %s8137_s17 = int_to_ptr.vmem [resolvable:$true] %s3286_s17 }
 0x389   : > { %v2854_v23 = vsel %vm2853_vm3, %v7822_v10, %v2850_v32  ;;  %vm2867_vm5 = vweird.f32 %v4484_v45  ;;  %v2870_v24 = vand.u32 2147483647, %v7991_v63  ;;  %v2858_v11 = vor.u32 1.1754944e-38, %v2857_v51  ;;  %s8513_s11 = sld [smem:[#allocation48_spill]] }
 0x38a   : > { %3063 = vst [vmem:[%s6421_s3 + $0x70] sm:$0xff] %v3047_v9  ;;  %v2864_v3 = vmul.f32 %v4484_v45, %v2863_v36  ;;  %vm2856_vm4 = vcmp.eq.f32.partialorder %v2855_v43, 8.507059e+37  ;;  %vm2866_vm6 = vweird.f32 %v7991_v63  ;;  %v2880_v10 = vadd.f32 %v7994_v59, %v2879_v5 }
 0x38b   : > { %v2859_v15 = vsel %vm2856_vm4, %v2858_v11, %v2854_v23  ;;  %vm2882_vm7 = vweird.f32 %v7994_v59  ;;  %vm2868_vm8 = vmor %vm2866_vm6, %vm2867_vm5  ;;  %v2873_v27 = vor.u32 1.1754944e-38, %v2872_v47  ;;  %vm2871_vm9 = vcmp.eq.f32.partialorder %v2870_v24, 8.507059e+37 }
 0x38c   : > { %v2865_v49 = vadd.f32 %v4484_v45, %v2864_v3  ;;  %vm2881_vm11 = vweird.f32 %v7941_v33  ;;  %v2887_v17 = vand.u32 2147483648, %v7941_v33  ;;  %v2996_v0 = vmul.f32 %v2859_v15, %v8510_v46 }
 0x38d   : > { %s3285_s21 = scalar_lea.hbm %s8509_s23, %s3817_s16  ;;  %v4486_v14 = vpop.eup %4485  ;;  %vm8127_vm12 = vmor %vm2881_vm11, %vm2882_vm7  ;;  %v2885_v28 = vand.u32 2147483647, %v7941_v33  ;;  %v2902_v8 = vand.u32 2147483648, %v8090_v31  ;;  %v2900_v33 = vand.u32 2147483647, %v8090_v31  ;;  %vm2896_vm14 = vweird.f32 %v8090_v31  ;;  %s4721_s28 = scalar_lea.hbm %s8509_s23, 512 }
 0x38e   : > { %v2869_v53 = vsel %vm2868_vm8, %v4484_v45, %v2865_v49  ;;  %v2892_v54 = vmul.f32 %v4486_v14, %v8090_v31  ;;  %s3288_s0 = sshll.u32 %s3285_s21, 4  ;;  %v2884_v60 = vsel %vm8127_vm12, %v7994_v59, %v2880_v10  ;;  %vm2897_vm13 = vweird.f32 %v4486_v14  ;;  %s8139_s0 = int_to_ptr.hbm [resolvable:$true] %s3288_s0 }
 0x38f   : > { %v2874_v62 = vsel %vm2871_vm9, %v2873_v27, %v2869_v53  ;;  %v2888_v12 = vor.u32 1.1754944e-38, %v2887_v17  ;;  %vm2886_vm10 = vcmp.eq.f32.partialorder %v2885_v28, 8.507059e+37  ;;  %s3305_s4 = scalar_lea.hbm %s8513_s11, %s3817_s16  ;;  %vm8149_vm15 = vmor %vm2896_vm14, %vm2897_vm13  ;;  %v2903_v59 = vor.u32 1.1754944e-38, %v2902_v8  ;;  %s4715_s25 = sshra.s32 %s8139_s0, 4  ;;  %s4716_s25 = int_to_ptr.hbm [resolvable:$true] %s4715_s25 }
 0x390   : > { %v2997_v18 = vmul.f32 %v2874_v62, %v7896_v30  ;;  %v2893_v42 = vsub.f32 1.0, %v2892_v54  ;;  %s4717_s9 = scalar_lea.hbm %s4716_s25, 128  ;;  %p4722_p12 = scmp.lt.s32.totalorder %s4716_s25, %s8509_s23 }
 0x391   : > { %v2889_v55 = vsel %vm2886_vm10, %v2888_v12, %v2884_v60  ;;  %p4718_p8 = scmp.ne.s32.totalorder %s4716_s25, %s4717_s9  ;;  %p4723_p13 = scmp.lt.s32.totalorder %s4721_s28, %s4717_s9 }
 0x392   : > { %v3016_v50 = vpack.c.bf16 %v2997_v18, %v2996_v0  ;;  %v2894_v35 = vmul.f32 %v4486_v14, %v2893_v42 }
 0x393   : > { %p4719_p10 = pnand %p4718_p8, %p5024_p5  ;;  %p4724_p0 = por %p4723_p13, %p4722_p12 }
 0x394   : > { %3032 = vst [vmem:[%s6350_s22 + $0x78] sm:$0xff] %v3016_v50  ;;  %v2895_v30 = vadd.f32 %v4486_v14, %v2894_v35 }
 0x395   : > { %p4720_p11 = pneg %p4719_p10 }
 0x397   : > { %p4725_p3 = pnand %p4724_p0, %p4720_p11 }
 0x399   : > { %4728 = shalt.err (!%p4725_p3)
}
 0x39a   : > { %s4856_s16 = smov 128   ;;  %s4857_s21 = smov 8   ;;  %v2899_v57 = vsel %vm8149_vm15, %v4486_v14, %v2895_v30  ;;  %vm2901_vm0 = vcmp.eq.f32.partialorder %v2900_v33, 8.507059e+37  ;;  %v2998_v19 = vmul.f32 %v2889_v55, %v7828_v41 }
 0x39b   : > { %4004 = dma.vmem_to_hbm [thread:$0]  (%p5024_p5), %s8137_s17, 2048, %s8139_s0, %s8049_s13, %s4856_s16, %s4856_s16, %s4857_s21   ;;  %v2904_v61 = vsel %vm2901_vm0, %v2903_v59, %v2899_v57 }
 0x39c   : > { %s3306_s24 = sshll.u32 %s6421_s3, 4  ;;  %s3308_s12 = sshll.u32 %s3305_s4, 4  ;;  %v2999_v25 = vmul.f32 %v2904_v61, %v7899_v26  ;;  %s3307_s24 = int_to_ptr.vmem [resolvable:$true] %s3306_s24  ;;  %s3309_s12 = int_to_ptr.hbm [resolvable:$true] %s3308_s12 }
 0x39d   : > { %s3233_s25 = scalar_lea.sflag [#allocation16], %s5049_s2  ;;  %s4743_s9 = sshra.s32 %s3309_s12, 4  ;;  %s4744_s9 = int_to_ptr.hbm [resolvable:$true] %s4743_s9 }
 0x39e   : > { %v3048_v44 = vpack.c.bf16 %v2999_v25, %v2998_v19  ;;  %s4745_s13 = scalar_lea.hbm %s4744_s9, 128  ;;  %s4749_s4 = scalar_lea.hbm %s8513_s11, 512 }
 0x39f   : > { %p4746_p7 = scmp.ne.s32.totalorder %s4744_s9, %s4745_s13  ;;  %p4750_p1 = scmp.lt.s32.totalorder %s4744_s9, %s8513_s11 }
 0x3a0   : > { %3064 = vst [vmem:[%s6421_s3 + $0x78] sm:$0xff] %v3048_v44  ;;  %p4751_p4 = scmp.lt.s32.totalorder %s4749_s4, %s4745_s13 }
 0x3a1   : > { %p4747_p9 = pnand %p4746_p7, %p5024_p5 }
 0x3a2   : > { %p4752_p8 = por %p4751_p4, %p4750_p1 }
 0x3a3   : > { %p4748_p2 = pneg %p4747_p9 }
 0x3a5   : > { %p4753_p10 = pnand %p4752_p8, %p4748_p2 }
 0x3a7   : > { %4756 = shalt.err (!%p4753_p10)
}
 0x3a8   : > { %4005 = dma.vmem_to_hbm [thread:$0]  (%p5024_p5), %s3307_s24, 2048, %s3309_s12, %s3233_s25, %s4856_s16, %s4856_s16, %s4857_s21  }
 0x3a9 PF: > { %s8516_s2 = sld [smem:[#allocation23_spill]]  ;;  %p4049_p11 = scmp.ge.s32.totalorder %s4843_s20, 2 }
 0x3ab   : > { %p4028_p12 = pnand %p4049_p11, %p4970_p6 }
 0x3ad   : > { %p4029_p13 = pneg %p4028_p12 }
 0x3af   : > { %s3323_s28 = sand.u32 1, %s8516_s2  }
 0x3b0   : > { %s3324_s7 = scalar_lea.sflag [#allocation4], %s3323_s28 }
 0x3b1   : > { %4802 = dma.done.wait (%p4029_p13), %s3324_s7, 1024  }
 0x3b2   : > { %4804 = vsyncadd (%p4029_p13), %s3324_s7, 4294966272  ;;  %s8518_s8 = sadd.s32 4294967294, %s4843_s20  }
 0x3b3   : > { %s3333_s9 = sand.u32 1, %s8518_s8  }
 0x3b4   : > { %s3334_s30 = scalar_lea.sflag [#allocation13], %s3333_s9 }
 0x3b5   : > { %4806 = dma.done.wait (%p4029_p13), %s3334_s30, 3072  }
 0x3b6   : > { %4808 = vsyncadd (%p4029_p13), %s3334_s30, 4294964224  ;;  %s3354_s13 = scalar_lea.sflag [#allocation16], %s3323_s28 }
 0x3b7   : > { %4810 = dma.done.wait (%p4029_p13), %s3354_s13, 2048  }
 0x3b8   : > { %4812 = vsyncadd (%p4029_p13), %s3354_s13, 4294965248  ;;  %s35_s20 = sadd.s32 1, %s4843_s20   ;;  %s8519_s21 = sld [smem:[#allocation26_spill]] }
 0x3b9   : > { %p32_p5 = scmp.ge.s32.totalorder %s35_s20, 6   ;;  %s8520_s13 = smov %s4819_s14 }
 0x3ba   : > { %s8521_s14 = smov %s4823_s15  ;;  %s8522_s15 = smov %s5037_s26 }
 0x3bb   : > { %s8523_s16 = smov %s4835_s18  ;;  %s8524_s17 = smov %s4839_s19 }
 0x3bc   : > { %s8526_s19 = smov %s8532_s29  ;;  %34 = sbr.rel (!%p32_p5) target bundleno = 23 (0x17), region = 158 }
 0x3be   : > { %s8525_s18 = smov %s8519_s21 }
 0x3c1   :  { %3360 = vsyncpa [#allocation3], 1 }
 0x3c2   :  { %3362 = vsyncpa [#allocation3 + $0x1], 1 }
 0x3c3   :  { %3363 = vsyncpa [#allocation6], 1 }
 0x3c4   :  { %3364 = vsyncpa [#allocation9], 1 }
 0x3c5   :  { %3365 = vsyncpa [#allocation4], 1 }
 0x3c6   :  { %3367 = vsyncpa [#allocation4 + $0x1], 1 }
 0x3c7   :  { %3368 = vsyncpa [#allocation13], 1 }
 0x3c8   :  { %3370 = vsyncpa [#allocation13 + $0x1], 1 }
 0x3c9   :  { %3371 = vsyncpa [#allocation16], 1 }
 0x3ca   :  { %3373 = vsyncpa [#allocation16 + $0x1], 1 }

</bundles_post_ra>
